<compile_context>
chip_gen: v5e
topology: v5e:2x2
jax: 0.10.0
libtpu: 0.0.40
codegen_flags: <defaults>
</compile_context>

<pallas_src>
import math

import jax
import jax.numpy as jnp
from jax.experimental import pallas as pl
from jax.experimental.pallas import tpu as pltpu

LEAKY_SLOPE = 0.2


def _leaky_relu(x, slope=LEAKY_SLOPE):
    # slope in (0,1)  =>  max(x, slope*x) == LeakyReLU(x); pure VPU, no select.
    return jnp.maximum(x, slope * x)


def _disc_kernel(xT_ref, w0_ref, b0_ref, w1_ref, b1_ref, w2_ref, b2_ref, o_ref):
    # xT_ref: (F, bt)  -- batch on the lane axis.
    # w*:     PyTorch-native (out, in).   b*: (out, 1), broadcasts over lanes.
    h = jnp.dot(w0_ref[...], xT_ref[...], preferred_element_type=jnp.float32)
    h = _leaky_relu(h + b0_ref[...])                          # (512, bt)
    h = jnp.dot(w1_ref[...], h, preferred_element_type=jnp.float32)
    h = _leaky_relu(h + b1_ref[...])                          # (256, bt)
    out = jnp.dot(w2_ref[...], h, preferred_element_type=jnp.float32)
    o_ref[...] = (out + b2_ref[...]).astype(o_ref.dtype)      # (1, bt), lane-dense


def discriminator_forward_pallas(x, params, *, batch_tile=None):
    """x: (B, F) row-major, F = 2*prod(img_shape). Returns (B, 1)."""
    w0, b0, w1, b1, w2, b2 = params
    B, F = x.shape
    H0 = w0.shape[0]  # 512
    H1 = w1.shape[0]  # 256

    if batch_tile is None:
        # Largest lane-aligned tile that gives >= 2 grid steps (v7x has 2 TCs),
        # capped at 2048 to keep per-step VMEM ~1 MiB and the pipeline busy.
        batch_tile = B
        for cand in (2048, 1024, 512, 256, 128):
            if B % cand == 0 and B // cand >= 2:
                batch_tile = cand
                break
    assert B % batch_tile == 0 and batch_tile % 128 == 0, (B, batch_tile)

    xT = x.T  # (F, B): wrapper-side layout plumbing so batch sits on lanes.

    flops = 2 * B * (F * H0 + H0 * H1 + H1 * 1)
    bytes_accessed = 4 * (B * F + B + w0.size + b0.size + w1.size + b1.size
                          + w2.size + b2.size)
    cost = pl.CostEstimate(flops=flops, transcendentals=0,
                           bytes_accessed=bytes_accessed)

    out_t = pl.pallas_call(
        _disc_kernel,
        out_shape=jax.ShapeDtypeStruct((1, B), jnp.float32),
        grid_spec=pltpu.PrefetchScalarGridSpec(
            num_scalar_prefetch=0,
            grid=(B // batch_tile,),
            in_specs=[
                pl.BlockSpec((F, batch_tile), lambda i: (0, i)),   # x^T tile
                pl.BlockSpec(w0.shape, lambda i: (0, 0)),          # resident weights
                pl.BlockSpec(b0.shape, lambda i: (0, 0)),
                pl.BlockSpec(w1.shape, lambda i: (0, 0)),
                pl.BlockSpec(b1.shape, lambda i: (0, 0)),
                pl.BlockSpec(w2.shape, lambda i: (0, 0)),
                pl.BlockSpec(b2.shape, lambda i: (0, 0)),
            ],
            out_specs=pl.BlockSpec((1, batch_tile), lambda i: (0, i)),
        ),
        compiler_params=pltpu.CompilerParams(
            dimension_semantics=("parallel",),
        ),
        cost_estimate=cost,
    )(xT, w0, b0, w1, b1, w2, b2)

    return out_t.T  # (B, 1), matching the PyTorch module's output shape


def reference_forward(x, params):
    """Plain-JAX forward mirroring the PyTorch module (weights are (out, in))."""
    w0, b0, w1, b1, w2, b2 = params
    h = _leaky_relu(x @ w0.T + b0.T)
    h = _leaky_relu(h @ w1.T + b1.T)
    return h @ w2.T + b2.T


def discriminator_forward(x, params, *, batch_tile=None):
    """Dispatch: tiny / lane-unaligned batches go straight to fused XLA."""
    B = x.shape[0]
    if B < 256 or B % 128 != 0:
        return reference_forward(x, params)
    return discriminator_forward_pallas(x, params, batch_tile=batch_tile)
    # TODO(synk): optional bf16 weight/activation cast (f32 accumulate) for
    # v6e/v7x MXU throughput; kept f32 here for exact reference comparison.


def init_params(key, img_shape=(1, 8, 8), dtype=jnp.float32):
    """Matches nn.Linear default init: U(-1/sqrt(fan_in), 1/sqrt(fan_in)).
    Weights are PyTorch-native (out, in); biases stored (out, 1)."""
    in_features = 2 * math.prod(img_shape)
    dims = [(512, in_features), (256, 512), (1, 256)]
    params = []
    for fan_out, fan_in in dims:
        key, wk, bk = jax.random.split(key, 3)
        bound = 1.0 / math.sqrt(fan_in)
        w = jax.random.uniform(wk, (fan_out, fan_in), dtype, -bound, bound)
        b = jax.random.uniform(bk, (fan_out, 1), dtype, -bound, bound)
        params.extend([w, b])
    return tuple(params)


if __name__ == "__main__":
    key = jax.random.PRNGKey(0)
    pkey, xkey = jax.random.split(key)

    # Small MNIST-like stand-in: img_shape (1, 8, 8) -> in_features = 2*64 = 128.
    img_shape = (1, 8, 8)
    B = 512  # grid of 2 steps with batch_tile=256 (both v7x TCs get work)

    params = init_params(pkey, img_shape)
    imgs = jax.random.normal(xkey, (B, 2 * math.prod(img_shape)), dtype=jnp.float32)

    out = discriminator_forward(imgs, params, batch_tile=256)
    out = jax.block_until_ready(out)

    ref = reference_forward(imgs, params)
    assert out.shape == (B, 1)
    assert jnp.allclose(out, ref, atol=1e-4, rtol=1e-4)

    print("KERNEL_OK")
</pallas_src>

<mosaic_0001>
module attributes {stable_mosaic.version = 11 : i64} {
  func.func @_disc_kernel(%arg0: i32, %arg1: memref<128x256xf32, #tpu.memory_space<vmem>>, %arg2: memref<512x128xf32, #tpu.memory_space<vmem>>, %arg3: memref<512x1xf32, #tpu.memory_space<vmem>>, %arg4: memref<256x512xf32, #tpu.memory_space<vmem>>, %arg5: memref<256x1xf32, #tpu.memory_space<vmem>>, %arg6: memref<1x256xf32, #tpu.memory_space<vmem>>, %arg7: memref<1x1xf32, #tpu.memory_space<vmem>>, %arg8: memref<1x256xf32, #tpu.memory_space<vmem>>) attributes {dimension_semantics = [#tpu.dimension_semantics<parallel>], iteration_bounds = array<i64: 2>, scalar_prefetch = 0 : i64, scratch_operands = 0 : i64, tpu.core_type = #tpu.core_type<tc>, window_params = [{transform_indices = @transform_0, window_bounds = array<i64: 128, 256>}, {pipeline_mode = #tpu.pipeline_mode<synchronous>, transform_indices = @transform_1, window_bounds = array<i64: 512, 128>}, {pipeline_mode = #tpu.pipeline_mode<synchronous>, transform_indices = @transform_2, window_bounds = array<i64: 512, 1>}, {pipeline_mode = #tpu.pipeline_mode<synchronous>, transform_indices = @transform_3, window_bounds = array<i64: 256, 512>}, {pipeline_mode = #tpu.pipeline_mode<synchronous>, transform_indices = @transform_4, window_bounds = array<i64: 256, 1>}, {pipeline_mode = #tpu.pipeline_mode<synchronous>, transform_indices = @transform_5, window_bounds = array<i64: 1, 256>}, {pipeline_mode = #tpu.pipeline_mode<synchronous>, transform_indices = @transform_6, window_bounds = array<i64: 1, 1>}, {transform_indices = @transform_7, window_bounds = array<i64: 1, 256>}]} {
    %c0 = arith.constant 0 : index
    %c0_0 = arith.constant 0 : index
    %0 = vector.load %arg2[%c0, %c0_0] : memref<512x128xf32, #tpu.memory_space<vmem>>, vector<512x128xf32>
    %c0_1 = arith.constant 0 : index
    %c0_2 = arith.constant 0 : index
    %1 = vector.load %arg1[%c0_1, %c0_2] : memref<128x256xf32, #tpu.memory_space<vmem>>, vector<128x256xf32>
    %cst = arith.constant dense<0.000000e+00> : vector<512x256xf32>
    %2 = tpu.matmul %0, %1, %cst {dimension_numbers = #tpu.dot_dimension_numbers<[1], [0], [0], [1], [0, 0, 1, 1], [], []>} : vector<512x128xf32>, vector<128x256xf32>, vector<512x256xf32> -> vector<512x256xf32>
    %c0_3 = arith.constant 0 : index
    %c0_4 = arith.constant 0 : index
    %3 = vector.load %arg3[%c0_3, %c0_4] : memref<512x1xf32, #tpu.memory_space<vmem>>, vector<512x1xf32>
    %4 = vector.broadcast %3 : vector<512x1xf32> to vector<512x256xf32>
    %5 = arith.addf %2, %4 : vector<512x256xf32>
    %cst_5 = arith.constant 2.000000e-01 : f32
    %6 = vector.broadcast %cst_5 : f32 to vector<512x256xf32>
    %7 = arith.mulf %6, %5 : vector<512x256xf32>
    %8 = arith.maximumf %5, %7 : vector<512x256xf32>
    %c0_6 = arith.constant 0 : index
    %c0_7 = arith.constant 0 : index
    %9 = vector.load %arg4[%c0_6, %c0_7] : memref<256x512xf32, #tpu.memory_space<vmem>>, vector<256x512xf32>
    %cst_8 = arith.constant dense<0.000000e+00> : vector<256x256xf32>
    %10 = tpu.matmul %9, %8, %cst_8 {dimension_numbers = #tpu.dot_dimension_numbers<[1], [0], [0], [1], [0, 0, 1, 1], [], []>} : vector<256x512xf32>, vector<512x256xf32>, vector<256x256xf32> -> vector<256x256xf32>
    %c0_9 = arith.constant 0 : index
    %c0_10 = arith.constant 0 : index
    %11 = vector.load %arg5[%c0_9, %c0_10] : memref<256x1xf32, #tpu.memory_space<vmem>>, vector<256x1xf32>
    %12 = vector.broadcast %11 : vector<256x1xf32> to vector<256x256xf32>
    %13 = arith.addf %10, %12 : vector<256x256xf32>
    %cst_11 = arith.constant 2.000000e-01 : f32
    %14 = vector.broadcast %cst_11 : f32 to vector<256x256xf32>
    %15 = arith.mulf %14, %13 : vector<256x256xf32>
    %16 = arith.maximumf %13, %15 : vector<256x256xf32>
    %c0_12 = arith.constant 0 : index
    %c0_13 = arith.constant 0 : index
    %17 = vector.load %arg6[%c0_12, %c0_13] : memref<1x256xf32, #tpu.memory_space<vmem>>, vector<1x256xf32>
    %cst_14 = arith.constant dense<0.000000e+00> : vector<1x256xf32>
    %18 = tpu.matmul %17, %16, %cst_14 {dimension_numbers = #tpu.dot_dimension_numbers<[1], [0], [0], [1], [0, 0, 1, 1], [], []>} : vector<1x256xf32>, vector<256x256xf32>, vector<1x256xf32> -> vector<1x256xf32>
    %c0_15 = arith.constant 0 : index
    %c0_16 = arith.constant 0 : index
    %19 = vector.load %arg7[%c0_15, %c0_16] : memref<1x1xf32, #tpu.memory_space<vmem>>, vector<1x1xf32>
    %20 = vector.broadcast %19 : vector<1x1xf32> to vector<1x256xf32>
    %21 = arith.addf %18, %20 : vector<1x256xf32>
    %c0_17 = arith.constant 0 : index
    %c0_18 = arith.constant 0 : index
    %22 = vector.load %arg8[%c0_17, %c0_18] : memref<1x256xf32, #tpu.memory_space<vmem>>, vector<1x256xf32>
    tpu.vector_store %arg8[%c0_17, %c0_18], %21 {strides = array<i32>} : memref<1x256xf32, #tpu.memory_space<vmem>>, vector<1x256xf32>,
    return
  }
  func.func @transform_0(%arg0: i32) -> (i32, i32) {
    %c0_i32 = arith.constant 0 : i32
    %c0_i32_0 = arith.constant 0 : i32
    return %c0_i32, %arg0 : i32, i32
  }
  func.func @transform_1(%arg0: i32) -> (i32, i32) {
    %c0_i32 = arith.constant 0 : i32
    %c0_i32_0 = arith.constant 0 : i32
    %c0_i32_1 = arith.constant 0 : i32
    return %c0_i32, %c0_i32_0 : i32, i32
  }
  func.func @transform_2(%arg0: i32) -> (i32, i32) {
    %c0_i32 = arith.constant 0 : i32
    %c0_i32_0 = arith.constant 0 : i32
    %c0_i32_1 = arith.constant 0 : i32
    return %c0_i32, %c0_i32_0 : i32, i32
  }
  func.func @transform_3(%arg0: i32) -> (i32, i32) {
    %c0_i32 = arith.constant 0 : i32
    %c0_i32_0 = arith.constant 0 : i32
    %c0_i32_1 = arith.constant 0 : i32
    return %c0_i32, %c0_i32_0 : i32, i32
  }
  func.func @transform_4(%arg0: i32) -> (i32, i32) {
    %c0_i32 = arith.constant 0 : i32
    %c0_i32_0 = arith.constant 0 : i32
    %c0_i32_1 = arith.constant 0 : i32
    return %c0_i32, %c0_i32_0 : i32, i32
  }
  func.func @transform_5(%arg0: i32) -> (i32, i32) {
    %c0_i32 = arith.constant 0 : i32
    %c0_i32_0 = arith.constant 0 : i32
    %c0_i32_1 = arith.constant 0 : i32
    return %c0_i32, %c0_i32_0 : i32, i32
  }
  func.func @transform_6(%arg0: i32) -> (i32, i32) {
    %c0_i32 = arith.constant 0 : i32
    %c0_i32_0 = arith.constant 0 : i32
    %c0_i32_1 = arith.constant 0 : i32
    return %c0_i32, %c0_i32_0 : i32, i32
  }
  func.func @transform_7(%arg0: i32) -> (i32, i32) {
    %c0_i32 = arith.constant 0 : i32
    %c0_i32_0 = arith.constant 0 : i32
    return %c0_i32, %arg0 : i32, i32
  }
}

</mosaic_0001>

<bundles_post_ra>
// kernel: tpu_custom_call.1
= control target key start
LH: loop header
LB: loop body
LE: loop exit
PB: predicated region body
PF: predicated region fallthrough
CT: control target
= control target key end

     0   :  { %s5635_s0 = inlined_call_operand.vmem [shape: f32[128,512], index: 0, kind: input, shape index: {}]   ;;  %s5636_s1 = inlined_call_operand.hbm [shape: f32[512,128], index: 1, kind: input, shape index: {}]   ;;  %s5637_s2 = inlined_call_operand.vmem [shape: f32[512,1], index: 2, kind: input, shape index: {}]   ;;  %s5638_s3 = inlined_call_operand.hbm [shape: f32[256,512], index: 3, kind: input, shape index: {}]   ;;  %s5639_s4 = inlined_call_operand.vmem [shape: f32[256,1], index: 4, kind: input, shape index: {}]   ;;  %s5640_s5 = inlined_call_operand.vmem [shape: f32[1,256], index: 5, kind: input, shape index: {}]   ;;  %s5641_s6 = inlined_call_operand.<no memory space> [shape: f32[1,1], index: 6, kind: input, shape index: {}]   ;;  %s5642_s7 = inlined_call_operand.hbm [shape: f32[1,512], index: 7, kind: output, shape index: {}]  }
   0x1   :  { %v12_v0 = vstv %s5641_s6 }
   0x2   :  { %13 = vst [vmem:[#allocation2] sm:$0x1] %v12_v0 }
   0x3   :  { %14 = vsyncpa [#allocation5], 0 }
   0x4   :  { %15 = vsyncpa [#allocation8], 0 }
   0x5   :  { %16 = vsyncpa [#allocation6], 0 }
   0x6   :  { %18 = vsyncpa [#allocation6 + $0x1], 0  ;;  %s3413_s26 = smov 0   ;;  %s3415_s27 = smov 0  }
   0x7   :  { %s3417_s28 = smov 0   ;;  %s3419_s29 = smov 0  }
   0x8 LB: > { %s3434_s6 = sadd.s32 4294967295, %s3361_s29   ;;  %s3110_s30 = sadd.s32 4294967294, %s3361_s29   ;;  %s3361_s29 = sphi %s3419_s29, %s6163_s29   ;;  %s3357_s28 = sphi %s3417_s28, %s6162_s28   ;;  %s3353_s27 = sphi %s3415_s27, %s6161_s27   ;;  %s3349_s26 = sphi %s3413_s26, %s6160_s26  }
   0x9   : > { %s3438_s8 = sadd.s32 1, %s3361_s29   ;;  %s31_s9 = sadd.s32 1, %s3357_s28 }
   0xa   : > { %s28_s10 = ssub.s32 %s3361_s29, %s3438_s8  ;;  %p38_p0 = scmp.ne.s32.totalorder %s3357_s28, %s3353_s27 }
   0xb   : > { %p29_p1 = scmp.eq.s32.totalorder %s28_s10, 0  ;;  %p39_p2 = scmp.eq.s32.totalorder %s3361_s29, 0 }
   0xc   : > { %p194_p3 = scmp.eq.s32.totalorder %s3434_s6, 1  ;;  %p199_p4 = scmp.ne.s32.totalorder %s3353_s27, %s3349_s26 }
   0xd   : > { %s3450_s11 = scalar_select %p29_p1, %s3357_s28, %s31_s9  }
   0xe   : > { %p3452_p5 = por %p39_p2, %p38_p0  ;;  %p3456_p6 = por %p194_p3, %p38_p0 }
   0xf   : > { %p200_p7 = scmp.eq.s32.totalorder %s3110_s30, 1  ;;  %p3111_p8 = scmp.ge.s32.totalorder %s3361_s29, 1 }
  0x10   : > { %p207_p9 = scmp.lt.s32.totalorder %s3361_s29, 3  ;;  %p3149_p11 = scmp.eq.s32.totalorder %s3434_s6, 0 }
  0x11   : > { %p3462_p10 = por %p200_p7, %p199_p4  ;;  %s218_s18 = sshll.u32 %s5636_s1, 4  ;;  %s219_s18 = int_to_ptr.hbm [resolvable:$true] %s218_s18 }
  0x12   : > { %p3467_p12 = pnand %p3111_p8, %p207_p9  ;;  %s3363_s19 = smov [#allocation4]  }
  0x13   : > { %s220_s20 = sshll.u32 %s3363_s19, 4  ;;  %s235_s23 = sshll.u32 %s5638_s3, 4  ;;  %s221_s20 = int_to_ptr.vmem [resolvable:$true] %s220_s20  ;;  %s236_s23 = int_to_ptr.hbm [resolvable:$true] %s235_s23 }
  0x14   : > { %p3138_p13 = pneg %p3467_p12  ;;  %s3364_s24 = smov 128  }
  0x15   : > { %s3365_s25 = smov 8   ;;  %s3366_s30 = smov [#allocation7]  }
  0x16   : > { %p3139_p0 = pnand %p3149_p11, %p3138_p13  ;;  %s237_s9 = sshll.u32 %s3366_s30, 4  ;;  %s238_s9 = int_to_ptr.vmem [resolvable:$true] %s237_s9 }
  0x17   : > { %s3367_s10 = smov 512   ;;  %s3368_s16 = smov 32  }
  0x18   : > { %3141 = dma.hbm_to_vmem [thread:$0]  (!%p3139_p0), %s219_s18, 8192, %s221_s20, [#allocation5], %s3364_s24, %s3364_s24, %s3365_s25  }
  0x19   : > { %3144 = dma.hbm_to_vmem [thread:$0]  (!%p3139_p0), %s236_s23, 16384, %s238_s9, [#allocation8], %s3367_s10, %s3367_s10, %s3368_s16  }
  0x1a   : > { %p3114_p1 = scmp.ge.s32.totalorder %s3361_s29, 2 }
  0x1c   : > { %256 = sbr.rel (%p3114_p1) target bundleno = 69 (0x45), region = 40 }
  0x21   : > { %259 = sbr.rel (!%p3452_p5) target bundleno = 69 (0x45), region = 44  ;;  %s261_s17 = sand.u32 (%p3452_p5), 1, %s3357_s28  }
  0x22   : > { %s3127_s19 = sshll.u32 (%p3452_p5), %s3361_s29, 4  ;;  %s3115_s21 = sshll.u32 (%p3452_p5), %s261_s17, 8 }
  0x23   : > { %s3491_s22 = scalar_lea.vmem (%p3452_p5), %s5635_s0, %s3127_s19  ;;  %s3496_s12 = scalar_lea.vmem (%p3452_p5), [#allocation3], %s3115_s21 }
  0x24   : > { %v279_v1 = vld [vmem:[%s3491_s22] sm:$0xff] (%p3452_p5)  ;;  %v281_v2 = vld [vmem:[%s3491_s22 + $0x8] sm:$0xff] (%p3452_p5) }
  0x25   : > { %v283_v3 = vld [vmem:[%s3491_s22 + $0x20] sm:$0xff] (%p3452_p5)  ;;  %280 = vst [vmem:[%s3496_s12] sm:$0xff] (%p3452_p5), %v279_v1  ;;  %v285_v4 = vld [vmem:[%s3491_s22 + $0x28] sm:$0xff] (%p3452_p5) }
  0x26   : > { %282 = vst [vmem:[%s3496_s12 + $0x8] sm:$0xff] %v281_v2  ;;  %v287_v5 = vld [vmem:[%s3491_s22 + $0x40] sm:$0xff]  ;;  %v289_v6 = vld [vmem:[%s3491_s22 + $0x48] sm:$0xff] }
  0x27   : > { %284 = vst [vmem:[%s3496_s12 + $0x10] sm:$0xff] %v283_v3  ;;  %v291_v7 = vld [vmem:[%s3491_s22 + $0x60] sm:$0xff]  ;;  %v293_v8 = vld [vmem:[%s3491_s22 + $0x68] sm:$0xff] }
  0x28   : > { %286 = vst [vmem:[%s3496_s12 + $0x18] sm:$0xff] %v285_v4  ;;  %v295_v9 = vld [vmem:[%s3491_s22 + $0x80] sm:$0xff]  ;;  %v297_v10 = vld [vmem:[%s3491_s22 + $0x88] sm:$0xff] }
  0x29   : > { %288 = vst [vmem:[%s3496_s12 + $0x20] sm:$0xff] %v287_v5  ;;  %v299_v11 = vld [vmem:[%s3491_s22 + $0xa0] sm:$0xff]  ;;  %v301_v12 = vld [vmem:[%s3491_s22 + $0xa8] sm:$0xff] }
  0x2a   : > { %290 = vst [vmem:[%s3496_s12 + $0x28] sm:$0xff] %v289_v6  ;;  %v303_v13 = vld [vmem:[%s3491_s22 + $0xc0] sm:$0xff]  ;;  %v305_v14 = vld [vmem:[%s3491_s22 + $0xc8] sm:$0xff] }
  0x2b   : > { %292 = vst [vmem:[%s3496_s12 + $0x30] sm:$0xff] %v291_v7  ;;  %v307_v15 = vld [vmem:[%s3491_s22 + $0xe0] sm:$0xff]  ;;  %v309_v16 = vld [vmem:[%s3491_s22 + $0xe8] sm:$0xff] }
  0x2c   : > { %294 = vst [vmem:[%s3496_s12 + $0x38] sm:$0xff] %v293_v8  ;;  %v311_v17 = vld [vmem:[%s3491_s22 + $0x100] sm:$0xff]  ;;  %v313_v18 = vld [vmem:[%s3491_s22 + $0x108] sm:$0xff] }
  0x2d   : > { %296 = vst [vmem:[%s3496_s12 + $0x40] sm:$0xff] %v295_v9  ;;  %v315_v19 = vld [vmem:[%s3491_s22 + $0x120] sm:$0xff]  ;;  %v317_v20 = vld [vmem:[%s3491_s22 + $0x128] sm:$0xff] }
  0x2e   : > { %298 = vst [vmem:[%s3496_s12 + $0x48] sm:$0xff] %v297_v10  ;;  %v319_v21 = vld [vmem:[%s3491_s22 + $0x140] sm:$0xff]  ;;  %v321_v22 = vld [vmem:[%s3491_s22 + $0x148] sm:$0xff] }
  0x2f   : > { %300 = vst [vmem:[%s3496_s12 + $0x50] sm:$0xff] %v299_v11  ;;  %v323_v23 = vld [vmem:[%s3491_s22 + $0x160] sm:$0xff]  ;;  %v325_v24 = vld [vmem:[%s3491_s22 + $0x168] sm:$0xff] }
  0x30   : > { %302 = vst [vmem:[%s3496_s12 + $0x58] sm:$0xff] %v301_v12  ;;  %v327_v25 = vld [vmem:[%s3491_s22 + $0x180] sm:$0xff]  ;;  %v329_v26 = vld [vmem:[%s3491_s22 + $0x188] sm:$0xff] }
  0x31   : > { %304 = vst [vmem:[%s3496_s12 + $0x60] sm:$0xff] %v303_v13  ;;  %v331_v27 = vld [vmem:[%s3491_s22 + $0x1a0] sm:$0xff]  ;;  %v333_v28 = vld [vmem:[%s3491_s22 + $0x1a8] sm:$0xff] }
  0x32   : > { %306 = vst [vmem:[%s3496_s12 + $0x68] sm:$0xff] %v305_v14  ;;  %v335_v29 = vld [vmem:[%s3491_s22 + $0x1c0] sm:$0xff]  ;;  %v337_v30 = vld [vmem:[%s3491_s22 + $0x1c8] sm:$0xff] }
  0x33   : > { %308 = vst [vmem:[%s3496_s12 + $0x70] sm:$0xff] %v307_v15  ;;  %v339_v31 = vld [vmem:[%s3491_s22 + $0x1e0] sm:$0xff]  ;;  %v341_v32 = vld [vmem:[%s3491_s22 + $0x1e8] sm:$0xff] }
  0x34   : > { %310 = vst [vmem:[%s3496_s12 + $0x78] sm:$0xff] %v309_v16 }
  0x35   : > { %312 = vst [vmem:[%s3496_s12 + $0x80] sm:$0xff] %v311_v17 }
  0x36   : > { %314 = vst [vmem:[%s3496_s12 + $0x88] sm:$0xff] %v313_v18 }
  0x37   : > { %316 = vst [vmem:[%s3496_s12 + $0x90] sm:$0xff] %v315_v19 }
  0x38   : > { %318 = vst [vmem:[%s3496_s12 + $0x98] sm:$0xff] %v317_v20 }
  0x39   : > { %320 = vst [vmem:[%s3496_s12 + $0xa0] sm:$0xff] %v319_v21 }
  0x3a   : > { %322 = vst [vmem:[%s3496_s12 + $0xa8] sm:$0xff] %v321_v22 }
  0x3b   : > { %324 = vst [vmem:[%s3496_s12 + $0xb0] sm:$0xff] %v323_v23 }
  0x3c   : > { %326 = vst [vmem:[%s3496_s12 + $0xb8] sm:$0xff] %v325_v24 }
  0x3d   : > { %328 = vst [vmem:[%s3496_s12 + $0xc0] sm:$0xff] %v327_v25 }
  0x3e   : > { %330 = vst [vmem:[%s3496_s12 + $0xc8] sm:$0xff] %v329_v26 }
  0x3f   : > { %332 = vst [vmem:[%s3496_s12 + $0xd0] sm:$0xff] %v331_v27 }
  0x40   : > { %334 = vst [vmem:[%s3496_s12 + $0xd8] sm:$0xff] %v333_v28 }
  0x41   : > { %336 = vst [vmem:[%s3496_s12 + $0xe0] sm:$0xff] %v335_v29 }
  0x42   : > { %338 = vst [vmem:[%s3496_s12 + $0xe8] sm:$0xff] %v337_v30 }
  0x43   : > { %340 = vst [vmem:[%s3496_s12 + $0xf0] sm:$0xff] %v339_v31 }
  0x44   : > { %342 = vst [vmem:[%s3496_s12 + $0xf8] sm:$0xff] %v341_v32 }
  0x45 PF: > { %351 = sbr.rel (%p3467_p12) target bundleno = 1597 (0x63d), region = 67 }
  0x4a   : > { %s3562_s23 = sand.u32 1, %s3353_s27  }
  0x4b   : > { %s3119_s24 = sshll.u32 %s3562_s23, 8 }
  0x4c   : > { %s3565_s25 = scalar_lea.vmem [#allocation3], %s3119_s24 }
  0x4d   : > { %3336 = dma.done.wait (%p3149_p11), [#allocation5], 8192  }
  0x4e   : > { %3338 = vsyncadd (%p3149_p11), [#allocation5], 4294959104 }
  0x4f   : > { %3340 = dma.done.wait (%p3149_p11), [#allocation8], 16384  }
  0x50   : > { %3342 = vsyncadd (%p3149_p11), [#allocation8], 4294950912  ;;  %v3369_v33 = vmov 0   ;;  %v524_v34 = vld [vmem:[%s5637_s2 + $0xf8] sm:$0xff]  ;;  %v523_v35 = vld [vmem:[%s5637_s2 + $0xf0] sm:$0xff]  ;;  %s3122_s15 = sshll.u32 %s3562_s23, 1 }
  0x51   : > { %3195 = vset.pattern.permute.xlu2 %v3369_v33  ;;  %3194 = vset.pattern.permute.xlu1 %v3369_v33  ;;  %v508_v36 = vld [vmem:[%s5637_s2 + $0x78] sm:$0xff]  ;;  %v489_v39 = vld [vmem:[%s3565_s25 + $0xe0] sm:$0xff]  ;;  %v490_v40 = vld [vmem:[%s3565_s25 + $0xe8] sm:$0xff]  ;;  %s3124_s30 = sshll.u32 %s3434_s6, 1  ;;  %s394_s16 = scalar_lea.vmem [#allocation9], %s3122_s15  ;;  %vm2999_vm0 = vcmask 1040384  }
  0x52   : > { %3193 = vset.pattern.permute.xlu0 %v3369_v33  ;;  %714 = vperm.xlu1 %3194, %v524_v34   ;;  %v491_v37 = vld [vmem:[%s3565_s25 + $0xf0] sm:$0xff]  ;;  %v492_v38 = vld [vmem:[%s3565_s25 + $0xf8] sm:$0xff]  ;;  %v485_v43 = vld [vmem:[%s3565_s25 + $0xc0] sm:$0xff]  ;;  %s3020_s17 = sshll.u32 %s394_s16, 4  ;;  %s3008_s6 = scalar_lea.sflag [#allocation6], %s3562_s23  ;;  %s3021_s17 = int_to_ptr.vmem [resolvable:$true] %s3020_s17 }
  0x53   : > { %709 = vperm.xlu2 %3195, %v523_v35   ;;  %634 = vperm.xlu0 %3193, %v508_v36   ;;  %v487_v41 = vld [vmem:[%s3565_s25 + $0xd0] sm:$0xff]  ;;  %v488_v42 = vld [vmem:[%s3565_s25 + $0xd8] sm:$0xff]  ;;  %v486_v44 = vld [vmem:[%s3565_s25 + $0xc8] sm:$0xff]  ;;  %s3311_s12 = scalar_lea.hbm %s5642_s7, 4 }
  0x54   : > { %877 = vmatpush.msra.mxu0 %v491_v37  ;;  %1086 = vmatpush.msra.mxu1 %v492_v38  ;;  %v506_v45 = vld [vmem:[%s5637_s2 + $0x68] sm:$0xff]  ;;  %v507_v46 = vld [vmem:[%s5637_s2 + $0x70] sm:$0xff]  ;;  %v505_v47 = vld [vmem:[%s5637_s2 + $0x60] sm:$0xff] }
  0x55   : > { %v483_v48 = vld [vmem:[%s3565_s25 + $0xb0] sm:$0xff]  ;;  %v484_v49 = vld [vmem:[%s3565_s25 + $0xb8] sm:$0xff]  ;;  %v481_v50 = vld [vmem:[%s3565_s25 + $0xa0] sm:$0xff] }
  0x56   : > { %878 = vmatpush.msra.mxu0 %v489_v39  ;;  %1087 = vmatpush.msra.mxu1 %v490_v40  ;;  %v482_v51 = vld [vmem:[%s3565_s25 + $0xa8] sm:$0xff]  ;;  %v479_v52 = vld [vmem:[%s3565_s25 + $0x90] sm:$0xff]  ;;  %v480_v53 = vld [vmem:[%s3565_s25 + $0x98] sm:$0xff] }
  0x57   : > { %v477_v54 = vld [vmem:[%s3565_s25 + $0x80] sm:$0xff]  ;;  %v478_v55 = vld [vmem:[%s3565_s25 + $0x88] sm:$0xff]  ;;  %v504_v58 = vld [vmem:[%s5637_s2 + $0x58] sm:$0xff] }
  0x58   : > { %879 = vmatpush.msra.mxu0 %v487_v41  ;;  %1088 = vmatpush.msra.mxu1 %v488_v42  ;;  %v522_v56 = vld [vmem:[%s5637_s2 + $0xe8] sm:$0xff]  ;;  %v521_v57 = vld [vmem:[%s5637_s2 + $0xe0] sm:$0xff]  ;;  %v475_v59 = vld [vmem:[%s3565_s25 + $0x70] sm:$0xff] }
  0x59   : > { %v476_v60 = vld [vmem:[%s3565_s25 + $0x78] sm:$0xff]  ;;  %v473_v61 = vld [vmem:[%s3565_s25 + $0x60] sm:$0xff]  ;;  %v474_v62 = vld [vmem:[%s3565_s25 + $0x68] sm:$0xff] }
  0x5a   : > { %880 = vmatpush.msra.mxu0 %v485_v43  ;;  %1089 = vmatpush.msra.mxu1 %v486_v44  ;;  %v471_v63 = vld [vmem:[%s3565_s25 + $0x50] sm:$0xff]  ;;  %v472_v0 = vld [vmem:[%s3565_s25 + $0x58] sm:$0xff]  ;;  %v469_v1 = vld [vmem:[%s3565_s25 + $0x40] sm:$0xff] }
  0x5b   : > { %624 = vperm.xlu1 %3194, %v506_v45   ;;  %629 = vperm.xlu0 %3193, %v507_v46   ;;  %v470_v2 = vld [vmem:[%s3565_s25 + $0x48] sm:$0xff]  ;;  %v520_v4 = vld [vmem:[%s5637_s2 + $0xd8] sm:$0xff]  ;;  %v465_v8 = vld [vmem:[%s3565_s25 + $0x20] sm:$0xff] }
  0x5c   : > { %619 = vperm.xlu2 %3195, %v505_v47   ;;  %881 = vmatpush.msra.mxu0 %v483_v48  ;;  %v503_v3 = vld [vmem:[%s5637_s2 + $0x50] sm:$0xff]  ;;  %v502_v5 = vld [vmem:[%s5637_s2 + $0x48] sm:$0xff]  ;;  %v468_v7 = vld [vmem:[%s3565_s25 + $0x38] sm:$0xff] }
  0x5d   : > { %1090 = vmatpush.msra.mxu1 %v484_v49  ;;  %v467_v6 = vld [vmem:[%s3565_s25 + $0x30] sm:$0xff]  ;;  %v466_v9 = vld [vmem:[%s3565_s25 + $0x28] sm:$0xff]  ;;  %v464_v11 = vld [vmem:[%s3565_s25 + $0x18] sm:$0xff] }
  0x5e   : > { %882 = vmatpush.msra.mxu0 %v481_v50  ;;  %v463_v10 = vld [vmem:[%s3565_s25 + $0x10] sm:$0xff]  ;;  %v461_v12 = vld [vmem:[%s3565_s25] sm:$0xff]  ;;  %v462_v13 = vld [vmem:[%s3565_s25 + $0x8] sm:$0xff]  ;;  %s3018_s25 = scalar_lea.hbm %s5642_s7, %s3124_s30 }
  0x5f   : > { %1091 = vmatpush.msra.mxu1 %v482_v51  ;;  %v397_v14 = vld [vmem:[#allocation4] sm:$0xff]  ;;  %v519_v15 = vld [vmem:[%s5637_s2 + $0xd0] sm:$0xff]  ;;  %v500_v19 = vld [vmem:[%s5637_s2 + $0x38] sm:$0xff]  ;;  %s3022_s19 = sshll.u32 %s3018_s25, 4  ;;  %s3023_s19 = int_to_ptr.hbm [resolvable:$true] %s3022_s19 }
  0x60   : > { %883 = vmatpush.msra.mxu0 %v479_v52  ;;  %v518_v16 = vld [vmem:[%s5637_s2 + $0xc8] sm:$0xff]  ;;  %v501_v17 = vld [vmem:[%s5637_s2 + $0x40] sm:$0xff]  ;;  %v499_v20 = vld [vmem:[%s5637_s2 + $0x30] sm:$0xff]  ;;  %s3305_s21 = sshra.s32 %s3023_s19, 4  ;;  %s3306_s21 = int_to_ptr.hbm [resolvable:$true] %s3305_s21 }
  0x61   : > { %1092 = vmatpush.msra.mxu1 %v480_v53  ;;  %v398_v18 = vld [vmem:[#allocation4 + $0x8] sm:$0xff]  ;;  %v517_v21 = vld [vmem:[%s5637_s2 + $0xc0] sm:$0xff]  ;;  %v399_v22 = vld [vmem:[#allocation4 + $0x10] sm:$0xff]  ;;  %s3307_s18 = scalar_lea.hbm %s3306_s21, 2  ;;  %p3312_p5 = scmp.lt.s32.totalorder %s3306_s21, %s5642_s7 }
  0x62   : > { %884 = vmatpush.msra.mxu0 %v477_v54  ;;  %v516_v23 = vld [vmem:[%s5637_s2 + $0xb8] sm:$0xff]  ;;  %v515_v24 = vld [vmem:[%s5637_s2 + $0xb0] sm:$0xff]  ;;  %v498_v25 = vld [vmem:[%s5637_s2 + $0x28] sm:$0xff]  ;;  %p3308_p2 = scmp.ne.s32.totalorder %s3306_s21, %s3307_s18  ;;  %p3313_p7 = scmp.lt.s32.totalorder %s3311_s12, %s3307_s18 }
  0x63   : > { %1093 = vmatpush.msra.mxu1 %v478_v55  ;;  %704 = vperm.xlu0 %3193, %v522_v56   ;;  %v400_v26 = vld [vmem:[#allocation4 + $0x18] sm:$0xff]  ;;  %v514_v29 = vld [vmem:[%s5637_s2 + $0xa8] sm:$0xff]  ;;  %v495_v33 = vld [vmem:[%s5637_s2 + $0x10] sm:$0xff] }
  0x64   : > { %699 = vperm.xlu2 %3195, %v521_v57   ;;  %614 = vperm.xlu1 %3194, %v504_v58   ;;  %v497_v27 = vld [vmem:[%s5637_s2 + $0x20] sm:$0xff]  ;;  %v496_v28 = vld [vmem:[%s5637_s2 + $0x18] sm:$0xff]  ;;  %v402_v34 = vld [vmem:[#allocation4 + $0x28] sm:$0xff]  ;;  %p3309_p3 = pnand %p3308_p2, %p3456_p6  ;;  %p3314_p8 = por %p3313_p7, %p3312_p5 }
  0x65   : > { %885 = vmatpush.msra.mxu0 %v475_v59  ;;  %1094 = vmatpush.msra.mxu1 %v476_v60  ;;  %v401_v30 = vld [vmem:[#allocation4 + $0x20] sm:$0xff]  ;;  %v512_v32 = vld [vmem:[%s5637_s2 + $0x98] sm:$0xff]  ;;  %v511_v37 = vld [vmem:[%s5637_s2 + $0x90] sm:$0xff] }
  0x66   : > { %v513_v31 = vld [vmem:[%s5637_s2 + $0xa0] sm:$0xff]  ;;  %v494_v35 = vld [vmem:[%s5637_s2 + $0x8] sm:$0xff]  ;;  %v403_v38 = vld [vmem:[#allocation4 + $0x30] sm:$0xff]  ;;  %p3310_p4 = pneg %p3309_p3 }
  0x67   : > { %886 = vmatpush.msra.mxu0 %v473_v61  ;;  %1095 = vmatpush.msra.mxu1 %v474_v62  ;;  %v493_v36 = vld [vmem:[%s5637_s2] sm:$0xff]  ;;  %v510_v39 = vld [vmem:[%s5637_s2 + $0x88] sm:$0xff]  ;;  %v540_v40 = vld [vmem:[%s5637_s2 + $0x178] sm:$0xff] }
  0x68   : > { %v509_v41 = vld [vmem:[%s5637_s2 + $0x80] sm:$0xff]  ;;  %v539_v43 = vld [vmem:[%s5637_s2 + $0x170] sm:$0xff]  ;;  %v538_v44 = vld [vmem:[%s5637_s2 + $0x168] sm:$0xff]  ;;  %p3315_p9 = pnand %p3314_p8, %p3310_p4 }
  0x69   : > { %887 = vmatpush.msra.mxu0 %v471_v63  ;;  %1096 = vmatpush.msra.mxu1 %v472_v0  ;;  %v404_v42 = vld [vmem:[#allocation4 + $0x38] sm:$0xff]  ;;  %v405_v46 = vld [vmem:[#allocation4 + $0x40] sm:$0xff]  ;;  %v555_v47 = vld [vmem:[%s5637_s2 + $0x1f0] sm:$0xff] }
  0x6a   : > { %v556_v45 = vld [vmem:[%s5637_s2 + $0x1f8] sm:$0xff]  ;;  %v554_v48 = vld [vmem:[%s5637_s2 + $0x1e8] sm:$0xff]  ;;  %v537_v49 = vld [vmem:[%s5637_s2 + $0x160] sm:$0xff] }
  0x6b   : > { %888 = vmatpush.msra.mxu0 %v469_v1  ;;  %1097 = vmatpush.msra.mxu1 %v470_v2  ;;  %v406_v50 = vld [vmem:[#allocation4 + $0x48] sm:$0xff]  ;;  %v536_v51 = vld [vmem:[%s5637_s2 + $0x158] sm:$0xff]  ;;  %v553_v53 = vld [vmem:[%s5637_s2 + $0x1e0] sm:$0xff] }
  0x6c   : > { %609 = vperm.xlu0 %3193, %v503_v3   ;;  %694 = vperm.xlu1 %3194, %v520_v4   ;;  %v535_v52 = vld [vmem:[%s5637_s2 + $0x150] sm:$0xff]  ;;  %v552_v55 = vld [vmem:[%s5637_s2 + $0x1d8] sm:$0xff]  ;;  %v534_v57 = vld [vmem:[%s5637_s2 + $0x148] sm:$0xff] }
  0x6d   : > { %604 = vperm.xlu2 %3195, %v502_v5   ;;  %889 = vmatpush.msra.mxu0 %v467_v6  ;;  %v407_v54 = vld [vmem:[#allocation4 + $0x50] sm:$0xff]  ;;  %v408_v58 = vld [vmem:[#allocation4 + $0x58] sm:$0xff]  ;;  %v550_v61 = vld [vmem:[%s5637_s2 + $0x1c8] sm:$0xff] }
  0x6e   : > { %1098 = vmatpush.msra.mxu1 %v468_v7  ;;  %v551_v56 = vld [vmem:[%s5637_s2 + $0x1d0] sm:$0xff]  ;;  %v533_v59 = vld [vmem:[%s5637_s2 + $0x140] sm:$0xff]  ;;  %v532_v60 = vld [vmem:[%s5637_s2 + $0x138] sm:$0xff] }
  0x6f   : > { %890 = vmatpush.msra.mxu0 %v465_v8  ;;  %v409_v62 = vld [vmem:[#allocation4 + $0x60] sm:$0xff]  ;;  %v548_v0 = vld [vmem:[%s5637_s2 + $0x1b8] sm:$0xff]  ;;  %v531_v1 = vld [vmem:[%s5637_s2 + $0x130] sm:$0xff] }
  0x70   : > { %1099 = vmatpush.msra.mxu1 %v466_v9  ;;  %v549_v63 = vld [vmem:[%s5637_s2 + $0x1c0] sm:$0xff]  ;;  %v410_v2 = vld [vmem:[#allocation4 + $0x68] sm:$0xff]  ;;  %v411_v6 = vld [vmem:[#allocation4 + $0x70] sm:$0xff] }
  0x71   : > { %891 = vmatpush.msra.mxu0 %v463_v10  ;;  %v530_v3 = vld [vmem:[%s5637_s2 + $0x128] sm:$0xff]  ;;  %v529_v4 = vld [vmem:[%s5637_s2 + $0x120] sm:$0xff]  ;;  %v547_v5 = vld [vmem:[%s5637_s2 + $0x1b0] sm:$0xff] }
  0x72   : > { %1100 = vmatpush.msra.mxu1 %v464_v11  ;;  %v546_v7 = vld [vmem:[%s5637_s2 + $0x1a8] sm:$0xff]  ;;  %v545_v8 = vld [vmem:[%s5637_s2 + $0x1a0] sm:$0xff]  ;;  %v528_v9 = vld [vmem:[%s5637_s2 + $0x118] sm:$0xff] }
  0x73   : > { %892 = vmatpush.msra.mxu0 %v461_v12  ;;  %v412_v10 = vld [vmem:[#allocation4 + $0x78] sm:$0xff]  ;;  %v527_v11 = vld [vmem:[%s5637_s2 + $0x110] sm:$0xff]  ;;  %v526_v12 = vld [vmem:[%s5637_s2 + $0x108] sm:$0xff] }
  0x74   : > { %1101 = vmatpush.msra.mxu1 %v462_v13  ;;  %893 = vmatmul.f32.vlgmr.msra.gmra.mxu0 %v397_v14  ;;  %v544_v13 = vld [vmem:[%s5637_s2 + $0x198] sm:$0xff] }
  0x75   : > { %1102 = vmatmul.f32.vlgmr.msra.gmra.mxu1 %v397_v14  ;;  %689 = vperm.xlu0 %3193, %v519_v15  }
  0x76   : > { %684 = vperm.xlu2 %3195, %v518_v16   ;;  %599 = vperm.xlu1 %3194, %v501_v17   ;;  %v413_v16 = vld [vmem:[#allocation4 + $0x80] sm:$0xff]  ;;  %v543_v17 = vld [vmem:[%s5637_s2 + $0x190] sm:$0xff] }
  0x7c   : > { %896 = vmatmul.f32.gmra.mxu0 %v398_v18 }
  0x7d   : > { %1105 = vmatmul.f32.gmra.mxu1 %v398_v18  ;;  %594 = vperm.xlu0 %3193, %v500_v19   ;;  %v542_v18 = vld [vmem:[%s5637_s2 + $0x188] sm:$0xff]  ;;  %v525_v19 = vld [vmem:[%s5637_s2 + $0x100] sm:$0xff] }
  0x7e   : > { %589 = vperm.xlu2 %3195, %v499_v20   ;;  %679 = vperm.xlu1 %3194, %v517_v21  }
  0x84   : > { %899 = vmatmul.f32.gmra.mxu0 %v399_v22 }
  0x85   : > { %1108 = vmatmul.f32.gmra.mxu1 %v399_v22  ;;  %674 = vperm.xlu0 %3193, %v516_v23   ;;  %v414_v22 = vld [vmem:[#allocation4 + $0x88] sm:$0xff]  ;;  %v541_v23 = vld [vmem:[%s5637_s2 + $0x180] sm:$0xff] }
  0x86   : > { %669 = vperm.xlu2 %3195, %v515_v24   ;;  %584 = vperm.xlu1 %3194, %v498_v25   ;;  %v1693_v24 = vld [vmem:[%s5639_s4 + $0x70] sm:$0xff]  ;;  %v1694_v25 = vld [vmem:[%s5639_s4 + $0x78] sm:$0xff] }
  0x8c   : > { %902 = vmatmul.f32.gmra.mxu0 %v400_v26 }
  0x8d   : > { %1111 = vmatmul.f32.gmra.mxu1 %v400_v26  ;;  %579 = vperm.xlu0 %3193, %v497_v27  }
  0x8e   : > { %574 = vperm.xlu2 %3195, %v496_v28   ;;  %664 = vperm.xlu1 %3194, %v514_v29   ;;  %v415_v28 = vld [vmem:[#allocation4 + $0x90] sm:$0xff] }
  0x8f   : > { %v1710_v29 = vld [vmem:[%s5639_s4 + $0xf8] sm:$0xff] }
  0x94   : > { %905 = vmatmul.f32.gmra.mxu0 %v401_v30 }
  0x95   : > { %1114 = vmatmul.f32.gmra.mxu1 %v401_v30  ;;  %659 = vperm.xlu0 %3193, %v513_v31   ;;  %v1709_v30 = vld [vmem:[%s5639_s4 + $0xf0] sm:$0xff]  ;;  %v1692_v31 = vld [vmem:[%s5639_s4 + $0x68] sm:$0xff] }
  0x96   : > { %654 = vperm.xlu2 %3195, %v512_v32   ;;  %569 = vperm.xlu1 %3194, %v495_v33  }
  0x9c   : > { %908 = vmatmul.f32.gmra.mxu0 %v402_v34 }
  0x9d   : > { %1117 = vmatmul.f32.gmra.mxu1 %v402_v34  ;;  %564 = vperm.xlu0 %3193, %v494_v35   ;;  %v416_v34 = vld [vmem:[#allocation4 + $0x98] sm:$0xff] }
  0x9e   : > { %559 = vperm.xlu2 %3195, %v493_v36   ;;  %649 = vperm.xlu1 %3194, %v511_v37   ;;  %v1691_v35 = vld [vmem:[%s5639_s4 + $0x60] sm:$0xff]  ;;  %v1690_v36 = vld [vmem:[%s5639_s4 + $0x58] sm:$0xff]  ;;  %v1708_v37 = vld [vmem:[%s5639_s4 + $0xe8] sm:$0xff] }
  0xa4   : > { %911 = vmatmul.f32.gmra.mxu0 %v403_v38 }
  0xa5   : > { %1120 = vmatmul.f32.gmra.mxu1 %v403_v38  ;;  %644 = vperm.xlu0 %3193, %v510_v39  }
  0xa6   : > { %794 = vperm.xlu2 %3195, %v540_v40   ;;  %639 = vperm.xlu1 %3194, %v509_v41   ;;  %v417_v40 = vld [vmem:[#allocation4 + $0xa0] sm:$0xff] }
  0xa7   : > { %v1707_v41 = vld [vmem:[%s5639_s4 + $0xe0] sm:$0xff] }
  0xac   : > { %914 = vmatmul.f32.gmra.mxu0 %v404_v42 }
  0xad   : > { %1123 = vmatmul.f32.gmra.mxu1 %v404_v42  ;;  %789 = vperm.xlu0 %3193, %v539_v43   ;;  %v1706_v42 = vld [vmem:[%s5639_s4 + $0xd8] sm:$0xff]  ;;  %v1689_v43 = vld [vmem:[%s5639_s4 + $0x50] sm:$0xff] }
  0xae   : > { %784 = vperm.xlu2 %3195, %v538_v44   ;;  %874 = vperm.xlu1 %3194, %v556_v45  }
  0xb4   : > { %917 = vmatmul.f32.gmra.mxu0 %v405_v46 }
  0xb5   : > { %1126 = vmatmul.f32.gmra.mxu1 %v405_v46  ;;  %869 = vperm.xlu0 %3193, %v555_v47   ;;  %v418_v46 = vld [vmem:[#allocation4 + $0xa8] sm:$0xff] }
  0xb6   : > { %864 = vperm.xlu2 %3195, %v554_v48   ;;  %779 = vperm.xlu1 %3194, %v537_v49   ;;  %v1688_v47 = vld [vmem:[%s5639_s4 + $0x48] sm:$0xff]  ;;  %v1687_v48 = vld [vmem:[%s5639_s4 + $0x40] sm:$0xff]  ;;  %v1705_v49 = vld [vmem:[%s5639_s4 + $0xd0] sm:$0xff] }
  0xbc   : > { %920 = vmatmul.f32.gmra.mxu0 %v406_v50 }
  0xbd   : > { %1129 = vmatmul.f32.gmra.mxu1 %v406_v50  ;;  %774 = vperm.xlu0 %3193, %v536_v51  }
  0xbe   : > { %769 = vperm.xlu2 %3195, %v535_v52   ;;  %859 = vperm.xlu1 %3194, %v553_v53   ;;  %v419_v52 = vld [vmem:[#allocation4 + $0xb0] sm:$0xff]  ;;  %v1704_v53 = vld [vmem:[%s5639_s4 + $0xc8] sm:$0xff] }
  0xc4   : > { %923 = vmatmul.f32.gmra.mxu0 %v407_v54 }
  0xc5   : > { %1132 = vmatmul.f32.gmra.mxu1 %v407_v54  ;;  %854 = vperm.xlu0 %3193, %v552_v55   ;;  %v1703_v54 = vld [vmem:[%s5639_s4 + $0xc0] sm:$0xff]  ;;  %v1686_v55 = vld [vmem:[%s5639_s4 + $0x38] sm:$0xff] }
  0xc6   : > { %849 = vperm.xlu2 %3195, %v551_v56   ;;  %764 = vperm.xlu1 %3194, %v534_v57   ;;  %v3878_v56 = vpop.permute.xlu0 %634  ;;  %v3880_v57 = vpop.permute.xlu2 %709 }
  0xcc   : > { %926 = vmatmul.f32.gmra.mxu0 %v408_v58 }
  0xcd   : > { %1135 = vmatmul.f32.gmra.mxu1 %v408_v58  ;;  %759 = vperm.xlu0 %3193, %v533_v59  }
  0xce   : > { %754 = vperm.xlu2 %3195, %v532_v60   ;;  %844 = vperm.xlu1 %3194, %v550_v61   ;;  %v420_v60 = vld [vmem:[#allocation4 + $0xb8] sm:$0xff]  ;;  %v1685_v61 = vld [vmem:[%s5639_s4 + $0x30] sm:$0xff] }
  0xd4   : > { %929 = vmatmul.f32.gmra.mxu0 %v409_v62 }
  0xd5   : > { %1138 = vmatmul.f32.gmra.mxu1 %v409_v62  ;;  %839 = vperm.xlu0 %3193, %v549_v63   ;;  %v1684_v62 = vld [vmem:[%s5639_s4 + $0x28] sm:$0xff]  ;;  %v1702_v63 = vld [vmem:[%s5639_s4 + $0xb8] sm:$0xff] }
  0xd6   : > { %834 = vperm.xlu2 %3195, %v548_v0   ;;  %749 = vperm.xlu1 %3194, %v531_v1   ;;  %v3895_v0 = vpop.permute.xlu1 %714  ;;  %v3897_v1 = vpop.permute.xlu0 %629 }
  0xdc   : > { %932 = vmatmul.f32.gmra.mxu0 %v410_v2 }
  0xdd   : > { %1141 = vmatmul.f32.gmra.mxu1 %v410_v2  ;;  %744 = vperm.xlu0 %3193, %v530_v3   ;;  %v3899_v2 = vpop.permute.xlu2 %619 }
  0xde   : > { %739 = vperm.xlu2 %3195, %v529_v4   ;;  %829 = vperm.xlu1 %3194, %v547_v5   ;;  %v421_v5 = vld [vmem:[#allocation4 + $0xc0] sm:$0xff] }
  0xe4   : > { %935 = vmatmul.f32.gmra.mxu0 %v411_v6 }
  0xe5   : > { %1144 = vmatmul.f32.gmra.mxu1 %v411_v6  ;;  %824 = vperm.xlu0 %3193, %v546_v7   ;;  %v1701_v6 = vld [vmem:[%s5639_s4 + $0xb0] sm:$0xff]  ;;  %v1700_v7 = vld [vmem:[%s5639_s4 + $0xa8] sm:$0xff] }
  0xe6   : > { %819 = vperm.xlu2 %3195, %v545_v8   ;;  %734 = vperm.xlu1 %3194, %v528_v9   ;;  %v1683_v8 = vld [vmem:[%s5639_s4 + $0x20] sm:$0xff]  ;;  %v3914_v9 = vpop.permute.xlu1 %624 }
  0xec   : > { %938 = vmatmul.f32.gmra.mxu0 %v412_v10 }
  0xed   : > { %1147 = vmatmul.f32.gmra.mxu1 %v412_v10  ;;  %729 = vperm.xlu0 %3193, %v527_v11   ;;  %v3916_v10 = vpop.permute.xlu0 %704 }
  0xee   : > { %724 = vperm.xlu2 %3195, %v526_v12   ;;  %814 = vperm.xlu1 %3194, %v544_v13   ;;  %v422_v13 = vld [vmem:[#allocation4 + $0xc8] sm:$0xff] }
  0xf1   : > { %v3787_v14 = vpop.f32.mrf.mxu0 }
  0xf2   : > { %v3789_v15 = vpop.f32.mrf.mxu1 }
  0xf4   : > { %941 = vmatmul.f32.gmra.mxu0 %v413_v16 }
  0xf5   : > { %1150 = vmatmul.f32.gmra.mxu1 %v413_v16  ;;  %809 = vperm.xlu0 %3193, %v543_v17   ;;  %v3922_v16 = vpop.permute.xlu2 %699  ;;  %v1682_v17 = vld [vmem:[%s5639_s4 + $0x18] sm:$0xff] }
  0xf6   : > { %804 = vperm.xlu2 %3195, %v542_v18   ;;  %719 = vperm.xlu1 %3194, %v525_v19   ;;  %v1681_v18 = vld [vmem:[%s5639_s4 + $0x10] sm:$0xff]  ;;  %v1699_v19 = vld [vmem:[%s5639_s4 + $0xa0] sm:$0xff] }
  0xf9   : > { %v3800_v20 = vpop.f32.mrf.mxu0 }
  0xfa   : > { %v3802_v21 = vpop.f32.mrf.mxu1 }
  0xfc   : > { %944 = vmatmul.f32.gmra.mxu0 %v414_v22 }
  0xfd   : > { %1153 = vmatmul.f32.gmra.mxu1 %v414_v22  ;;  %799 = vperm.xlu0 %3193, %v541_v23   ;;  %v3933_v22 = vpop.permute.xlu1 %614 }
  0xfe   : > { %1783 = vperm.xlu2 %3195, %v1693_v24   ;;  %1788 = vperm.xlu1 %3194, %v1694_v25   ;;  %v423_v25 = vld [vmem:[#allocation4 + $0xd0] sm:$0xff] }
 0x101   : > { %v3813_v26 = vpop.f32.mrf.mxu0 }
 0x102   : > { %v3815_v27 = vpop.f32.mrf.mxu1 }
 0x104   : > { %947 = vmatmul.f32.gmra.mxu0 %v415_v28 }
 0x105   : > { %1156 = vmatmul.f32.gmra.mxu1 %v415_v28  ;;  %1868 = vperm.xlu0 %3193, %v1710_v29   ;;  %v3939_v28 = vpop.permute.xlu0 %609  ;;  %v1698_v29 = vld [vmem:[%s5639_s4 + $0x98] sm:$0xff] }
 0x106   : > { %1863 = vperm.xlu2 %3195, %v1709_v30   ;;  %1778 = vperm.xlu1 %3194, %v1692_v31   ;;  %v1697_v30 = vld [vmem:[%s5639_s4 + $0x90] sm:$0xff]  ;;  %v1680_v31 = vld [vmem:[%s5639_s4 + $0x8] sm:$0xff] }
 0x109   : > { %v3826_v32 = vpop.f32.mrf.mxu0 }
 0x10a   : > { %v3828_v33 = vpop.f32.mrf.mxu1 }
 0x10c   : > { %950 = vmatmul.f32.gmra.mxu0 %v416_v34 }
 0x10d   : > { %1159 = vmatmul.f32.gmra.mxu1 %v416_v34  ;;  %1773 = vperm.xlu0 %3193, %v1691_v35   ;;  %v3950_v34 = vpop.permute.xlu2 %604 }
 0x10e   : > { %1768 = vperm.xlu2 %3195, %v1690_v36   ;;  %1858 = vperm.xlu1 %3194, %v1708_v37   ;;  %v424_v37 = vld [vmem:[#allocation4 + $0xd8] sm:$0xff] }
 0x111   : > { %v3839_v38 = vpop.f32.mrf.mxu0 }
 0x112   : > { %v3841_v39 = vpop.f32.mrf.mxu1 }
 0x114   : > { %953 = vmatmul.f32.gmra.mxu0 %v417_v40 }
 0x115   : > { %1162 = vmatmul.f32.gmra.mxu1 %v417_v40  ;;  %1853 = vperm.xlu0 %3193, %v1707_v41   ;;  %v3954_v40 = vpop.permute.xlu1 %694  ;;  %v1679_v41 = vld [vmem:[%s5639_s4] sm:$0xff] }
 0x116   : > { %1848 = vperm.xlu2 %3195, %v1706_v42   ;;  %1763 = vperm.xlu1 %3194, %v1689_v43   ;;  %v1695_v42 = vld [vmem:[%s5639_s4 + $0x80] sm:$0xff]  ;;  %v1696_v43 = vld [vmem:[%s5639_s4 + $0x88] sm:$0xff] }
 0x119   : > { %v3852_v44 = vpop.f32.mrf.mxu0 }
 0x11a   : > { %v3854_v45 = vpop.f32.mrf.mxu1 }
 0x11c   : > { %956 = vmatmul.f32.gmra.mxu0 %v418_v46 }
 0x11d   : > { %1165 = vmatmul.f32.gmra.mxu1 %v418_v46  ;;  %1758 = vperm.xlu0 %3193, %v1688_v47   ;;  %v3965_v46 = vpop.permute.xlu0 %689  ;;  %v3967_v47 = vpop.permute.xlu2 %684 }
 0x11e   : > { %1753 = vperm.xlu2 %3195, %v1687_v48   ;;  %1843 = vperm.xlu1 %3194, %v1705_v49   ;;  %5757 = vst [vmem:[#allocation13_spill] sm:$0xff] %v3967_v47 }
 0x121   : > { %v3865_v50 = vpop.f32.mrf.mxu0 }
 0x122   : > { %v3867_v51 = vpop.f32.mrf.mxu1 }
 0x124   : > { %959 = vmatmul.f32.gmra.mxu0 %v419_v52 }
 0x125   : > { %1168 = vmatmul.f32.gmra.mxu1 %v419_v52  ;;  %1838 = vperm.xlu0 %3193, %v1704_v53   ;;  %v425_v52 = vld [vmem:[#allocation4 + $0xe0] sm:$0xff]  ;;  %v2904_v53 = vld [vmem:[#allocation2] sm:$0x1] }
 0x126   : > { %1833 = vperm.xlu2 %3195, %v1703_v54   ;;  %1748 = vperm.xlu1 %3194, %v1686_v55   ;;  %v3971_v54 = vpop.permute.xlu1 %599  ;;  %v3973_v55 = vpop.permute.xlu0 %594 }
 0x129   : > { %v3882_v58 = vpop.f32.mrf.mxu0 }
 0x12a   : > { %v3884_v59 = vpop.f32.mrf.mxu1 }
 0x12c   : > { %962 = vmatmul.f32.gmra.mxu0 %v420_v60 }
 0x12d   : > { %1171 = vmatmul.f32.gmra.mxu1 %v420_v60  ;;  %1743 = vperm.xlu0 %3193, %v1685_v61   ;;  %v3975_v60 = vpop.permute.xlu2 %589 }
 0x12e   : > { %1738 = vperm.xlu2 %3195, %v1684_v62   ;;  %1828 = vperm.xlu1 %3194, %v1702_v63   ;;  %v426_v63 = vld [vmem:[#allocation4 + $0xe8] sm:$0xff] }
 0x131   : > { %v3901_v3 = vpop.f32.mrf.mxu0 }
 0x132   : > { %v3903_v4 = vpop.f32.mrf.mxu1 }
 0x134   : > { %965 = vmatmul.f32.gmra.mxu0 %v421_v5 }
 0x135   : > { %1174 = vmatmul.f32.gmra.mxu1 %v421_v5  ;;  %1823 = vperm.xlu0 %3193, %v1701_v6   ;;  %v3979_v5 = vpop.permute.xlu1 %679  ;;  %v3981_v6 = vpop.permute.xlu0 %674 }
 0x136   : > { %1818 = vperm.xlu2 %3195, %v1700_v7   ;;  %1733 = vperm.xlu1 %3194, %v1683_v8   ;;  %5758 = vst [vmem:[#allocation14_spill] sm:$0xff] %v3979_v5  ;;  %v429_v5 = vld [vmem:[#allocation4 + $0x100] sm:$0xff] }
 0x137   : > { %5759 = vst [vmem:[#allocation15_spill] sm:$0xff] %v3981_v6 }
 0x139   : > { %v3918_v11 = vpop.f32.mrf.mxu0 }
 0x13a   : > { %v3920_v12 = vpop.f32.mrf.mxu1 }
 0x13c   : > { %968 = vmatmul.f32.gmra.mxu0 %v422_v13 }
 0x13d   : > { %1177 = vmatmul.f32.gmra.mxu1 %v422_v13  ;;  %1728 = vperm.xlu0 %3193, %v1682_v17   ;;  %v427_v13 = vld [vmem:[#allocation4 + $0xf0] sm:$0xff]  ;;  %v3983_v17 = vpop.permute.xlu2 %669 }
 0x13e   : > { %1723 = vperm.xlu2 %3195, %v1681_v18   ;;  %1813 = vperm.xlu1 %3194, %v1699_v19   ;;  %5760 = vst [vmem:[#allocation16_spill] sm:$0xff] %v3983_v17  ;;  %v3985_v18 = vpop.permute.xlu1 %584 }
 0x141   : > { %v3935_v23 = vpop.f32.mrf.mxu0 }
 0x142   : > { %v3937_v24 = vpop.f32.mrf.mxu1 }
 0x144   : > { %971 = vmatmul.f32.gmra.mxu0 %v423_v25 }
 0x145   : > { %1180 = vmatmul.f32.gmra.mxu1 %v423_v25  ;;  %1808 = vperm.xlu0 %3193, %v1698_v29  }
 0x146   : > { %1803 = vperm.xlu2 %3195, %v1697_v30   ;;  %1718 = vperm.xlu1 %3194, %v1680_v31   ;;  %v428_v30 = vld [vmem:[#allocation4 + $0xf8] sm:$0xff] }
 0x149   : > { %v927_v35 = vpop.f32.mrf.mxu0 }
 0x14a   : > { %v3952_v36 = vpop.f32.mrf.mxu1 }
 0x14c   : > { %974 = vmatmul.f32.gmra.mxu0 %v424_v37 }
 0x14d   : > { %1183 = vmatmul.f32.gmra.mxu1 %v424_v37  ;;  %1713 = vperm.xlu0 %3193, %v1679_v41   ;;  %v3989_v37 = vpop.permute.xlu0 %579 }
 0x14e   : > { %1793 = vperm.xlu2 %3195, %v1695_v42   ;;  %1798 = vperm.xlu1 %3194, %v1696_v43   ;;  %v3992_v42 = vpop.permute.xlu2 %574 }
 0x151   : > { %v930_v48 = vpop.f32.mrf.mxu0 }
 0x152   : > { %v3969_v49 = vpop.f32.mrf.mxu1 }
 0x154   : > { %977 = vmatmul.f32.gmra.mxu0 %v425_v52 }
 0x155   : > { %1186 = vmatmul.f32.gmra.mxu1 %v425_v52  ;;  %2907 = vperm.xlu0 %3193, %v2904_v53   ;;  %v931_v53 = vadd.f32 %v930_v48, %v3899_v2  ;;  %v922_v48 = vadd.f32 %v3918_v11, %v3950_v34 }
 0x157   : > { %v1319_v47 = vmul.f32 0.2, %v931_v53 }
 0x159   : > { %v933_v61 = vpop.f32.mrf.mxu0 }
 0x15a   : > { %v3977_v62 = vpop.f32.mrf.mxu1  ;;  %v934_v41 = vadd.f32 %v933_v61, %v3914_v9 }
 0x15c   : > { %980 = vmatmul.f32.gmra.mxu0 %v426_v63 }
 0x15d   : > { %1189 = vmatmul.f32.gmra.mxu1 %v426_v63 }
 0x161   : > { %v936_v7 = vpop.f32.mrf.mxu0 }
 0x162   : > { %v1145_v8 = vpop.f32.mrf.mxu1  ;;  %v937_v19 = vadd.f32 %v936_v7, %v3897_v1  ;;  %v928_v7 = vadd.f32 %v927_v35, %v3933_v22 }
 0x164   : > { %983 = vmatmul.f32.gmra.mxu0 %v427_v13  ;;  %v1323_v52 = vmul.f32 0.2, %v937_v19  ;;  %v1317_v35 = vmul.f32 0.2, %v928_v7 }
 0x165   : > { %1192 = vmatmul.f32.gmra.mxu1 %v427_v13  ;;  %v1321_v13 = vmul.f32 0.2, %v934_v41 }
 0x166   : > { %v1451_v17 = vmax.f32 %v937_v19, %v1323_v52  ;;  %v4006_v19 = vpop.permute.xlu0 %659  ;;  %v1445_v11 = vmax.f32 %v928_v7, %v1317_v35 }
 0x169   : > { %v939_v25 = vpop.f32.mrf.mxu0 }
 0x16a   : > { %v1148_v29 = vpop.f32.mrf.mxu1  ;;  %v940_v31 = vadd.f32 %v939_v25, %v3878_v56  ;;  %v925_v25 = vadd.f32 %v3935_v23, %v3939_v28  ;;  %v919_v23 = vadd.f32 %v3901_v3, %v3971_v54 }
 0x16c   : > { %986 = vmatmul.f32.gmra.mxu0 %v428_v30  ;;  %v1325_v43 = vmul.f32 0.2, %v940_v31  ;;  %v1315_v52 = vmul.f32 0.2, %v925_v25 }
 0x16d   : > { %1195 = vmatmul.f32.gmra.mxu1 %v428_v30  ;;  %v4002_v30 = vpop.permute.xlu1 %664 }
 0x16e   : > { %v1453_v63 = vmax.f32 %v940_v31, %v1325_v43  ;;  %v1449_v31 = vmax.f32 %v934_v41, %v1321_v13  ;;  %v1447_v43 = vmax.f32 %v931_v53, %v1319_v47  ;;  %v1313_v41 = vmul.f32 0.2, %v922_v48 }
 0x16f   : > { %v1146_v13 = vadd.f32 %v1145_v8, %v3897_v1  ;;  %v1443_v53 = vmax.f32 %v925_v25, %v1315_v52  ;;  %v907_v1 = vadd.f32 %v3839_v38, %v3989_v37  ;;  %v1140_v25 = vadd.f32 %v3969_v49, %v3899_v2 }
 0x170   : > { %1871 = vmatpush.msra.mxu2 %v1453_v63  ;;  %v4010_v63 = vpop.permute.xlu2 %654  ;;  %v1137_v38 = vadd.f32 %v3952_v36, %v3933_v22  ;;  %v431_v36 = vld [vmem:[#allocation4 + $0x110] sm:$0xff] }
 0x171   : > { %v3998_v6 = vpop.f32.mrf.mxu0  ;;  %v1324_v52 = vmul.f32 0.2, %v1146_v13  ;;  %v1303_v49 = vmul.f32 0.2, %v907_v1 }
 0x172   : > { %5761 = vst [vmem:[#allocation17_spill] sm:$0xff] %v3998_v6  ;;  %v4000_v61 = vpop.f32.mrf.mxu1  ;;  %1872 = vmatpush.msra.mxu2 %v1451_v17  ;;  %v916_v17 = vadd.f32 %v3882_v58, %v3973_v55  ;;  %v1311_v6 = vmul.f32 0.2, %v919_v23  ;;  %v910_v58 = vadd.f32 %v3852_v44, %v3985_v18 }
 0x173   : > { %5762 = vst [vmem:[#allocation18_spill] sm:$0xff] %v4000_v61  ;;  %v1149_v61 = vadd.f32 %v1148_v29, %v3878_v56  ;;  %v1143_v56 = vadd.f32 %v3977_v62, %v3914_v9  ;;  %v1441_v29 = vmax.f32 %v922_v48, %v1313_v41  ;;  %v904_v9 = vadd.f32 %v3826_v32, %v3992_v42  ;;  %v4034_v48 = vpop.permute.xlu0 %564 }
 0x174   : > { %989 = vmatmul.f32.gmra.mxu0 %v429_v5  ;;  %1873 = vmatpush.msra.mxu2 %v1449_v31  ;;  %v430_v31 = vld [vmem:[#allocation4 + $0x108] sm:$0xff]  ;;  %v1309_v7 = vmul.f32 0.2, %v916_v17  ;;  %v1439_v44 = vmax.f32 %v919_v23, %v1311_v6  ;;  %v1305_v62 = vmul.f32 0.2, %v910_v58  ;;  %v1452_v41 = vmax.f32 %v1146_v13, %v1324_v52 }
 0x175   : > { %1198 = vmatmul.f32.gmra.mxu1 %v429_v5  ;;  %v913_v5 = vadd.f32 %v3865_v50, %v3975_v60  ;;  %v1326_v50 = vmul.f32 0.2, %v1149_v61  ;;  %v4028_v35 = vpop.permute.xlu1 %569  ;;  %v1134_v32 = vadd.f32 %v3937_v24, %v3939_v28  ;;  %v898_v13 = vadd.f32 %v3800_v20, %v4034_v48 }
 0x176   : > { %1874 = vmatpush.msra.mxu2 %v1447_v43  ;;  %v901_v2 = vadd.f32 %v3813_v26, %v4028_v35  ;;  %v1131_v26 = vadd.f32 %v3920_v12, %v3950_v34  ;;  %v1318_v28 = vmul.f32 0.2, %v1137_v38  ;;  %v1431_v20 = vmax.f32 %v907_v1, %v1303_v49 }
 0x177   : > { %v1307_v8 = vmul.f32 0.2, %v913_v5  ;;  %v1454_v43 = vmax.f32 %v1149_v61, %v1326_v50  ;;  %v1125_v34 = vadd.f32 %v3884_v59, %v3973_v55  ;;  %v1122_v52 = vadd.f32 %v3867_v51, %v3975_v60 }
 0x178   : > { %1875 = vmatpush.msra.mxu2 %v1445_v11  ;;  %v1437_v11 = vmax.f32 %v916_v17, %v1309_v7  ;;  %v1320_v17 = vmul.f32 0.2, %v1140_v25  ;;  %v1433_v7 = vmax.f32 %v910_v58, %v1305_v62  ;;  %v1297_v58 = vmul.f32 0.2, %v898_v13  ;;  %v432_v62 = vld [vmem:[#allocation4 + $0x118] sm:$0xff] }
 0x179   : > { %v4018_v3 = vpop.f32.mrf.mxu0  ;;  %2323 = vmatpush.msrb.mxu0 %v1454_v43  ;;  %v1435_v22 = vmax.f32 %v913_v5, %v1307_v8  ;;  %v1299_v5 = vmul.f32 0.2, %v901_v2  ;;  %v1446_v8 = vmax.f32 %v1137_v38, %v1318_v28  ;;  %v1119_v59 = vadd.f32 %v3854_v45, %v3985_v18 }
 0x17a   : > { %v4020_v47 = vpop.f32.mrf.mxu1  ;;  %1876 = vmatpush.msra.mxu2 %v1443_v53  ;;  %v1322_v53 = vmul.f32 0.2, %v1143_v56  ;;  %v1448_v24 = vmax.f32 %v1140_v25, %v1320_v17  ;;  %v1425_v55 = vmax.f32 %v898_v13, %v1297_v58  ;;  %v1116_v51 = vadd.f32 %v3841_v39, %v3989_v37  ;;  %v436_v58 = vld [vmem:[#allocation4 + $0x138] sm:$0xff] }
 0x17b   : > { %2324 = vmatpush.msrb.mxu0 %v1452_v41  ;;  %v1427_v1 = vmax.f32 %v901_v2, %v1299_v5  ;;  %v1310_v41 = vmul.f32 0.2, %v1125_v34  ;;  %v1308_v49 = vmul.f32 0.2, %v1122_v52  ;;  %v1113_v45 = vadd.f32 %v3828_v33, %v3992_v42  ;;  %v4090_v5 = vld [vmem:[#allocation7 + $0x40] sm:$0xff] }
 0x17c   : > { %992 = vmatmul.f32.gmra.mxu0 %v430_v31  ;;  %1877 = vmatpush.msra.mxu2 %v1441_v29  ;;  %v1450_v23 = vmax.f32 %v1143_v56, %v1322_v53  ;;  %v1301_v29 = vmul.f32 0.2, %v904_v9  ;;  %v1128_v56 = vadd.f32 %v3903_v4, %v3971_v54  ;;  %v4068_v53 = vld [vmem:[#allocation7] sm:$0xff]  ;;  %v1304_v17 = vmul.f32 0.2, %v1116_v51 }
 0x17d   : > { %1201 = vmatmul.f32.gmra.mxu1 %v430_v31  ;;  %v4038_v31 = vpop.permute.xlu2 %559  ;;  %v1438_v2 = vmax.f32 %v1125_v34, %v1310_v41  ;;  %v1436_v18 = vmax.f32 %v1122_v52, %v1308_v49  ;;  %v1107_v33 = vadd.f32 %v3802_v21, %v4034_v48  ;;  %v1302_v13 = vmul.f32 0.2, %v1113_v45  ;;  %v434_v21 = vld [vmem:[#allocation4 + $0x128] sm:$0xff]  ;;  %v4097_v34 = vld [vmem:[#allocation7 + $0x60] sm:$0xff] }
 0x17e   : > { %1878 = vmatpush.msra.mxu2 %v1439_v44  ;;  %2325 = vmatpush.msrb.mxu0 %v1450_v23  ;;  %v895_v50 = vadd.f32 %v3787_v14, %v4038_v31  ;;  %v1316_v44 = vmul.f32 0.2, %v1134_v32  ;;  %v1429_v12 = vmax.f32 %v904_v9, %v1301_v29  ;;  %v1314_v14 = vmul.f32 0.2, %v1131_v26  ;;  %v4081_v29 = vld [vmem:[#allocation7 + $0x20] sm:$0xff] }
 0x17f   : > { %v1312_v38 = vmul.f32 0.2, %v1128_v56  ;;  %v1432_v42 = vmax.f32 %v1116_v51, %v1304_v17  ;;  %v437_v52 = vld [vmem:[#allocation4 + $0x140] sm:$0xff]  ;;  %v439_v51 = vld [vmem:[#allocation4 + $0x150] sm:$0xff] }
 0x180   : > { %1879 = vmatpush.msra.mxu2 %v1437_v11  ;;  %2326 = vmatpush.msrb.mxu0 %v1448_v24  ;;  %v1444_v25 = vmax.f32 %v1134_v32, %v1316_v44  ;;  %v1295_v43 = vmul.f32 0.2, %v895_v50  ;;  %v1442_v9 = vmax.f32 %v1131_v26, %v1314_v14  ;;  %v1306_v32 = vmul.f32 0.2, %v1119_v59  ;;  %v435_v44 = vld [vmem:[#allocation4 + $0x130] sm:$0xff] }
 0x181   : > { %v4044_v6 = vpop.f32.mrf.mxu0  ;;  %v1440_v11 = vmax.f32 %v1128_v56, %v1312_v38  ;;  %v438_v38 = vld [vmem:[#allocation4 + $0x148] sm:$0xff] }
 0x182   : > { %v4046_v61 = vpop.f32.mrf.mxu1  ;;  %1880 = vmatpush.msra.mxu2 %v1435_v22  ;;  %2327 = vmatpush.msrb.mxu0 %v1446_v8  ;;  %v1423_v60 = vmax.f32 %v895_v50, %v1295_v43  ;;  %v1110_v22 = vadd.f32 %v3815_v27, %v4028_v35  ;;  %v1434_v23 = vmax.f32 %v1119_v59, %v1306_v32  ;;  %v1575_v59 = vld [vmem:[#allocation7 + $0xc0] sm:$0xff]  ;;  %v440_v32 = vld [vmem:[#allocation4 + $0x158] sm:$0xff] }
 0x183   : > { %v1430_v27 = vmax.f32 %v1113_v45, %v1302_v13  ;;  %v1104_v50 = vadd.f32 %v3789_v15, %v4038_v31  ;;  %v1587_v13 = vld [vmem:[#allocation7 + $0x120] sm:$0xff] }
 0x184   : > { %995 = vmatmul.f32.gmra.mxu0 %v431_v36  ;;  %1881 = vmatpush.msra.mxu2 %v1433_v7  ;;  %v1300_v35 = vmul.f32 0.2, %v1110_v22  ;;  %v1298_v7 = vmul.f32 0.2, %v1107_v33 }
 0x185   : > { %1204 = vmatmul.f32.gmra.mxu1 %v431_v36  ;;  %2328 = vmatpush.msrb.mxu0 %v1444_v25  ;;  %v433_v36 = vld [vmem:[#allocation4 + $0x120] sm:$0xff]  ;;  %v1296_v56 = vmul.f32 0.2, %v1104_v50 }
 0x186   : > { %1882 = vmatpush.msra.mxu2 %v1431_v20  ;;  %v1428_v26 = vmax.f32 %v1110_v22, %v1300_v35  ;;  %v1426_v48 = vmax.f32 %v1107_v33, %v1298_v7  ;;  %v1567_v25 = vld [vmem:[#allocation7 + $0x80] sm:$0xff] }
 0x187   : > { %2329 = vmatpush.msrb.mxu0 %v1442_v9  ;;  %v1583_v22 = vld [vmem:[#allocation7 + $0x100] sm:$0xff] }
 0x188   : > { %1883 = vmatpush.msra.mxu2 %v1429_v12  ;;  %v1424_v12 = vmax.f32 %v1104_v50, %v1296_v56  ;;  %v441_v33 = vld [vmem:[#allocation4 + $0x160] sm:$0xff] }
 0x189   : > { %v4060_v4 = vpop.f32.mrf.mxu0  ;;  %2330 = vmatpush.msrb.mxu0 %v1440_v11 }
 0x18a   : > { %v4062_v54 = vpop.f32.mrf.mxu1  ;;  %1884 = vmatpush.msra.mxu2 %v1427_v1  ;;  %v1571_v1 = vld [vmem:[#allocation7 + $0xa0] sm:$0xff] }
 0x18b   : > { %2331 = vmatpush.msrb.mxu0 %v1438_v2  ;;  %v4118_v2 = vpop.permute.xlu1 %649 }
 0x18c   : > { %998 = vmatmul.f32.gmra.mxu0 %v432_v62  ;;  %1885 = vmatpush.msra.mxu2 %v1425_v55  ;;  %v4112_v55 = vpop.permute.xlu0 %644 }
 0x18d   : > { %1207 = vmatmul.f32.gmra.mxu1 %v432_v62  ;;  %2332 = vmatpush.msrb.mxu0 %v1436_v18 }
 0x18e   : > { %1886 = vmatpush.msra.mxu2 %v1423_v60  ;;  %v1579_v60 = vld [vmem:[#allocation7 + $0xe0] sm:$0xff] }
 0x18f   : > { %1887 = vmatmul.f32.vlgmr.msra.gmra.mxu2 %v4068_v53  ;;  %2333 = vmatpush.msrb.mxu0 %v1434_v23 }
 0x191   : > { %v4075_v39 = vpop.f32.mrf.mxu0  ;;  %2334 = vmatpush.msrb.mxu0 %v1432_v42 }
 0x192   : > { %v4077_v37 = vpop.f32.mrf.mxu1 }
 0x193   : > { %2335 = vmatpush.msrb.mxu0 %v1430_v27 }
 0x194   : > { %1001 = vmatmul.f32.gmra.mxu0 %v433_v36  ;;  %v4120_v49 = vpop.permute.xlu0 %789 }
 0x195   : > { %1210 = vmatmul.f32.gmra.mxu1 %v433_v36  ;;  %2336 = vmatpush.msrb.mxu0 %v1428_v26  ;;  %v4122_v36 = vpop.permute.xlu1 %639  ;;  %v442_v26 = vld [vmem:[#allocation4 + $0x168] sm:$0xff] }
 0x197   : > { %1890 = vmatmul.f32.gmra.mxu2 %v4081_v29  ;;  %2337 = vmatpush.msrb.mxu0 %v1426_v48  ;;  %v1591_v48 = vld [vmem:[#allocation7 + $0x140] sm:$0xff] }
 0x199   : > { %v4084_v24 = vpop.f32.mrf.mxu0  ;;  %2338 = vmatpush.msrb.mxu0 %v1424_v12  ;;  %v4130_v12 = vpop.permute.xlu2 %794 }
 0x19a   : > { %v4086_v28 = vpop.f32.mrf.mxu1 }
 0x19c   : > { %1004 = vmatmul.f32.gmra.mxu0 %v434_v21  ;;  %v4124_v42 = vpop.permute.xlu0 %869 }
 0x19d   : > { %1213 = vmatmul.f32.gmra.mxu1 %v434_v21  ;;  %5763 = vst [vmem:[#allocation19_spill] sm:$0xff] %v4124_v42  ;;  %v4126_v7 = vpop.permute.xlu1 %874 }
 0x19e   : > { %5764 = vst [vmem:[#allocation20_spill] sm:$0xff] %v4126_v7 }
 0x19f   : > { %1893 = vmatmul.f32.gmra.mxu2 %v4090_v5 }
 0x1a1   : > { %v4093_v20 = vpop.f32.mrf.mxu0 }
 0x1a2   : > { %v4095_v8 = vpop.f32.mrf.mxu1 }
 0x1a4   : > { %1007 = vmatmul.f32.gmra.mxu0 %v435_v44  ;;  %v4128_v21 = vpop.permute.xlu0 %774 }
 0x1a5   : > { %1216 = vmatmul.f32.gmra.mxu1 %v435_v44  ;;  %v443_v44 = vld [vmem:[#allocation4 + $0x170] sm:$0xff] }
 0x1a7   : > { %1896 = vmatmul.f32.gmra.mxu2 %v4097_v34 }
 0x1a9   : > { %v4100_v15 = vpop.f32.mrf.mxu0 }
 0x1aa   : > { %v4102_v31 = vpop.f32.mrf.mxu1 }
 0x1ac   : > { %1010 = vmatmul.f32.gmra.mxu0 %v436_v58 }
 0x1ad   : > { %1219 = vmatmul.f32.gmra.mxu1 %v436_v58  ;;  %v4132_v58 = vpop.permute.xlu1 %779 }
 0x1af   : > { %1899 = vmatmul.f32.gmra.mxu2 %v1567_v25  ;;  %v1595_v25 = vld [vmem:[#allocation7 + $0x160] sm:$0xff] }
 0x1b1   : > { %v4104_v14 = vpop.f32.mrf.mxu0 }
 0x1b2   : > { %v4106_v43 = vpop.f32.mrf.mxu1 }
 0x1b4   : > { %1013 = vmatmul.f32.gmra.mxu0 %v437_v52 }
 0x1b5   : > { %1222 = vmatmul.f32.gmra.mxu1 %v437_v52  ;;  %v4134_v52 = vpop.permute.xlu0 %854 }
 0x1b6   : > { %5765 = vst [vmem:[#allocation21_spill] sm:$0xff] %v4134_v52 }
 0x1b7   : > { %1902 = vmatmul.f32.gmra.mxu2 %v1571_v1 }
 0x1b9   : > { %v4108_v62 = vpop.f32.mrf.mxu0 }
 0x1ba   : > { %v4110_v9 = vpop.f32.mrf.mxu1 }
 0x1bc   : > { %1016 = vmatmul.f32.gmra.mxu0 %v438_v38 }
 0x1bd   : > { %1225 = vmatmul.f32.gmra.mxu1 %v438_v38 }
 0x1bf   : > { %1905 = vmatmul.f32.gmra.mxu2 %v1575_v59 }
 0x1c1   : > { %v4114_v11 = vpop.f32.mrf.mxu0 }
 0x1c2   : > { %v4116_v41 = vpop.f32.mrf.mxu1  ;;  %v973_v42 = vadd.f32 %v4114_v11, %v3965_v46 }
 0x1c4   : > { %1019 = vmatmul.f32.gmra.mxu0 %v439_v51 }
 0x1c5   : > { %1228 = vmatmul.f32.gmra.mxu1 %v439_v51 }
 0x1c7   : > { %1908 = vmatmul.f32.gmra.mxu2 %v1579_v60  ;;  %v444_v60 = vld [vmem:[#allocation4 + $0x178] sm:$0xff] }
 0x1c9   : > { %v975_v45 = vpop.f32.mrf.mxu0 }
 0x1ca   : > { %v1184_v18 = vpop.f32.mrf.mxu1 }
 0x1cc   : > { %1022 = vmatmul.f32.gmra.mxu0 %v440_v32 }
 0x1cd   : > { %1231 = vmatmul.f32.gmra.mxu1 %v440_v32 }
 0x1cf   : > { %1911 = vmatmul.f32.gmra.mxu2 %v1583_v22 }
 0x1d1   : > { %v978_v23 = vpop.f32.mrf.mxu0 }
 0x1d2   : > { %v1187_v17 = vpop.f32.mrf.mxu1 }
 0x1d4   : > { %1025 = vmatmul.f32.gmra.mxu0 %v441_v33 }
 0x1d5   : > { %1234 = vmatmul.f32.gmra.mxu1 %v441_v33 }
 0x1d7   : > { %1914 = vmatmul.f32.gmra.mxu2 %v1587_v13 }
 0x1d9   : > { %v981_v27 = vpop.f32.mrf.mxu0 }
 0x1da   : > { %v1190_v35 = vpop.f32.mrf.mxu1  ;;  %v982_v33 = vadd.f32 %v981_v27, %v3916_v10  ;;  %v976_v27 = vadd.f32 %v975_v45, %v3954_v40 }
 0x1db   : > { %v1191_v13 = vadd.f32 %v1190_v35, %v3916_v10  ;;  %v1185_v10 = vadd.f32 %v1184_v18, %v3954_v40  ;;  %v445_v40 = vld [vmem:[#allocation4 + $0x180] sm:$0xff] }
 0x1dc   : > { %1028 = vmatmul.f32.gmra.mxu0 %v442_v26  ;;  %v1353_v35 = vmul.f32 0.2, %v982_v33 }
 0x1dd   : > { %1237 = vmatmul.f32.gmra.mxu1 %v442_v26  ;;  %v4142_v26 = vpop.permute.xlu2 %784  ;;  %v1354_v7 = vmul.f32 0.2, %v1191_v13 }
 0x1df   : > { %1917 = vmatmul.f32.gmra.mxu2 %v1591_v48 }
 0x1e1   : > { %v984_v50 = vpop.f32.mrf.mxu0 }
 0x1e2   : > { %v1193_v56 = vpop.f32.mrf.mxu1  ;;  %v985_v1 = vadd.f32 %v984_v50, %v3880_v57 }
 0x1e3   : > { %v1194_v38 = vadd.f32 %v1193_v56, %v3880_v57  ;;  %v979_v57 = vadd.f32 %v978_v23, %v3922_v16  ;;  %v1188_v56 = vadd.f32 %v1187_v17, %v3922_v16  ;;  %v1182_v23 = vadd.f32 %v4116_v41, %v3965_v46 }
 0x1e4   : > { %1031 = vmatmul.f32.gmra.mxu0 %v443_v44  ;;  %v1349_v46 = vmul.f32 0.2, %v976_v27  ;;  %v1350_v41 = vmul.f32 0.2, %v1185_v10 }
 0x1e5   : > { %1240 = vmatmul.f32.gmra.mxu1 %v443_v44  ;;  %v1355_v44 = vmul.f32 0.2, %v985_v1  ;;  %v1356_v52 = vmul.f32 0.2, %v1194_v38  ;;  %v1351_v18 = vmul.f32 0.2, %v979_v57 }
 0x1e7   : > { %1920 = vmatmul.f32.gmra.mxu2 %v1595_v25  ;;  %v1599_v25 = vld [vmem:[#allocation7 + $0x180] sm:$0xff]  ;;  %v1483_v16 = vmax.f32 %v985_v1, %v1355_v44  ;;  %v1484_v45 = vmax.f32 %v1194_v38, %v1356_v52  ;;  %v1481_v1 = vmax.f32 %v982_v33, %v1353_v35  ;;  %v1482_v44 = vmax.f32 %v1191_v13, %v1354_v7  ;;  %v5771_v7 = vld [vmem:[#allocation15_spill] sm:$0xff] }
 0x1e8   : > { %v964_v33 = vadd.f32 %v4100_v15, %v5771_v7  ;;  %v1478_v13 = vmax.f32 %v1185_v10, %v1350_v41  ;;  %v446_v10 = vld [vmem:[#allocation4 + $0x188] sm:$0xff] }
 0x1e9   : > { %v987_v59 = vpop.f32.mrf.mxu0 }
 0x1ea   : > { %v1196_v51 = vpop.f32.mrf.mxu1  ;;  %v988_v32 = vadd.f32 %v987_v59, %v3895_v0  ;;  %v4146_v59 = vpop.permute.xlu1 %859 }
 0x1eb   : > { %v1197_v22 = vadd.f32 %v1196_v51, %v3895_v0  ;;  %5766 = vst [vmem:[#allocation22_spill] sm:$0xff] %v4146_v59  ;;  %v4329_v59 = vld [vmem:[#allocation7 + $0xe8] sm:$0xff] }
 0x1ec   : > { %1034 = vmatmul.f32.gmra.mxu0 %v444_v60  ;;  %v1357_v48 = vmul.f32 0.2, %v988_v32  ;;  %5804 = vst [vmem:[#allocation48_spill] sm:$0xff] %v4329_v59 }
 0x1ed   : > { %1243 = vmatmul.f32.gmra.mxu1 %v444_v60  ;;  %v1358_v50 = vmul.f32 0.2, %v1197_v22  ;;  %v4150_v60 = vpop.permute.xlu0 %759 }
 0x1ee   : > { %v1485_v0 = vmax.f32 %v988_v32, %v1357_v48  ;;  %v5768_v48 = vld [vmem:[#allocation13_spill] sm:$0xff] }
 0x1ef   : > { %v1486_v51 = vmax.f32 %v1197_v22, %v1358_v50  ;;  %1923 = vmatmul.f32.gmra.mxu2 %v1599_v25  ;;  %v1352_v22 = vmul.f32 0.2, %v1188_v56  ;;  %v970_v50 = vadd.f32 %v4108_v62, %v5768_v48  ;;  %v1179_v11 = vadd.f32 %v4110_v9, %v5768_v48  ;;  %v5769_v25 = vld [vmem:[#allocation14_spill] sm:$0xff] }
 0x1f0   : > { %1984 = vmatpush.msra.mxu3 %v1485_v0  ;;  %v967_v0 = vadd.f32 %v4104_v14, %v5769_v25  ;;  %v1176_v52 = vadd.f32 %v4106_v43, %v5769_v25  ;;  %v1479_v62 = vmax.f32 %v979_v57, %v1351_v18  ;;  %v1347_v9 = vmul.f32 0.2, %v973_v42  ;;  %v5772_v57 = vld [vmem:[#allocation16_spill] sm:$0xff] }
 0x1f1   : > { %2436 = vmatpush.msrb.mxu1 %v1486_v51  ;;  %v4156_v17 = vpop.f32.mrf.mxu0  ;;  %v1480_v38 = vmax.f32 %v1188_v56, %v1352_v22  ;;  %v1603_v51 = vld [vmem:[#allocation7 + $0x1a0] sm:$0xff]  ;;  %v1173_v14 = vadd.f32 %v4102_v31, %v5771_v7  ;;  %v1477_v43 = vmax.f32 %v976_v27, %v1349_v46  ;;  %v1345_v35 = vmul.f32 0.2, %v970_v50 }
 0x1f2   : > { %v4158_v32 = vpop.f32.mrf.mxu1  ;;  %1985 = vmatpush.msra.mxu3 %v1483_v16  ;;  %v1348_v16 = vmul.f32 0.2, %v1182_v23  ;;  %v4174_v48 = vpop.permute.xlu1 %764  ;;  %v961_v56 = vadd.f32 %v4093_v20, %v5772_v57  ;;  %v1170_v18 = vadd.f32 %v4095_v8, %v5772_v57  ;;  %v1475_v22 = vmax.f32 %v973_v42, %v1347_v9  ;;  %v1607_v9 = vld [vmem:[#allocation7 + $0x1c0] sm:$0xff] }
 0x1f3   : > { %5767 = vst [vmem:[#allocation23_spill] sm:$0xff] %v4158_v32  ;;  %2437 = vmatpush.msrb.mxu1 %v1484_v45  ;;  %v4168_v45 = vpop.permute.xlu2 %864  ;;  %v958_v20 = vadd.f32 %v4084_v24, %v4002_v30  ;;  %v1167_v8 = vadd.f32 %v4086_v28, %v4002_v30  ;;  %v1473_v41 = vmax.f32 %v970_v50, %v1345_v35 }
 0x1f4   : > { %1037 = vmatmul.f32.gmra.mxu0 %v445_v40  ;;  %1986 = vmatpush.msra.mxu3 %v1481_v1  ;;  %5770 = vst [vmem:[#allocation13_spill] sm:$0xff] %v4168_v45  ;;  %v1476_v27 = vmax.f32 %v1182_v23, %v1348_v16  ;;  %v1343_v1 = vmul.f32 0.2, %v967_v0  ;;  %v955_v42 = vadd.f32 %v4075_v39, %v4006_v19  ;;  %v1339_v30 = vmul.f32 0.2, %v961_v56  ;;  %v456_v45 = vld [vmem:[#allocation4 + $0x1d8] sm:$0xff] }
 0x1f5   : > { %1246 = vmatmul.f32.gmra.mxu1 %v445_v40  ;;  %v1346_v40 = vmul.f32 0.2, %v1179_v11  ;;  %v4184_v46 = vpop.permute.xlu0 %839  ;;  %v1164_v23 = vadd.f32 %v4077_v37, %v4006_v19  ;;  %v1340_v28 = vmul.f32 0.2, %v1170_v18  ;;  %v952_v50 = vadd.f32 %v4060_v4, %v4010_v63 }
 0x1f6   : > { %2438 = vmatpush.msrb.mxu1 %v1482_v44  ;;  %1987 = vmatpush.msra.mxu3 %v1479_v62  ;;  %v1344_v44 = vmul.f32 0.2, %v1176_v52  ;;  %5774 = vst [vmem:[#allocation15_spill] sm:$0xff] %v4184_v46  ;;  %v1341_v62 = vmul.f32 0.2, %v964_v33  ;;  %v1471_v24 = vmax.f32 %v967_v0, %v1343_v1  ;;  %v949_v0 = vadd.f32 %v4044_v6, %v4118_v2 }
 0x1f7   : > { %1926 = vmatmul.f32.gmra.mxu2 %v1603_v51  ;;  %v1474_v25 = vmax.f32 %v1179_v11, %v1346_v40  ;;  %v1161_v11 = vadd.f32 %v4062_v54, %v4010_v63  ;;  %v1337_v19 = vmul.f32 0.2, %v958_v20  ;;  %v1338_v37 = vmul.f32 0.2, %v1167_v8 }
 0x1f8   : > { %2439 = vmatpush.msrb.mxu1 %v1480_v38  ;;  %1988 = vmatpush.msra.mxu3 %v1477_v43  ;;  %v1342_v38 = vmul.f32 0.2, %v1173_v14  ;;  %v1472_v51 = vmax.f32 %v1176_v52, %v1344_v44  ;;  %v1469_v39 = vmax.f32 %v964_v33, %v1341_v62  ;;  %v1158_v52 = vadd.f32 %v4046_v61, %v4118_v2 }
 0x1f9   : > { %v4180_v15 = vpop.f32.mrf.mxu0  ;;  %v1467_v54 = vmax.f32 %v961_v56, %v1339_v30  ;;  %v1468_v33 = vmax.f32 %v1170_v18, %v1340_v28  ;;  %v1335_v43 = vmul.f32 0.2, %v955_v42  ;;  %v946_v6 = vadd.f32 %v4018_v3, %v4112_v55  ;;  %v5777_v56 = vld [vmem:[#allocation17_spill] sm:$0xff] }
 0x1fa   : > { %2440 = vmatpush.msrb.mxu1 %v1478_v13  ;;  %v4182_v31 = vpop.f32.mrf.mxu1  ;;  %1989 = vmatpush.msra.mxu3 %v1475_v22  ;;  %v1470_v16 = vmax.f32 %v1173_v14, %v1342_v38  ;;  %v447_v14 = vld [vmem:[#allocation4 + $0x190] sm:$0xff]  ;;  %v1336_v13 = vmul.f32 0.2, %v1164_v23  ;;  %v4208_v35 = vpop.permute.xlu1 %844  ;;  %v1155_v61 = vadd.f32 %v4020_v47, %v4112_v55  ;;  %v1465_v2 = vmax.f32 %v958_v20, %v1337_v19  ;;  %v4220_v55 = vld [vmem:[#allocation7 + $0x1e0] sm:$0xff] }
 0x1fb   : > { %5773 = vst [vmem:[#allocation14_spill] sm:$0xff] %v4182_v31  ;;  %v4198_v7 = vpop.permute.xlu2 %769  ;;  %v1466_v40 = vmax.f32 %v1167_v8, %v1338_v37  ;;  %v1333_v57 = vmul.f32 0.2, %v952_v50  ;;  %v1334_v22 = vmul.f32 0.2, %v1161_v11  ;;  %v943_v18 = vadd.f32 %v5777_v56, %v4122_v36  ;;  %v4231_v19 = vld [vmem:[#allocation7 + $0x200] sm:$0xff] }
 0x1fc   : > { %2441 = vmatpush.msrb.mxu1 %v1476_v27  ;;  %1040 = vmatmul.f32.gmra.mxu0 %v446_v10  ;;  %5776 = vst [vmem:[#allocation24_spill] sm:$0xff] %v4208_v35  ;;  %v1463_v3 = vmax.f32 %v955_v42, %v1335_v43  ;;  %v1464_v47 = vmax.f32 %v1164_v23, %v1336_v13  ;;  %v1331_v44 = vmul.f32 0.2, %v949_v0  ;;  %v1332_v20 = vmul.f32 0.2, %v1158_v52  ;;  %v4233_v37 = vld [vmem:[#allocation7 + $0x8] sm:$0xff] }
 0x1fd   : > { %1249 = vmatmul.f32.gmra.mxu1 %v446_v10  ;;  %1990 = vmatpush.msra.mxu3 %v1473_v41  ;;  %v4214_v27 = vpop.permute.xlu0 %744  ;;  %v5778_v10 = vld [vmem:[#allocation18_spill] sm:$0xff]  ;;  %5779 = vst [vmem:[#allocation17_spill] sm:$0xff] %v4220_v55  ;;  %v1461_v8 = vmax.f32 %v952_v50, %v1333_v57  ;;  %v1462_v41 = vmax.f32 %v1161_v11, %v1334_v22  ;;  %v1330_v62 = vmul.f32 0.2, %v1155_v61  ;;  %v1619_v13 = vld [vmem:[#allocation7 + $0x220] sm:$0xff] }
 0x1fe   : > { %2442 = vmatpush.msrb.mxu1 %v1474_v25  ;;  %v1152_v1 = vadd.f32 %v5778_v10, %v4122_v36  ;;  %v1329_v25 = vmul.f32 0.2, %v946_v6  ;;  %v1459_v42 = vmax.f32 %v949_v0, %v1331_v44  ;;  %v1460_v23 = vmax.f32 %v1158_v52, %v1332_v20  ;;  %5782 = vst [vmem:[#allocation26_spill] sm:$0xff] %v4231_v19  ;;  %v450_v22 = vld [vmem:[#allocation4 + $0x1a8] sm:$0xff]  ;;  %v451_v20 = vld [vmem:[#allocation4 + $0x1b0] sm:$0xff] }
 0x1ff   : > { %1991 = vmatpush.msra.mxu3 %v1471_v24  ;;  %1929 = vmatmul.f32.gmra.mxu2 %v1607_v9  ;;  %v448_v24 = vld [vmem:[#allocation4 + $0x198] sm:$0xff]  ;;  %v1458_v50 = vmax.f32 %v1155_v61, %v1330_v62  ;;  %v4260_v10 = vld [vmem:[#allocation7 + $0x48] sm:$0xff]  ;;  %v455_v35 = vld [vmem:[#allocation4 + $0x1d0] sm:$0xff] }
 0x200   : > { %2443 = vmatpush.msrb.mxu1 %v1472_v51  ;;  %v1327_v51 = vmul.f32 0.2, %v943_v18  ;;  %v1328_v9 = vmul.f32 0.2, %v1152_v1  ;;  %v1457_v28 = vmax.f32 %v946_v6, %v1329_v25  ;;  %v4247_v6 = vld [vmem:[#allocation7 + $0x28] sm:$0xff]  ;;  %v1627_v25 = vld [vmem:[#allocation7 + $0x260] sm:$0xff] }
 0x201   : > { %1992 = vmatpush.msra.mxu3 %v1469_v39  ;;  %v4204_v4 = vpop.f32.mrf.mxu0  ;;  %v4275_v62 = vld [vmem:[#allocation7 + $0x68] sm:$0xff] }
 0x202   : > { %2444 = vmatpush.msrb.mxu1 %v1470_v16  ;;  %v4206_v63 = vpop.f32.mrf.mxu1  ;;  %v4229_v11 = vpop.permute.xlu1 %749  ;;  %v1455_v39 = vmax.f32 %v943_v18, %v1327_v51  ;;  %v1456_v16 = vmax.f32 %v1152_v1, %v1328_v9  ;;  %v1623_v18 = vld [vmem:[#allocation7 + $0x240] sm:$0xff]  ;;  %v452_v51 = vld [vmem:[#allocation4 + $0x1b8] sm:$0xff] }
 0x203   : > { %5775 = vst [vmem:[#allocation16_spill] sm:$0xff] %v4206_v63  ;;  %1993 = vmatpush.msra.mxu3 %v1467_v54  ;;  %v4227_v30 = vpop.permute.xlu2 %849 }
 0x204   : > { %2445 = vmatpush.msrb.mxu1 %v1468_v33  ;;  %1043 = vmatmul.f32.gmra.mxu0 %v447_v14  ;;  %5781 = vst [vmem:[#allocation25_spill] sm:$0xff] %v4227_v30  ;;  %v449_v33 = vld [vmem:[#allocation4 + $0x1a0] sm:$0xff] }
 0x205   : > { %1252 = vmatmul.f32.gmra.mxu1 %v447_v14  ;;  %1994 = vmatpush.msra.mxu3 %v1465_v2  ;;  %v4235_v0 = vpop.permute.xlu0 %824 }
 0x206   : > { %2446 = vmatpush.msrb.mxu1 %v1466_v40  ;;  %5783 = vst [vmem:[#allocation27_spill] sm:$0xff] %v4235_v0  ;;  %v454_v0 = vld [vmem:[#allocation4 + $0x1c8] sm:$0xff] }
 0x207   : > { %1995 = vmatpush.msra.mxu3 %v1463_v3  ;;  %1932 = vmatmul.f32.gmra.mxu2 %v4220_v55 }
 0x208   : > { %2447 = vmatpush.msrb.mxu1 %v1464_v47 }
 0x209   : > { %1996 = vmatpush.msra.mxu3 %v1461_v8  ;;  %v4223_v36 = vpop.f32.mrf.mxu0 }
 0x20a   : > { %2448 = vmatpush.msrb.mxu1 %v1462_v41  ;;  %v4225_v38 = vpop.f32.mrf.mxu1  ;;  %v4249_v61 = vpop.permute.xlu1 %829 }
 0x20b   : > { %5780 = vst [vmem:[#allocation18_spill] sm:$0xff] %v4225_v38  ;;  %1997 = vmatpush.msra.mxu3 %v1459_v42  ;;  %v4245_v43 = vpop.permute.xlu2 %754 }
 0x20c   : > { %2449 = vmatpush.msrb.mxu1 %v1460_v23  ;;  %1046 = vmatmul.f32.gmra.mxu0 %v448_v24  ;;  %5785 = vst [vmem:[#allocation29_spill] sm:$0xff] %v4249_v61 }
 0x20d   : > { %1255 = vmatmul.f32.gmra.mxu1 %v448_v24  ;;  %1998 = vmatpush.msra.mxu3 %v1457_v28  ;;  %v4251_v2 = vpop.permute.xlu0 %729 }
 0x20e   : > { %2450 = vmatpush.msrb.mxu1 %v1458_v50 }
 0x20f   : > { %1999 = vmatpush.msra.mxu3 %v1455_v39  ;;  %1935 = vmatmul.f32.gmra.mxu2 %v4231_v19  ;;  %v1631_v39 = vld [vmem:[#allocation7 + $0x280] sm:$0xff] }
 0x210   : > { %2451 = vmatpush.msrb.mxu1 %v1456_v16  ;;  %2000 = vmatmul.f32.vlgmr.msra.gmra.mxu3 %v4233_v37  ;;  %v4290_v16 = vld [vmem:[#allocation7 + $0x88] sm:$0xff] }
 0x211   : > { %v4239_v52 = vpop.f32.mrf.mxu0 }
 0x212   : > { %v4241_v54 = vpop.f32.mrf.mxu1  ;;  %v4243_v14 = vpop.f32.mrf.mxu2 }
 0x213   : > { %5784 = vst [vmem:[#allocation28_spill] sm:$0xff] %v4241_v54  ;;  %v4262_v1 = vpop.permute.xlu2 %834  ;;  %v4264_v3 = vpop.permute.xlu1 %734 }
 0x214   : > { %1049 = vmatmul.f32.gmra.mxu0 %v449_v33  ;;  %5788 = vst [vmem:[#allocation32_spill] sm:$0xff] %v4262_v1  ;;  %v4316_v1 = vld [vmem:[#allocation7 + $0xc8] sm:$0xff] }
 0x215   : > { %1258 = vmatmul.f32.gmra.mxu1 %v449_v33  ;;  %v4271_v8 = vpop.permute.xlu0 %809  ;;  %5800 = vst [vmem:[#allocation44_spill] sm:$0xff] %v4316_v1 }
 0x216   : > { %5790 = vst [vmem:[#allocation34_spill] sm:$0xff] %v4271_v8 }
 0x217   : > { %1938 = vmatmul.f32.gmra.mxu2 %v1619_v13 }
 0x218   : > { %2003 = vmatmul.f32.gmra.mxu3 %v4247_v6 }
 0x219   : > { %v4254_v40 = vpop.f32.mrf.mxu0 }
 0x21a   : > { %v4256_v57 = vpop.f32.mrf.mxu1  ;;  %v4258_v56 = vpop.f32.mrf.mxu2 }
 0x21b   : > { %5786 = vst [vmem:[#allocation30_spill] sm:$0xff] %v4256_v57  ;;  %v4277_v42 = vpop.permute.xlu2 %739  ;;  %v4284_v9 = vpop.permute.xlu1 %814 }
 0x21c   : > { %5787 = vst [vmem:[#allocation31_spill] sm:$0xff] %v4258_v56  ;;  %1052 = vmatmul.f32.gmra.mxu0 %v450_v22 }
 0x21d   : > { %1261 = vmatmul.f32.gmra.mxu1 %v450_v22  ;;  %5792 = vst [vmem:[#allocation36_spill] sm:$0xff] %v4284_v9  ;;  %v4288_v50 = vpop.permute.xlu0 %799  ;;  %v453_v22 = vld [vmem:[#allocation4 + $0x1c0] sm:$0xff] }
 0x21e   : > { %5794 = vst [vmem:[#allocation38_spill] sm:$0xff] %v4288_v50  ;;  %v4303_v50 = vld [vmem:[#allocation7 + $0xa8] sm:$0xff] }
 0x21f   : > { %1941 = vmatmul.f32.gmra.mxu2 %v1623_v18  ;;  %5797 = vst [vmem:[#allocation41_spill] sm:$0xff] %v4303_v50 }
 0x220   : > { %2006 = vmatmul.f32.gmra.mxu3 %v4260_v10 }
 0x221   : > { %v4267_v47 = vpop.f32.mrf.mxu0 }
 0x222   : > { %v4269_v44 = vpop.f32.mrf.mxu1  ;;  %v4273_v41 = vpop.f32.mrf.mxu2 }
 0x223   : > { %5789 = vst [vmem:[#allocation33_spill] sm:$0xff] %v4269_v44  ;;  %v4297_v18 = vpop.permute.xlu2 %819 }
 0x224   : > { %5791 = vst [vmem:[#allocation35_spill] sm:$0xff] %v4273_v41  ;;  %1055 = vmatmul.f32.gmra.mxu0 %v451_v20  ;;  %v459_v41 = vld [vmem:[#allocation4 + $0x1f0] sm:$0xff] }
 0x225   : > { %1264 = vmatmul.f32.gmra.mxu1 %v451_v20  ;;  %5795 = vst [vmem:[#allocation39_spill] sm:$0xff] %v4297_v18  ;;  %v4305_v8 = vpop.permute.xlu0 %1868 }
 0x226   : > { %5798 = vst [vmem:[#allocation42_spill] sm:$0xff] %v4305_v8 }
 0x227   : > { %1944 = vmatmul.f32.gmra.mxu2 %v1627_v25  ;;  %v4301_v25 = vpop.permute.xlu1 %719 }
 0x228   : > { %2009 = vmatmul.f32.gmra.mxu3 %v4275_v62 }
 0x229   : > { %v4280_v23 = vpop.f32.mrf.mxu0 }
 0x22a   : > { %v4282_v24 = vpop.f32.mrf.mxu1  ;;  %v4286_v28 = vpop.f32.mrf.mxu2 }
 0x22b   : > { %5793 = vst [vmem:[#allocation37_spill] sm:$0xff] %v4286_v28  ;;  %v4314_v61 = vpop.permute.xlu2 %724 }
 0x22c   : > { %1058 = vmatmul.f32.gmra.mxu0 %v452_v51 }
 0x22d   : > { %1267 = vmatmul.f32.gmra.mxu1 %v452_v51  ;;  %v1635_v51 = vld [vmem:[#allocation7 + $0x2a0] sm:$0xff]  ;;  %v4320_v8 = vpop.permute.xlu0 %1773 }
 0x22e   : > { %5802 = vst [vmem:[#allocation46_spill] sm:$0xff] %v4320_v8 }
 0x22f   : > { %1947 = vmatmul.f32.gmra.mxu2 %v1631_v39  ;;  %v4318_v46 = vpop.permute.xlu1 %1788 }
 0x230   : > { %2012 = vmatmul.f32.gmra.mxu3 %v4290_v16  ;;  %5801 = vst [vmem:[#allocation45_spill] sm:$0xff] %v4318_v46 }
 0x231   : > { %v4293_v33 = vpop.f32.mrf.mxu0 }
 0x232   : > { %v4295_v13 = vpop.f32.mrf.mxu1  ;;  %v4299_v20 = vpop.f32.mrf.mxu2 }
 0x233   : > { %5796 = vst [vmem:[#allocation40_spill] sm:$0xff] %v4299_v20  ;;  %v4331_v55 = vpop.permute.xlu2 %804  ;;  %v4344_v20 = vld [vmem:[#allocation7 + $0x108] sm:$0xff] }
 0x234   : > { %1061 = vmatmul.f32.gmra.mxu0 %v453_v22  ;;  %5805 = vst [vmem:[#allocation49_spill] sm:$0xff] %v4331_v55 }
 0x235   : > { %1270 = vmatmul.f32.gmra.mxu1 %v453_v22  ;;  %v1639_v22 = vld [vmem:[#allocation7 + $0x2c0] sm:$0xff]  ;;  %5809 = vst [vmem:[#allocation53_spill] sm:$0xff] %v4344_v20 }
 0x237   : > { %1950 = vmatmul.f32.gmra.mxu2 %v1635_v51  ;;  %v4333_v46 = vpop.permute.xlu1 %1778 }
 0x238   : > { %2015 = vmatmul.f32.gmra.mxu3 %v4303_v50  ;;  %5806 = vst [vmem:[#allocation50_spill] sm:$0xff] %v4333_v46  ;;  %v4394_v50 = vld [vmem:[#allocation7 + $0x188] sm:$0xff] }
 0x239   : > { %v4308_v39 = vpop.f32.mrf.mxu0  ;;  %5826 = vst [vmem:[#allocation70_spill] sm:$0xff] %v4394_v50 }
 0x23a   : > { %v4310_v9 = vpop.f32.mrf.mxu1  ;;  %v4312_v18 = vpop.f32.mrf.mxu2 }
 0x23b   : > { %5799 = vst [vmem:[#allocation43_spill] sm:$0xff] %v4312_v18  ;;  %v4340_v18 = vpop.permute.xlu0 %1853  ;;  %v4346_v55 = vpop.permute.xlu2 %1783 }
 0x23c   : > { %1064 = vmatmul.f32.gmra.mxu0 %v454_v0  ;;  %5807 = vst [vmem:[#allocation51_spill] sm:$0xff] %v4340_v18 }
 0x23d   : > { %1273 = vmatmul.f32.gmra.mxu1 %v454_v0  ;;  %v1643_v0 = vld [vmem:[#allocation7 + $0x2e0] sm:$0xff]  ;;  %5810 = vst [vmem:[#allocation54_spill] sm:$0xff] %v4346_v55 }
 0x23f   : > { %1953 = vmatmul.f32.gmra.mxu2 %v1639_v22  ;;  %v4351_v28 = vpop.permute.xlu1 %1858 }
 0x240   : > { %2018 = vmatmul.f32.gmra.mxu3 %v4316_v1  ;;  %5811 = vst [vmem:[#allocation55_spill] sm:$0xff] %v4351_v28 }
 0x241   : > { %v4323_v51 = vpop.f32.mrf.mxu0 }
 0x242   : > { %v4325_v19 = vpop.f32.mrf.mxu1  ;;  %v4327_v30 = vpop.f32.mrf.mxu2 }
 0x243   : > { %5803 = vst [vmem:[#allocation47_spill] sm:$0xff] %v4327_v30  ;;  %v4355_v18 = vpop.permute.xlu0 %1758  ;;  %v4362_v1 = vpop.permute.xlu2 %1863 }
 0x244   : > { %1067 = vmatmul.f32.gmra.mxu0 %v455_v35  ;;  %5813 = vst [vmem:[#allocation57_spill] sm:$0xff] %v4355_v18  ;;  %v1655_v18 = vld [vmem:[#allocation7 + $0x340] sm:$0xff] }
 0x245   : > { %1276 = vmatmul.f32.gmra.mxu1 %v455_v35  ;;  %v1647_v35 = vld [vmem:[#allocation7 + $0x300] sm:$0xff]  ;;  %5815 = vst [vmem:[#allocation59_spill] sm:$0xff] %v4362_v1 }
 0x247   : > { %1956 = vmatmul.f32.gmra.mxu2 %v1643_v0  ;;  %v4366_v28 = vpop.permute.xlu1 %1763 }
 0x248   : > { %2021 = vmatmul.f32.gmra.mxu3 %v4329_v59  ;;  %v457_v59 = vld [vmem:[#allocation4 + $0x1e0] sm:$0xff]  ;;  %5817 = vst [vmem:[#allocation61_spill] sm:$0xff] %v4366_v28 }
 0x249   : > { %v4336_v22 = vpop.f32.mrf.mxu0  ;;  %v1659_v28 = vld [vmem:[#allocation7 + $0x360] sm:$0xff] }
 0x24a   : > { %v4338_v8 = vpop.f32.mrf.mxu1  ;;  %v4342_v30 = vpop.f32.mrf.mxu2  ;;  %v1024_v56 = vadd.f32 %v4336_v22, %v4128_v21 }
 0x24b   : > { %5808 = vst [vmem:[#allocation52_spill] sm:$0xff] %v4342_v30  ;;  %v4357_v30 = vld [vmem:[#allocation7 + $0x128] sm:$0xff]  ;;  %v4377_v1 = vpop.permute.xlu2 %1768 }
 0x24c   : > { %1070 = vmatmul.f32.gmra.mxu0 %v456_v45  ;;  %5814 = vst [vmem:[#allocation58_spill] sm:$0xff] %v4357_v30 }
 0x24d   : > { %1279 = vmatmul.f32.gmra.mxu1 %v456_v45  ;;  %v1651_v45 = vld [vmem:[#allocation7 + $0x320] sm:$0xff]  ;;  %5821 = vst [vmem:[#allocation65_spill] sm:$0xff] %v4377_v1 }
 0x24f   : > { %1959 = vmatmul.f32.gmra.mxu2 %v1647_v35 }
 0x250   : > { %2024 = vmatmul.f32.gmra.mxu3 %v4344_v20  ;;  %v458_v20 = vld [vmem:[#allocation4 + $0x1e8] sm:$0xff] }
 0x251   : > { %v1026_v0 = vpop.f32.mrf.mxu0 }
 0x252   : > { %v4349_v46 = vpop.f32.mrf.mxu1  ;;  %v4353_v32 = vpop.f32.mrf.mxu2 }
 0x253   : > { %5812 = vst [vmem:[#allocation56_spill] sm:$0xff] %v4353_v32  ;;  %v4370_v32 = vpop.permute.xlu0 %1838 }
 0x254   : > { %1073 = vmatmul.f32.gmra.mxu0 %v457_v59  ;;  %5819 = vst [vmem:[#allocation63_spill] sm:$0xff] %v4370_v32 }
 0x255   : > { %1282 = vmatmul.f32.gmra.mxu1 %v457_v59  ;;  %v4368_v59 = vld [vmem:[#allocation7 + $0x148] sm:$0xff] }
 0x256   : > { %5818 = vst [vmem:[#allocation62_spill] sm:$0xff] %v4368_v59 }
 0x257   : > { %1962 = vmatmul.f32.gmra.mxu2 %v1651_v45 }
 0x258   : > { %2027 = vmatmul.f32.gmra.mxu3 %v4357_v30 }
 0x259   : > { %v1029_v35 = vpop.f32.mrf.mxu0 }
 0x25a   : > { %v4360_v55 = vpop.f32.mrf.mxu1  ;;  %v4364_v31 = vpop.f32.mrf.mxu2 }
 0x25b   : > { %5816 = vst [vmem:[#allocation60_spill] sm:$0xff] %v4364_v31  ;;  %v4381_v31 = vpop.permute.xlu1 %1843  ;;  %v4383_v38 = vpop.permute.xlu0 %1743 }
 0x25c   : > { %1076 = vmatmul.f32.gmra.mxu0 %v458_v20  ;;  %5823 = vst [vmem:[#allocation67_spill] sm:$0xff] %v4381_v31 }
 0x25d   : > { %1285 = vmatmul.f32.gmra.mxu1 %v458_v20  ;;  %v4379_v20 = vld [vmem:[#allocation7 + $0x168] sm:$0xff]  ;;  %5824 = vst [vmem:[#allocation68_spill] sm:$0xff] %v4383_v38  ;;  %v1027_v38 = vadd.f32 %v1026_v0, %v4132_v58 }
 0x25e   : > { %5822 = vst [vmem:[#allocation66_spill] sm:$0xff] %v4379_v20 }
 0x25f   : > { %1965 = vmatmul.f32.gmra.mxu2 %v1655_v18 }
 0x260   : > { %2030 = vmatmul.f32.gmra.mxu3 %v4368_v59 }
 0x261   : > { %v1032_v45 = vpop.f32.mrf.mxu0 }
 0x262   : > { %v4373_v30 = vpop.f32.mrf.mxu1  ;;  %v4375_v63 = vpop.f32.mrf.mxu2  ;;  %v1033_v18 = vadd.f32 %v1032_v45, %v4120_v49 }
 0x263   : > { %5820 = vst [vmem:[#allocation64_spill] sm:$0xff] %v4375_v63  ;;  %v460_v63 = vld [vmem:[#allocation4 + $0x1f8] sm:$0xff]  ;;  %v4396_v45 = vpop.permute.xlu2 %1848  ;;  %v4400_v44 = vpop.permute.xlu1 %1748 }
 0x264   : > { %1079 = vmatmul.f32.gmra.mxu0 %v459_v41  ;;  %5827 = vst [vmem:[#allocation71_spill] sm:$0xff] %v4396_v45  ;;  %v1383_v45 = vmul.f32 0.2, %v1027_v38 }
 0x265   : > { %1288 = vmatmul.f32.gmra.mxu1 %v459_v41  ;;  %v1030_v41 = vadd.f32 %v1029_v35, %v4142_v26  ;;  %5828 = vst [vmem:[#allocation72_spill] sm:$0xff] %v4400_v44 }
 0x267   : > { %1968 = vmatmul.f32.gmra.mxu2 %v1659_v28  ;;  %v1663_v28 = vld [vmem:[#allocation7 + $0x380] sm:$0xff] }
 0x268   : > { %2033 = vmatmul.f32.gmra.mxu3 %v4379_v20  ;;  %v1387_v20 = vmul.f32 0.2, %v1033_v18 }
 0x269   : > { %v1035_v32 = vpop.f32.mrf.mxu0 }
 0x26a   : > { %v4387_v59 = vpop.f32.mrf.mxu1  ;;  %v1036_v1 = vadd.f32 %v1035_v32, %v4130_v12  ;;  %v4391_v54 = vpop.f32.mrf.mxu2  ;;  %v1385_v32 = vmul.f32 0.2, %v1030_v41 }
 0x26b   : > { %5825 = vst [vmem:[#allocation69_spill] sm:$0xff] %v4391_v54  ;;  %v1515_v54 = vmax.f32 %v1033_v18, %v1387_v20  ;;  %v1667_v20 = vld [vmem:[#allocation7 + $0x3a0] sm:$0xff]  ;;  %v4419_v18 = vld [vmem:[#allocation7 + $0x1a8] sm:$0xff] }
 0x26c   : > { %1082 = vmatmul.f32.gmra.mxu0 %v460_v63  ;;  %v1389_v31 = vmul.f32 0.2, %v1036_v1 }
 0x26d   : > { %1291 = vmatmul.f32.gmra.mxu1 %v460_v63  ;;  %v1021_v63 = vadd.f32 %v4323_v51, %v4198_v7  ;;  %v1511_v51 = vmax.f32 %v1027_v38, %v1383_v45 }
 0x26e   : > { %v1517_v57 = vmax.f32 %v1036_v1, %v1389_v31  ;;  %v4409_v31 = vpop.permute.xlu0 %1823  ;;  %v1018_v1 = vadd.f32 %v4308_v39, %v4174_v48  ;;  %v1012_v39 = vadd.f32 %v4280_v23, %v4245_v43 }
 0x26f   : > { %1971 = vmatmul.f32.gmra.mxu2 %v1663_v28  ;;  %5830 = vst [vmem:[#allocation74_spill] sm:$0xff] %v4409_v31  ;;  %v1513_v28 = vmax.f32 %v1030_v41, %v1385_v32  ;;  %v1379_v31 = vmul.f32 0.2, %v1021_v63  ;;  %v4423_v32 = vpop.permute.xlu2 %1753 }
 0x270   : > { %2036 = vmatmul.f32.gmra.mxu3 %v4394_v50  ;;  %2097 = vmatpush.msrb.mxu2 %v1517_v57  ;;  %v1381_v50 = vmul.f32 0.2, %v1024_v56  ;;  %v1015_v57 = vadd.f32 %v4293_v33, %v4150_v60  ;;  %v1377_v41 = vmul.f32 0.2, %v1018_v1  ;;  %5831 = vst [vmem:[#allocation75_spill] sm:$0xff] %v4423_v32 }
 0x271   : > { %v4405_v0 = vpop.f32.mrf.mxu0  ;;  %v1507_v33 = vmax.f32 %v1021_v63, %v1379_v31  ;;  %v1671_v31 = vld [vmem:[#allocation7 + $0x3c0] sm:$0xff] }
 0x272   : > { %v4407_v35 = vpop.f32.mrf.mxu1  ;;  %v4413_v22 = vpop.f32.mrf.mxu2  ;;  %2098 = vmatpush.msrb.mxu2 %v1515_v54  ;;  %v1509_v54 = vmax.f32 %v1024_v56, %v1381_v50  ;;  %v1375_v45 = vmul.f32 0.2, %v1015_v57  ;;  %v1006_v56 = vadd.f32 %v4254_v40, %v4214_v27  ;;  %v1505_v50 = vmax.f32 %v1018_v1, %v1377_v41 }
 0x273   : > { %5829 = vst [vmem:[#allocation73_spill] sm:$0xff] %v4407_v35 }
 0x274   : > { %2339 = vmatmul.f32.vlgmr.msrb.gmra.mxu0 %v4068_v53  ;;  %2099 = vmatpush.msrb.mxu2 %v1513_v28  ;;  %v1009_v53 = vadd.f32 %v4267_v47, %v4229_v11  ;;  %v4432_v28 = vpop.permute.xlu1 %1828  ;;  %v1003_v47 = vadd.f32 %v4239_v52, %v4277_v42  ;;  %v1503_v63 = vmax.f32 %v1015_v57, %v1375_v45  ;;  %v1369_v41 = vmul.f32 0.2, %v1006_v56 }
 0x275   : > { %2452 = vmatmul.f32.vlgmr.msrb.gmra.mxu1 %v4233_v37  ;;  %5833 = vst [vmem:[#allocation77_spill] sm:$0xff] %v4432_v28  ;;  %v1581_v28 = vld [vmem:[#allocation7 + $0xf0] sm:$0xff] }
 0x276   : > { %2100 = vmatpush.msrb.mxu2 %v1511_v51  ;;  %v1373_v51 = vmul.f32 0.2, %v1012_v39  ;;  %v1371_v40 = vmul.f32 0.2, %v1009_v53  ;;  %v1367_v45 = vmul.f32 0.2, %v1003_v47 }
 0x277   : > { %1974 = vmatmul.f32.gmra.mxu2 %v1667_v20  ;;  %v4438_v20 = vpop.permute.xlu0 %1728 }
 0x278   : > { %2039 = vmatmul.f32.gmra.mxu3 %v4419_v18  ;;  %2101 = vmatpush.msrb.mxu2 %v1509_v54  ;;  %5834 = vst [vmem:[#allocation78_spill] sm:$0xff] %v4438_v20  ;;  %v4444_v54 = vld [vmem:[#allocation7 + $0x1c8] sm:$0xff]  ;;  %v1501_v1 = vmax.f32 %v1012_v39, %v1373_v51  ;;  %v1499_v57 = vmax.f32 %v1009_v53, %v1371_v40  ;;  %v1675_v40 = vld [vmem:[#allocation7 + $0x3e0] sm:$0xff] }
 0x279   : > { %v4428_v38 = vpop.f32.mrf.mxu0  ;;  %v1497_v51 = vmax.f32 %v1006_v56, %v1369_v41  ;;  %v1495_v53 = vmax.f32 %v1003_v47, %v1367_v45  ;;  %v1245_v56 = vadd.f32 %v4387_v59, %v4130_v12 }
 0x27a   : > { %v4430_v37 = vpop.f32.mrf.mxu1  ;;  %v4436_v23 = vpop.f32.mrf.mxu2  ;;  %2102 = vmatpush.msrb.mxu2 %v1507_v33  ;;  %v1000_v33 = vadd.f32 %v4223_v36, %v4264_v3  ;;  %v994_v36 = vadd.f32 %v4180_v15, %v4314_v61 }
 0x27b   : > { %5832 = vst [vmem:[#allocation76_spill] sm:$0xff] %v4430_v37  ;;  %v1390_v12 = vmul.f32 0.2, %v1245_v56  ;;  %v5915_v37 = vld [vmem:[#allocation46_spill] sm:$0xff] }
 0x27c   : > { %2342 = vmatmul.f32.gmra.mxu0 %v4081_v29  ;;  %2103 = vmatpush.msrb.mxu2 %v1505_v50  ;;  %v997_v29 = vadd.f32 %v4204_v4, %v4251_v2  ;;  %v4455_v50 = vpop.permute.xlu2 %1833  ;;  %v991_v4 = vadd.f32 %v4156_v17, %v4301_v25 }
 0x27d   : > { %2455 = vmatmul.f32.gmra.mxu1 %v4247_v6  ;;  %5836 = vst [vmem:[#allocation80_spill] sm:$0xff] %v4455_v50 }
 0x27e   : > { %2104 = vmatpush.msrb.mxu2 %v1503_v63  ;;  %v1365_v63 = vmul.f32 0.2, %v1000_v33  ;;  %v1363_v15 = vmul.f32 0.2, %v997_v29  ;;  %v1359_v45 = vmul.f32 0.2, %v991_v4 }
 0x27f   : > { %1977 = vmatmul.f32.gmra.mxu2 %v1671_v31  ;;  %v4461_v31 = vpop.permute.xlu1 %1733  ;;  %v4469_v50 = vpop.permute.xlu0 %1808 }
 0x280   : > { %2042 = vmatmul.f32.gmra.mxu3 %v4444_v54  ;;  %2105 = vmatpush.msrb.mxu2 %v1501_v1  ;;  %5837 = vst [vmem:[#allocation81_spill] sm:$0xff] %v4461_v31  ;;  %v4467_v1 = vld [vmem:[#allocation7 + $0x1e8] sm:$0xff]  ;;  %v1493_v41 = vmax.f32 %v1000_v33, %v1365_v63  ;;  %v1491_v47 = vmax.f32 %v997_v29, %v1363_v15 }
 0x281   : > { %v4451_v52 = vpop.f32.mrf.mxu0  ;;  %5838 = vst [vmem:[#allocation82_spill] sm:$0xff] %v4469_v50  ;;  %v1487_v29 = vmax.f32 %v991_v4, %v1359_v45  ;;  %v1518_v15 = vmax.f32 %v1245_v56, %v1390_v12 }
 0x282   : > { %v4453_v6 = vpop.f32.mrf.mxu1  ;;  %v4459_v39 = vpop.f32.mrf.mxu2  ;;  %2106 = vmatpush.msrb.mxu2 %v1499_v57  ;;  %v1361_v57 = vmul.f32 0.2, %v994_v36 }
 0x283   : > { %5835 = vst [vmem:[#allocation79_spill] sm:$0xff] %v4453_v6 }
 0x284   : > { %2345 = vmatmul.f32.gmra.mxu0 %v4090_v5  ;;  %2107 = vmatpush.msrb.mxu2 %v1497_v51  ;;  %v1242_v5 = vadd.f32 %v4373_v30, %v4120_v49  ;;  %v1239_v51 = vadd.f32 %v4360_v55, %v4142_v26  ;;  %v1489_v33 = vmax.f32 %v994_v36, %v1361_v57  ;;  %v4484_v63 = vpop.permute.xlu2 %1738  ;;  %v1553_v26 = vld [vmem:[#allocation7 + $0x10] sm:$0xff] }
 0x285   : > { %2458 = vmatmul.f32.gmra.mxu1 %v4260_v10  ;;  %5839 = vst [vmem:[#allocation83_spill] sm:$0xff] %v4484_v63  ;;  %v1236_v49 = vadd.f32 %v4349_v46, %v4132_v58  ;;  %v1233_v36 = vadd.f32 %v4338_v8, %v4128_v21  ;;  %v1230_v58 = vadd.f32 %v4325_v19, %v4198_v7  ;;  %v3196_v19 = vld [vmem:[#allocation7 + $0x80] sm:$0xff] }
 0x286   : > { %2108 = vmatpush.msrb.mxu2 %v1495_v53  ;;  %v1388_v30 = vmul.f32 0.2, %v1242_v5  ;;  %v4490_v53 = vld [vmem:[#allocation7 + $0x208] sm:$0xff]  ;;  %v1227_v8 = vadd.f32 %v4310_v9, %v4174_v48  ;;  %v1557_v48 = vld [vmem:[#allocation7 + $0x30] sm:$0xff] }
 0x287   : > { %1980 = vmatmul.f32.gmra.mxu2 %v1675_v40  ;;  %v4492_v55 = vpop.permute.xlu1 %1813  ;;  %v1386_v40 = vmul.f32 0.2, %v1239_v51  ;;  %v1384_v46 = vmul.f32 0.2, %v1236_v49  ;;  %v1382_v56 = vmul.f32 0.2, %v1233_v36 }
 0x288   : > { %2045 = vmatmul.f32.gmra.mxu3 %v4467_v1  ;;  %2109 = vmatpush.msrb.mxu2 %v1493_v41  ;;  %5840 = vst [vmem:[#allocation84_spill] sm:$0xff] %v4492_v55  ;;  %v1380_v12 = vmul.f32 0.2, %v1230_v58 }
 0x289   : > { %v4476_v17 = vpop.f32.mrf.mxu0  ;;  %v1514_v57 = vmax.f32 %v1239_v51, %v1386_v40  ;;  %v1221_v51 = vadd.f32 %v4282_v24, %v4245_v43  ;;  %v5845_v43 = vld [vmem:[#allocation31_spill] sm:$0xff] }
 0x28a   : > { %v4478_v10 = vpop.f32.mrf.mxu1  ;;  %v4482_v59 = vpop.f32.mrf.mxu2  ;;  %2110 = vmatpush.msrb.mxu2 %v1491_v47 }
 0x28c   : > { %2348 = vmatmul.f32.gmra.mxu0 %v4097_v34  ;;  %2111 = vmatpush.msrb.mxu2 %v1489_v33  ;;  %v4496_v34 = vpop.permute.xlu0 %1713  ;;  %v4516_v33 = vld [vmem:[#allocation7 + $0x228] sm:$0xff]  ;;  %v4518_v9 = vpop.permute.xlu2 %1818 }
 0x28d   : > { %2461 = vmatmul.f32.gmra.mxu1 %v4275_v62  ;;  %5841 = vst [vmem:[#allocation85_spill] sm:$0xff] %v4496_v34  ;;  %v1516_v62 = vmax.f32 %v1242_v5, %v1388_v30  ;;  %v1889_v21 = vadd.f32 %v4243_v14, %v4496_v34  ;;  %v1224_v5 = vadd.f32 %v4295_v13, %v4150_v60  ;;  %v1378_v30 = vmul.f32 0.2, %v1227_v8  ;;  %v5844_v60 = vld [vmem:[#allocation33_spill] sm:$0xff] }
 0x28e   : > { %2112 = vmatpush.msrb.mxu2 %v1487_v29  ;;  %v1512_v14 = vmax.f32 %v1236_v49, %v1384_v46  ;;  %5842 = vst [vmem:[#allocation86_spill] sm:$0xff] %v4518_v9  ;;  %v1510_v29 = vmax.f32 %v1233_v36, %v1382_v56  ;;  %v1508_v49 = vmax.f32 %v1230_v58, %v1380_v12  ;;  %v5846_v36 = vld [vmem:[#allocation30_spill] sm:$0xff]  ;;  %v3197_v58 = vld [vmem:[#allocation7 + $0xa0] sm:$0xff] }
 0x28f   : > { %2113 = vmatmul.f32.vlgmr.msrb.gmra.mxu2 %v1553_v26  ;;  %v4522_v26 = vpop.permute.xlu1 %1718  ;;  %v1376_v13 = vmul.f32 0.2, %v1224_v5  ;;  %v1215_v46 = vadd.f32 %v5846_v36, %v4214_v27  ;;  %v1561_v27 = vld [vmem:[#allocation7 + $0x50] sm:$0xff]  ;;  %v4622_v34 = vld [vmem:[#allocation7 + $0x2e8] sm:$0xff] }
 0x290   : > { %2048 = vmatmul.f32.gmra.mxu3 %v4490_v53  ;;  %2549 = vmatpush.msra.mxu2 %v1518_v15  ;;  %5843 = vst [vmem:[#allocation87_spill] sm:$0xff] %v4522_v26  ;;  %v1892_v24 = vadd.f32 %v5845_v43, %v4522_v26 }
 0x291   : > { %v4501_v4 = vpop.f32.mrf.mxu0 }
 0x292   : > { %v4503_v41 = vpop.f32.mrf.mxu1  ;;  %2550 = vmatpush.msra.mxu2 %v1516_v62  ;;  %v4509_v47 = vpop.f32.mrf.mxu2  ;;  %v1374_v62 = vmul.f32 0.2, %v1221_v51 }
 0x293   : > { %v2001_v45 = vpop.f32.mrf.mxu3 }
 0x294   : > { %v4511_v7 = vadd.f32 %v2001_v45, %v1889_v21  ;;  %2351 = vmatmul.f32.gmra.mxu0 %v3196_v19  ;;  %2551 = vmatpush.msra.mxu2 %v1514_v57  ;;  %v1506_v21 = vmax.f32 %v1227_v8, %v1378_v30  ;;  %v5847_v45 = vld [vmem:[#allocation41_spill] sm:$0xff]  ;;  %v5848_v19 = vld [vmem:[#allocation28_spill] sm:$0xff]  ;;  %v5849_v8 = vld [vmem:[#allocation18_spill] sm:$0xff]  ;;  %v4546_v43 = vpop.permute.xlu2 %1723 }
 0x295   : > { %2464 = vmatmul.f32.gmra.mxu1 %v4290_v16  ;;  %v1218_v16 = vadd.f32 %v5844_v60, %v4229_v11  ;;  %v1212_v12 = vadd.f32 %v5848_v19, %v4277_v42  ;;  %v1209_v30 = vadd.f32 %v5849_v8, %v4264_v3  ;;  %v1370_v60 = vmul.f32 0.2, %v1215_v46  ;;  %5850 = vst [vmem:[#allocation33_spill] sm:$0xff] %v4546_v43  ;;  %v5852_v3 = vld [vmem:[#allocation35_spill] sm:$0xff] }
 0x296   : > { %2552 = vmatpush.msra.mxu2 %v1512_v14 }
 0x297   : > { %2116 = vmatmul.f32.gmra.mxu2 %v1557_v48  ;;  %v1372_v14 = vmul.f32 0.2, %v1218_v16  ;;  %v1504_v48 = vmax.f32 %v1224_v5, %v1376_v13  ;;  %v1368_v36 = vmul.f32 0.2, %v1212_v12 }
 0x298   : > { %2051 = vmatmul.f32.gmra.mxu3 %v4516_v33  ;;  %2553 = vmatpush.msra.mxu2 %v1510_v29  ;;  %v4542_v29 = vld [vmem:[#allocation7 + $0x248] sm:$0xff] }
 0x299   : > { %v4527_v40 = vpop.f32.mrf.mxu0  ;;  %v1500_v5 = vmax.f32 %v1218_v16, %v1372_v14  ;;  %v3198_v16 = vld [vmem:[#allocation7 + $0xc0] sm:$0xff] }
 0x29a   : > { %v4529_v15 = vpop.f32.mrf.mxu1  ;;  %2554 = vmatpush.msra.mxu2 %v1508_v49  ;;  %v4535_v56 = vpop.f32.mrf.mxu2  ;;  %v1502_v49 = vmax.f32 %v1221_v51, %v1374_v62  ;;  %v5853_v51 = vld [vmem:[#allocation14_spill] sm:$0xff]  ;;  %v5856_v14 = vld [vmem:[#allocation44_spill] sm:$0xff] }
 0x29b   : > { %v2004_v57 = vpop.f32.mrf.mxu3  ;;  %v1203_v62 = vadd.f32 %v5853_v51, %v4314_v61  ;;  %v1565_v61 = vld [vmem:[#allocation7 + $0x70] sm:$0xff] }
 0x29c   : > { %v4537_v11 = vadd.f32 %v2004_v57, %v1892_v24  ;;  %2354 = vmatmul.f32.gmra.mxu0 %v3197_v58  ;;  %2555 = vmatpush.msra.mxu2 %v1506_v21  ;;  %v5851_v24 = vld [vmem:[#allocation16_spill] sm:$0xff]  ;;  %v1895_v57 = vadd.f32 %v5852_v3, %v4546_v43  ;;  %v1366_v58 = vmul.f32 0.2, %v1209_v30  ;;  %v4566_v3 = vld [vmem:[#allocation7 + $0x268] sm:$0xff] }
 0x29d   : > { %2467 = vmatmul.f32.gmra.mxu1 %v5847_v45  ;;  %v1206_v42 = vadd.f32 %v5851_v24, %v4251_v2  ;;  %v1498_v45 = vmax.f32 %v1215_v46, %v1370_v60  ;;  %v1496_v24 = vmax.f32 %v1212_v12, %v1368_v36  ;;  %v1362_v46 = vmul.f32 0.2, %v1203_v62 }
 0x29e   : > { %2556 = vmatpush.msra.mxu2 %v1504_v48  ;;  %v1494_v60 = vmax.f32 %v1209_v30, %v1366_v58  ;;  %v3199_v58 = vld [vmem:[#allocation7 + $0xe0] sm:$0xff] }
 0x29f   : > { %2119 = vmatmul.f32.gmra.mxu2 %v1561_v27  ;;  %v5857_v27 = vld [vmem:[#allocation23_spill] sm:$0xff]  ;;  %v1490_v36 = vmax.f32 %v1203_v62, %v1362_v46 }
 0x2a0   : > { %2054 = vmatmul.f32.gmra.mxu3 %v4542_v29  ;;  %2557 = vmatpush.msra.mxu2 %v1502_v49  ;;  %v1200_v8 = vadd.f32 %v5857_v27, %v4301_v25  ;;  %v1364_v49 = vmul.f32 0.2, %v1206_v42  ;;  %v5858_v25 = vld [vmem:[#allocation37_spill] sm:$0xff] }
 0x2a1   : > { %v4551_v13 = vpop.f32.mrf.mxu0  ;;  %v1898_v12 = vadd.f32 %v5858_v25, %v4438_v20  ;;  %v4580_v27 = vld [vmem:[#allocation7 + $0x288] sm:$0xff] }
 0x2a2   : > { %v4553_v21 = vpop.f32.mrf.mxu1  ;;  %2558 = vmatpush.msra.mxu2 %v1500_v5  ;;  %v4559_v19 = vpop.f32.mrf.mxu2  ;;  %v1360_v5 = vmul.f32 0.2, %v1200_v8 }
 0x2a3   : > { %5854 = vst [vmem:[#allocation31_spill] sm:$0xff] %v4559_v19  ;;  %v2007_v48 = vpop.f32.mrf.mxu3 }
 0x2a4   : > { %v4561_v2 = vadd.f32 %v2007_v48, %v1895_v57  ;;  %2357 = vmatmul.f32.gmra.mxu0 %v3198_v16  ;;  %2559 = vmatpush.msra.mxu2 %v1498_v45  ;;  %v1492_v57 = vmax.f32 %v1206_v42, %v1364_v49  ;;  %v1488_v42 = vmax.f32 %v1200_v8, %v1360_v5  ;;  %v1569_v49 = vld [vmem:[#allocation7 + $0x90] sm:$0xff]  ;;  %v3200_v8 = vld [vmem:[#allocation7 + $0x100] sm:$0xff] }
 0x2a5   : > { %2470 = vmatmul.f32.gmra.mxu1 %v5856_v14  ;;  %v5861_v14 = vld [vmem:[#allocation48_spill] sm:$0xff]  ;;  %v5865_v5 = vld [vmem:[#allocation53_spill] sm:$0xff] }
 0x2a6   : > { %5855 = vst [vmem:[#allocation30_spill] sm:$0xff] %v4561_v2  ;;  %2560 = vmatpush.msra.mxu2 %v1496_v24  ;;  %v4700_v2 = vld [vmem:[#allocation7 + $0x190] sm:$0xff] }
 0x2a7   : > { %2122 = vmatmul.f32.gmra.mxu2 %v1565_v61  ;;  %v5862_v61 = vld [vmem:[#allocation40_spill] sm:$0xff]  ;;  %5876 = vst [vmem:[#allocation48_spill] sm:$0xff] %v4622_v34 }
 0x2a8   : > { %2057 = vmatmul.f32.gmra.mxu3 %v4566_v3  ;;  %2561 = vmatpush.msra.mxu2 %v1494_v60  ;;  %v1901_v46 = vadd.f32 %v5862_v61, %v4461_v31  ;;  %v1577_v31 = vld [vmem:[#allocation7 + $0xd0] sm:$0xff] }
 0x2a9   : > { %v4569_v51 = vpop.f32.mrf.mxu0 }
 0x2aa   : > { %v4571_v48 = vpop.f32.mrf.mxu1  ;;  %2562 = vmatpush.msra.mxu2 %v1492_v57  ;;  %v4575_v45 = vpop.f32.mrf.mxu2 }
 0x2ab   : > { %5859 = vst [vmem:[#allocation41_spill] sm:$0xff] %v4575_v45  ;;  %v2010_v16 = vpop.f32.mrf.mxu3 }
 0x2ac   : > { %v4577_v30 = vadd.f32 %v2010_v16, %v1898_v12  ;;  %2360 = vmatmul.f32.gmra.mxu0 %v3199_v58  ;;  %2563 = vmatpush.msra.mxu2 %v1490_v36  ;;  %v4594_v12 = vld [vmem:[#allocation7 + $0x2a8] sm:$0xff]  ;;  %v1573_v36 = vld [vmem:[#allocation7 + $0xb0] sm:$0xff] }
 0x2ad   : > { %2473 = vmatmul.f32.gmra.mxu1 %v5861_v14  ;;  %v5866_v14 = vld [vmem:[#allocation43_spill] sm:$0xff] }
 0x2ae   : > { %5860 = vst [vmem:[#allocation28_spill] sm:$0xff] %v4577_v30  ;;  %2564 = vmatpush.msra.mxu2 %v1488_v42  ;;  %v1904_v42 = vadd.f32 %v5866_v14, %v4484_v63  ;;  %v5871_v14 = vld [vmem:[#allocation68_spill] sm:$0xff]  ;;  %v5872_v63 = vld [vmem:[#allocation47_spill] sm:$0xff] }
 0x2af   : > { %2125 = vmatmul.f32.gmra.mxu2 %v1569_v49  ;;  %v1907_v43 = vadd.f32 %v5872_v63, %v5871_v14  ;;  %v5877_v63 = vld [vmem:[#allocation52_spill] sm:$0xff] }
 0x2b0   : > { %2060 = vmatmul.f32.gmra.mxu3 %v4580_v27  ;;  %v1910_v14 = vadd.f32 %v5877_v63, %v4400_v44  ;;  %v5882_v63 = vld [vmem:[#allocation56_spill] sm:$0xff] }
 0x2b1   : > { %v4583_v62 = vpop.f32.mrf.mxu0  ;;  %v1913_v44 = vadd.f32 %v5882_v63, %v4423_v32  ;;  %v5888_v63 = vld [vmem:[#allocation57_spill] sm:$0xff]  ;;  %v5889_v32 = vld [vmem:[#allocation60_spill] sm:$0xff] }
 0x2b2   : > { %v4585_v24 = vpop.f32.mrf.mxu1  ;;  %v4589_v60 = vpop.f32.mrf.mxu2 }
 0x2b3   : > { %5863 = vst [vmem:[#allocation18_spill] sm:$0xff] %v4589_v60  ;;  %v2013_v57 = vpop.f32.mrf.mxu3 }
 0x2b4   : > { %v4591_v25 = vadd.f32 %v2013_v57, %v1901_v46  ;;  %2363 = vmatmul.f32.gmra.mxu0 %v3200_v8  ;;  %v3201_v57 = vld [vmem:[#allocation7 + $0x120] sm:$0xff]  ;;  %v5869_v8 = vld [vmem:[#allocation58_spill] sm:$0xff] }
 0x2b5   : > { %2476 = vmatmul.f32.gmra.mxu1 %v5865_v5  ;;  %v4608_v5 = vld [vmem:[#allocation7 + $0x2c8] sm:$0xff] }
 0x2b6   : > { %5864 = vst [vmem:[#allocation16_spill] sm:$0xff] %v4591_v25  ;;  %v4650_v25 = vld [vmem:[#allocation7 + $0x130] sm:$0xff] }
 0x2b7   : > { %2128 = vmatmul.f32.gmra.mxu2 %v1573_v36  ;;  %5870 = vst [vmem:[#allocation44_spill] sm:$0xff] %v4608_v5 }
 0x2b8   : > { %2063 = vmatmul.f32.gmra.mxu3 %v4594_v12  ;;  %5887 = vst [vmem:[#allocation52_spill] sm:$0xff] %v4650_v25 }
 0x2b9   : > { %v4597_v16 = vpop.f32.mrf.mxu0 }
 0x2ba   : > { %v4599_v58 = vpop.f32.mrf.mxu1  ;;  %v4603_v49 = vpop.f32.mrf.mxu2 }
 0x2bb   : > { %5867 = vst [vmem:[#allocation35_spill] sm:$0xff] %v4603_v49  ;;  %v2016_v61 = vpop.f32.mrf.mxu3  ;;  %v1585_v49 = vld [vmem:[#allocation7 + $0x110] sm:$0xff] }
 0x2bc   : > { %v4605_v46 = vadd.f32 %v2016_v61, %v1904_v42  ;;  %2366 = vmatmul.f32.gmra.mxu0 %v3201_v57  ;;  %v3202_v57 = vld [vmem:[#allocation7 + $0x140] sm:$0xff] }
 0x2bd   : > { %2479 = vmatmul.f32.gmra.mxu1 %v5869_v8  ;;  %v5875_v8 = vld [vmem:[#allocation62_spill] sm:$0xff] }
 0x2be   : > { %5868 = vst [vmem:[#allocation14_spill] sm:$0xff] %v4605_v46 }
 0x2bf   : > { %2131 = vmatmul.f32.gmra.mxu2 %v1577_v31 }
 0x2c0   : > { %2066 = vmatmul.f32.gmra.mxu3 %v4608_v5  ;;  %v4698_v5 = vld [vmem:[#allocation7 + $0x388] sm:$0xff] }
 0x2c1   : > { %v4611_v36 = vpop.f32.mrf.mxu0 }
 0x2c2   : > { %v4613_v20 = vpop.f32.mrf.mxu1  ;;  %v4617_v26 = vpop.f32.mrf.mxu2 }
 0x2c3   : > { %5873 = vst [vmem:[#allocation23_spill] sm:$0xff] %v4617_v26  ;;  %v2019_v42 = vpop.f32.mrf.mxu3 }
 0x2c4   : > { %v4619_v61 = vadd.f32 %v2019_v42, %v1907_v43  ;;  %2369 = vmatmul.f32.gmra.mxu0 %v3202_v57  ;;  %v3203_v57 = vld [vmem:[#allocation7 + $0x160] sm:$0xff] }
 0x2c5   : > { %2482 = vmatmul.f32.gmra.mxu1 %v5875_v8  ;;  %v5880_v8 = vld [vmem:[#allocation66_spill] sm:$0xff] }
 0x2c6   : > { %5874 = vst [vmem:[#allocation37_spill] sm:$0xff] %v4619_v61  ;;  %v4636_v61 = vld [vmem:[#allocation7 + $0x308] sm:$0xff] }
 0x2c7   : > { %2134 = vmatmul.f32.gmra.mxu2 %v1581_v28  ;;  %5881 = vst [vmem:[#allocation43_spill] sm:$0xff] %v4636_v61 }
 0x2c8   : > { %2069 = vmatmul.f32.gmra.mxu3 %v4622_v34  ;;  %v5904_v34 = vld [vmem:[#allocation13_spill] sm:$0xff] }
 0x2c9   : > { %v4625_v31 = vpop.f32.mrf.mxu0  ;;  %5910 = vst [vmem:[#allocation13_spill] sm:$0xff] %v4700_v2 }
 0x2ca   : > { %v4627_v46 = vpop.f32.mrf.mxu1  ;;  %v4631_v26 = vpop.f32.mrf.mxu2 }
 0x2cb   : > { %5878 = vst [vmem:[#allocation40_spill] sm:$0xff] %v4631_v26  ;;  %v2022_v43 = vpop.f32.mrf.mxu3 }
 0x2cc   : > { %v4633_v42 = vadd.f32 %v2022_v43, %v1910_v14  ;;  %2372 = vmatmul.f32.gmra.mxu0 %v3203_v57  ;;  %v3204_v57 = vld [vmem:[#allocation7 + $0x180] sm:$0xff] }
 0x2cd   : > { %2485 = vmatmul.f32.gmra.mxu1 %v5880_v8  ;;  %v5885_v8 = vld [vmem:[#allocation70_spill] sm:$0xff] }
 0x2ce   : > { %5879 = vst [vmem:[#allocation53_spill] sm:$0xff] %v4633_v42  ;;  %v4648_v42 = vld [vmem:[#allocation7 + $0x328] sm:$0xff] }
 0x2cf   : > { %2137 = vmatmul.f32.gmra.mxu2 %v1585_v49  ;;  %5886 = vst [vmem:[#allocation62_spill] sm:$0xff] %v4648_v42 }
 0x2d0   : > { %2072 = vmatmul.f32.gmra.mxu3 %v4636_v61 }
 0x2d1   : > { %v1074_v28 = vpop.f32.mrf.mxu0 }
 0x2d2   : > { %v4639_v9 = vpop.f32.mrf.mxu1  ;;  %v4643_v26 = vpop.f32.mrf.mxu2 }
 0x2d3   : > { %5883 = vst [vmem:[#allocation58_spill] sm:$0xff] %v4643_v26  ;;  %v2025_v14 = vpop.f32.mrf.mxu3  ;;  %v1916_v26 = vadd.f32 %v5889_v32, %v5888_v63  ;;  %v5894_v32 = vld [vmem:[#allocation61_spill] sm:$0xff]  ;;  %v5895_v63 = vld [vmem:[#allocation64_spill] sm:$0xff] }
 0x2d4   : > { %v4645_v43 = vadd.f32 %v2025_v14, %v1913_v44  ;;  %2375 = vmatmul.f32.gmra.mxu0 %v3204_v57 }
 0x2d5   : > { %2488 = vmatmul.f32.gmra.mxu1 %v5885_v8  ;;  %v3205_v8 = vld [vmem:[#allocation7 + $0x1a0] sm:$0xff] }
 0x2d6   : > { %5884 = vst [vmem:[#allocation47_spill] sm:$0xff] %v4645_v43  ;;  %v4663_v43 = vld [vmem:[#allocation7 + $0x348] sm:$0xff] }
 0x2d7   : > { %2140 = vmatmul.f32.gmra.mxu2 %v4650_v25  ;;  %5892 = vst [vmem:[#allocation70_spill] sm:$0xff] %v4663_v43 }
 0x2d8   : > { %2075 = vmatmul.f32.gmra.mxu3 %v4648_v42  ;;  %v4665_v42 = vld [vmem:[#allocation7 + $0x150] sm:$0xff] }
 0x2d9   : > { %v1077_v49 = vpop.f32.mrf.mxu0  ;;  %5893 = vst [vmem:[#allocation60_spill] sm:$0xff] %v4665_v42 }
 0x2da   : > { %v4654_v61 = vpop.f32.mrf.mxu1  ;;  %v4658_v44 = vpop.f32.mrf.mxu2 }
 0x2db   : > { %5890 = vst [vmem:[#allocation66_spill] sm:$0xff] %v4658_v44  ;;  %v2028_v14 = vpop.f32.mrf.mxu3  ;;  %v1919_v44 = vadd.f32 %v5895_v63, %v5894_v32 }
 0x2dc   : > { %v4660_v57 = vadd.f32 %v2028_v14, %v1916_v26  ;;  %2378 = vmatmul.f32.gmra.mxu0 %v3205_v8 }
 0x2dd   : > { %2491 = vmatmul.f32.gmra.mxu1 %v4419_v18  ;;  %v3206_v18 = vld [vmem:[#allocation7 + $0x1c0] sm:$0xff] }
 0x2de   : > { %5891 = vst [vmem:[#allocation56_spill] sm:$0xff] %v4660_v57  ;;  %v4678_v57 = vld [vmem:[#allocation7 + $0x368] sm:$0xff] }
 0x2df   : > { %2143 = vmatmul.f32.gmra.mxu2 %v4665_v42  ;;  %5898 = vst [vmem:[#allocation89_spill] sm:$0xff] %v4678_v57  ;;  %v5900_v42 = vld [vmem:[#allocation19_spill] sm:$0xff] }
 0x2e0   : > { %2078 = vmatmul.f32.gmra.mxu3 %v4663_v43  ;;  %v4680_v43 = vld [vmem:[#allocation7 + $0x170] sm:$0xff] }
 0x2e1   : > { %v1080_v25 = vpop.f32.mrf.mxu0  ;;  %5899 = vst [vmem:[#allocation90_spill] sm:$0xff] %v4680_v43 }
 0x2e2   : > { %v4669_v60 = vpop.f32.mrf.mxu1  ;;  %v4673_v26 = vpop.f32.mrf.mxu2  ;;  %v1081_v55 = vadd.f32 %v1080_v25, %v5900_v42 }
 0x2e3   : > { %5896 = vst [vmem:[#allocation64_spill] sm:$0xff] %v4673_v26  ;;  %v2031_v14 = vpop.f32.mrf.mxu3  ;;  %v5901_v26 = vld [vmem:[#allocation65_spill] sm:$0xff] }
 0x2e4   : > { %v4675_v8 = vadd.f32 %v2031_v14, %v1919_v44  ;;  %2381 = vmatmul.f32.gmra.mxu0 %v3206_v18  ;;  %v5902_v44 = vld [vmem:[#allocation69_spill] sm:$0xff] }
 0x2e5   : > { %2494 = vmatmul.f32.gmra.mxu1 %v4444_v54  ;;  %v1922_v14 = vadd.f32 %v5902_v44, %v5901_v26  ;;  %v1078_v54 = vadd.f32 %v1077_v49, %v5904_v34  ;;  %v1419_v44 = vmul.f32 0.2, %v1081_v55  ;;  %v5911_v26 = vld [vmem:[#allocation21_spill] sm:$0xff] }
 0x2e6   : > { %5897 = vst [vmem:[#allocation88_spill] sm:$0xff] %v4675_v8  ;;  %v5903_v8 = vld [vmem:[#allocation20_spill] sm:$0xff]  ;;  %v1072_v49 = vadd.f32 %v4625_v31, %v5911_v26 }
 0x2e7   : > { %2146 = vmatmul.f32.gmra.mxu2 %v4680_v43  ;;  %v5908_v43 = vld [vmem:[#allocation22_spill] sm:$0xff]  ;;  %5909 = vst [vmem:[#allocation20_spill] sm:$0xff] %v4698_v5 }
 0x2e8   : > { %2081 = vmatmul.f32.gmra.mxu3 %v4678_v57  ;;  %v5907_v57 = vld [vmem:[#allocation17_spill] sm:$0xff]  ;;  %v1075_v35 = vadd.f32 %v1074_v28, %v5908_v43  ;;  %v1547_v28 = vmax.f32 %v1081_v55, %v1419_v44  ;;  %v1413_v6 = vmul.f32 0.2, %v1072_v49  ;;  %v5919_v55 = vld [vmem:[#allocation15_spill] sm:$0xff] }
 0x2e9   : > { %v1083_v63 = vpop.f32.mrf.mxu0  ;;  %v1063_v44 = vadd.f32 %v4583_v62, %v5919_v55 }
 0x2ea   : > { %v4685_v32 = vpop.f32.mrf.mxu1  ;;  %v1084_v18 = vadd.f32 %v1083_v63, %v5903_v8  ;;  %v4691_v30 = vpop.f32.mrf.mxu2 }
 0x2eb   : > { %5905 = vst [vmem:[#allocation19_spill] sm:$0xff] %v4691_v30  ;;  %v2034_v45 = vpop.f32.mrf.mxu3  ;;  %v1417_v30 = vmul.f32 0.2, %v1078_v54 }
 0x2ec   : > { %v4693_v50 = vadd.f32 %v2034_v45, %v1922_v14  ;;  %2384 = vmatmul.f32.gmra.mxu0 %v5907_v57  ;;  %v1421_v25 = vmul.f32 0.2, %v1084_v18  ;;  %v5912_v45 = vld [vmem:[#allocation25_spill] sm:$0xff] }
 0x2ed   : > { %2497 = vmatmul.f32.gmra.mxu1 %v4467_v1  ;;  %v1069_v1 = vadd.f32 %v4611_v36, %v5912_v45 }
 0x2ee   : > { %5906 = vst [vmem:[#allocation69_spill] sm:$0xff] %v4693_v50  ;;  %v1549_v63 = vmax.f32 %v1084_v18, %v1421_v25  ;;  %v1415_v50 = vmul.f32 0.2, %v1075_v35  ;;  %v1925_v18 = vadd.f32 %v4413_v22, %v5915_v37  ;;  %v5916_v25 = vld [vmem:[#allocation24_spill] sm:$0xff]  ;;  %v4724_v37 = vld [vmem:[#allocation7 + $0x3a8] sm:$0xff] }
 0x2ef   : > { %2149 = vmatmul.f32.gmra.mxu2 %v4700_v2  ;;  %v1066_v31 = vadd.f32 %v4597_v16, %v5916_v25  ;;  %v1545_v2 = vmax.f32 %v1078_v54, %v1417_v30  ;;  %v4726_v16 = vld [vmem:[#allocation7 + $0x1b0] sm:$0xff] }
 0x2f0   : > { %2084 = vmatmul.f32.gmra.mxu3 %v4698_v5  ;;  %v1543_v22 = vmax.f32 %v1075_v35, %v1415_v50  ;;  %5920 = vst [vmem:[#allocation25_spill] sm:$0xff] %v4726_v16 }
 0x2f1   : > { %2210 = vmatpush.msrb.mxu3 %v1549_v63  ;;  %v4708_v57 = vpop.f32.mrf.mxu0  ;;  %v5918_v63 = vld [vmem:[#allocation26_spill] sm:$0xff]  ;;  %v1409_v54 = vmul.f32 0.2, %v1066_v31 }
 0x2f2   : > { %5913 = vst [vmem:[#allocation17_spill] sm:$0xff] %v4708_v57  ;;  %v4710_v14 = vpop.f32.mrf.mxu1  ;;  %v4716_v19 = vpop.f32.mrf.mxu2  ;;  %v5921_v57 = vld [vmem:[#allocation32_spill] sm:$0xff] }
 0x2f3   : > { %5914 = vst [vmem:[#allocation22_spill] sm:$0xff] %v4710_v14  ;;  %v2037_v5 = vpop.f32.mrf.mxu3  ;;  %2211 = vmatpush.msrb.mxu3 %v1547_v28  ;;  %v1411_v14 = vmul.f32 0.2, %v1069_v1  ;;  %v1060_v30 = vadd.f32 %v4569_v51, %v5921_v57  ;;  %v1407_v28 = vmul.f32 0.2, %v1063_v44 }
 0x2f4   : > { %v4718_v36 = vadd.f32 %v2037_v5, %v1925_v18  ;;  %2387 = vmatmul.f32.gmra.mxu0 %v5918_v63  ;;  %v1541_v5 = vmax.f32 %v1072_v49, %v1413_v6  ;;  %v5925_v18 = vld [vmem:[#allocation50_spill] sm:$0xff]  ;;  %v5926_v63 = vld [vmem:[#allocation27_spill] sm:$0xff] }
 0x2f5   : > { %2500 = vmatmul.f32.gmra.mxu1 %v4490_v53  ;;  %2212 = vmatpush.msrb.mxu3 %v1545_v2  ;;  %v5922_v53 = vld [vmem:[#allocation29_spill] sm:$0xff]  ;;  %v1539_v50 = vmax.f32 %v1069_v1, %v1411_v14  ;;  %v1928_v51 = vadd.f32 %v4436_v23, %v5925_v18  ;;  %v1054_v6 = vadd.f32 %v4527_v40, %v5926_v63  ;;  %v5928_v1 = vld [vmem:[#allocation39_spill] sm:$0xff] }
 0x2f6   : > { %5917 = vst [vmem:[#allocation21_spill] sm:$0xff] %v4718_v36  ;;  %v1057_v62 = vadd.f32 %v4551_v13, %v5922_v53  ;;  %v1405_v36 = vmul.f32 0.2, %v1060_v30  ;;  %v1051_v14 = vadd.f32 %v4501_v4, %v5928_v1  ;;  %v1535_v23 = vmax.f32 %v1063_v44, %v1407_v28  ;;  %v4749_v18 = vld [vmem:[#allocation7 + $0x3c8] sm:$0xff]  ;;  %v4751_v40 = vld [vmem:[#allocation7 + $0x1d0] sm:$0xff] }
 0x2f7   : > { %2213 = vmatpush.msrb.mxu3 %v1543_v22  ;;  %2152 = vmatmul.f32.gmra.mxu2 %v4726_v16  ;;  %v1537_v16 = vmax.f32 %v1066_v31, %v1409_v54  ;;  %5929 = vst [vmem:[#allocation32_spill] sm:$0xff] %v4751_v40 }
 0x2f8   : > { %2087 = vmatmul.f32.gmra.mxu3 %v4724_v37  ;;  %v1533_v54 = vmax.f32 %v1060_v30, %v1405_v36 }
 0x2f9   : > { %2214 = vmatpush.msrb.mxu3 %v1541_v5  ;;  %v4734_v35 = vpop.f32.mrf.mxu0  ;;  %v3207_v5 = vld [vmem:[#allocation7 + $0x220] sm:$0xff] }
 0x2fa   : > { %5923 = vst [vmem:[#allocation24_spill] sm:$0xff] %v4734_v35  ;;  %v4736_v2 = vpop.f32.mrf.mxu1  ;;  %v4742_v49 = vpop.f32.mrf.mxu2  ;;  %v5930_v35 = vld [vmem:[#allocation36_spill] sm:$0xff] }
 0x2fb   : > { %5924 = vst [vmem:[#allocation26_spill] sm:$0xff] %v4736_v2  ;;  %v2040_v22 = vpop.f32.mrf.mxu3  ;;  %2215 = vmatpush.msrb.mxu3 %v1539_v50  ;;  %v1403_v2 = vmul.f32 0.2, %v1057_v62  ;;  %v1048_v31 = vadd.f32 %v4476_v17, %v5930_v35  ;;  %v1401_v50 = vmul.f32 0.2, %v1054_v6 }
 0x2fc   : > { %v4744_v13 = vadd.f32 %v2040_v22, %v1928_v51  ;;  %2390 = vmatmul.f32.gmra.mxu0 %v3207_v5  ;;  %v1399_v51 = vmul.f32 0.2, %v1051_v14  ;;  %v5934_v22 = vld [vmem:[#allocation54_spill] sm:$0xff]  ;;  %v5935_v5 = vld [vmem:[#allocation49_spill] sm:$0xff] }
 0x2fd   : > { %2503 = vmatmul.f32.gmra.mxu1 %v4516_v33  ;;  %2216 = vmatpush.msrb.mxu3 %v1537_v16  ;;  %v5931_v33 = vld [vmem:[#allocation34_spill] sm:$0xff]  ;;  %v1531_v16 = vmax.f32 %v1057_v62, %v1403_v2  ;;  %v1931_v17 = vadd.f32 %v4459_v39, %v5934_v22  ;;  %v1042_v36 = vadd.f32 %v4428_v38, %v5935_v5 }
 0x2fe   : > { %5927 = vst [vmem:[#allocation15_spill] sm:$0xff] %v4744_v13  ;;  %v1045_v4 = vadd.f32 %v4451_v52, %v5931_v33  ;;  %v1397_v13 = vmul.f32 0.2, %v1048_v31  ;;  %v5936_v62 = vld [vmem:[#allocation38_spill] sm:$0xff]  ;;  %v1527_v39 = vmax.f32 %v1051_v14, %v1399_v51 }
 0x2ff   : > { %2217 = vmatpush.msrb.mxu3 %v1535_v23  ;;  %2155 = vmatmul.f32.gmra.mxu2 %v4751_v40  ;;  %v1529_v40 = vmax.f32 %v1054_v6, %v1401_v50  ;;  %v1039_v2 = vadd.f32 %v4405_v0, %v5936_v62  ;;  %v4774_v22 = vld [vmem:[#allocation7 + $0x3e8] sm:$0xff]  ;;  %v4776_v38 = vld [vmem:[#allocation7 + $0x1f0] sm:$0xff]  ;;  %v1293_v6 = vadd.f32 %v4685_v32, %v5903_v8 }
 0x300   : > { %2090 = vmatmul.f32.gmra.mxu3 %v4749_v18  ;;  %v1525_v50 = vmax.f32 %v1048_v31, %v1397_v13  ;;  %v1290_v0 = vadd.f32 %v4669_v60, %v5900_v42  ;;  %v1287_v8 = vadd.f32 %v4654_v61, %v5904_v34  ;;  %v3209_v42 = vld [vmem:[#allocation7 + $0x260] sm:$0xff]  ;;  %v4803_v34 = vld [vmem:[#allocation7 + $0x18] sm:$0xff]  ;;  %v1281_v61 = vadd.f32 %v4627_v46, %v5911_v26 }
 0x301   : > { %2218 = vmatpush.msrb.mxu3 %v1533_v54  ;;  %v4759_v44 = vpop.f32.mrf.mxu0  ;;  %v3208_v54 = vld [vmem:[#allocation7 + $0x240] sm:$0xff]  ;;  %v1391_v51 = vmul.f32 0.2, %v1039_v2  ;;  %v1422_v13 = vmul.f32 0.2, %v1293_v6  ;;  %v1275_v26 = vadd.f32 %v4599_v58, %v5916_v25  ;;  %v4829_v58 = vld [vmem:[#allocation7 + $0x230] sm:$0xff] }
 0x302   : > { %5932 = vst [vmem:[#allocation29_spill] sm:$0xff] %v4759_v44  ;;  %v4761_v28 = vpop.f32.mrf.mxu1  ;;  %v4767_v30 = vpop.f32.mrf.mxu2  ;;  %v4831_v25 = vld [vmem:[#allocation7 + $0x38] sm:$0xff] }
 0x303   : > { %5933 = vst [vmem:[#allocation27_spill] sm:$0xff] %v4761_v28  ;;  %v2043_v23 = vpop.f32.mrf.mxu3  ;;  %2219 = vmatpush.msrb.mxu3 %v1531_v16  ;;  %v1395_v28 = vmul.f32 0.2, %v1045_v4  ;;  %v4778_v44 = vpop.permute.xlu2 %1803  ;;  %v1393_v16 = vmul.f32 0.2, %v1042_v36 }
 0x304   : > { %v4769_v52 = vadd.f32 %v2043_v23, %v1931_v17  ;;  %2393 = vmatmul.f32.gmra.mxu0 %v3208_v54  ;;  %v5937_v17 = vld [vmem:[#allocation45_spill] sm:$0xff] }
 0x305   : > { %2506 = vmatmul.f32.gmra.mxu1 %v4542_v29  ;;  %2220 = vmatpush.msrb.mxu3 %v1529_v40  ;;  %v1523_v14 = vmax.f32 %v1045_v4, %v1395_v28  ;;  %v1934_v32 = vadd.f32 %v4482_v59, %v5937_v17  ;;  %v1521_v54 = vmax.f32 %v1042_v36, %v1393_v16  ;;  %v1420_v28 = vmul.f32 0.2, %v1290_v0  ;;  %v5979_v17 = vld [vmem:[#allocation70_spill] sm:$0xff] }
 0x306   : > { %v1284_v4 = vadd.f32 %v4639_v9, %v5908_v43  ;;  %v1519_v59 = vmax.f32 %v1039_v2, %v1391_v51  ;;  %v1418_v36 = vmul.f32 0.2, %v1287_v8  ;;  %v1278_v9 = vadd.f32 %v4613_v20, %v5912_v45  ;;  %v3210_v45 = vld [vmem:[#allocation7 + $0x280] sm:$0xff] }
 0x307   : > { %2221 = vmatpush.msrb.mxu3 %v1527_v39  ;;  %2158 = vmatmul.f32.gmra.mxu2 %v4776_v38  ;;  %v4801_v39 = vld [vmem:[#allocation7 + $0x210] sm:$0xff]  ;;  %v1548_v43 = vmax.f32 %v1290_v0, %v1420_v28  ;;  %v4835_v28 = vpop.permute.xlu1 %1798 }
 0x308   : > { %2093 = vmatmul.f32.gmra.mxu3 %v4774_v22  ;;  %v1546_v51 = vmax.f32 %v1287_v8, %v1418_v36  ;;  %v1412_v0 = vmul.f32 0.2, %v1278_v9  ;;  %v1269_v8 = vadd.f32 %v4571_v48, %v5921_v57  ;;  %v1940_v48 = vadd.f32 %v4535_v56, %v4835_v28 }
 0x309   : > { %2222 = vmatpush.msrb.mxu3 %v1525_v50  ;;  %v4786_v29 = vpop.f32.mrf.mxu0  ;;  %v1550_v50 = vmax.f32 %v1293_v6, %v1422_v13  ;;  %v1414_v6 = vmul.f32 0.2, %v1281_v61  ;;  %v1263_v57 = vadd.f32 %v4529_v15, %v5926_v63  ;;  %v1260_v56 = vadd.f32 %v4503_v41, %v5928_v1  ;;  %v4857_v15 = vld [vmem:[#allocation7 + $0x250] sm:$0xff]  ;;  %v4859_v63 = vld [vmem:[#allocation7 + $0x58] sm:$0xff] }
 0x30a   : > { %v4788_v40 = vpop.f32.mrf.mxu1  ;;  %v4794_v31 = vpop.f32.mrf.mxu2 }
 0x30b   : > { %v2046_v23 = vpop.f32.mrf.mxu3  ;;  %2223 = vmatpush.msrb.mxu3 %v1523_v14  ;;  %v4807_v16 = vpop.permute.xlu2 %1793  ;;  %v1400_v1 = vmul.f32 0.2, %v1260_v56 }
 0x30c   : > { %v4796_v60 = vadd.f32 %v2046_v23, %v1934_v32  ;;  %2396 = vmatmul.f32.gmra.mxu0 %v3209_v42  ;;  %v1937_v46 = vadd.f32 %v4509_v47, %v4807_v16  ;;  %v1272_v47 = vadd.f32 %v4585_v24, %v5919_v55  ;;  %v1410_v42 = vmul.f32 0.2, %v1275_v26 }
 0x30d   : > { %2509 = vmatmul.f32.gmra.mxu1 %v4566_v3  ;;  %2224 = vmatpush.msrb.mxu3 %v1521_v54  ;;  %v1416_v3 = vmul.f32 0.2, %v1284_v4  ;;  %v1540_v55 = vmax.f32 %v1278_v9, %v1412_v0 }
 0x30e   : > { %v1408_v24 = vmul.f32 0.2, %v1272_v47  ;;  %v1538_v36 = vmax.f32 %v1275_v26, %v1410_v42  ;;  %v1257_v26 = vadd.f32 %v4478_v10, %v5930_v35  ;;  %v5946_v35 = vld [vmem:[#allocation76_spill] sm:$0xff] }
 0x30f   : > { %2225 = vmatpush.msrb.mxu3 %v1519_v59  ;;  %2161 = vmatmul.f32.gmra.mxu2 %v4801_v39  ;;  %v1544_v54 = vmax.f32 %v1284_v4, %v1416_v3 }
 0x310   : > { %2226 = vmatmul.f32.vlgmr.msrb.gmra.mxu3 %v4803_v34  ;;  %v1398_v0 = vmul.f32 0.2, %v1257_v26 }
 0x311   : > { %2662 = vmatpush.msra.mxu3 %v1550_v50  ;;  %v4813_v2 = vpop.f32.mrf.mxu0 }
 0x312   : > { %5938 = vst [vmem:[#allocation39_spill] sm:$0xff] %v4813_v2  ;;  %v4815_v14 = vpop.f32.mrf.mxu1  ;;  %v2114_v13 = vpop.f32.mrf.mxu2  ;;  %v5061_v2 = vld [vmem:[#allocation7 + $0x3b0] sm:$0xff] }
 0x313   : > { %5939 = vst [vmem:[#allocation36_spill] sm:$0xff] %v4815_v14  ;;  %2663 = vmatpush.msra.mxu3 %v1548_v43  ;;  %v2049_v32 = vpop.f32.mrf.mxu3  ;;  %v4824_v20 = vadd.f32 %v2114_v13, %v4511_v7  ;;  %v1542_v7 = vmax.f32 %v1281_v61, %v1414_v6  ;;  %v1406_v61 = vmul.f32 0.2, %v1269_v8  ;;  %v1402_v6 = vmul.f32 0.2, %v1263_v57  ;;  %v3220_v14 = vld [vmem:[#allocation7 + $0x3c0] sm:$0xff] }
 0x314   : > { %v4821_v23 = vadd.f32 %v2049_v32, %v1937_v46  ;;  %2399 = vmatmul.f32.gmra.mxu0 %v3210_v45  ;;  %v1536_v46 = vmax.f32 %v1272_v47, %v1408_v24  ;;  %v5945_v45 = vld [vmem:[#allocation31_spill] sm:$0xff]  ;;  %v1251_v47 = vadd.f32 %v5946_v35, %v5935_v5  ;;  %v3212_v24 = vld [vmem:[#allocation7 + $0x2c0] sm:$0xff]  ;;  %6022 = vst [vmem:[#allocation92_spill] sm:$0xff] %v5061_v2 }
 0x315   : > { %2512 = vmatmul.f32.gmra.mxu1 %v4580_v27  ;;  %2664 = vmatpush.msra.mxu3 %v1546_v51  ;;  %v1266_v27 = vadd.f32 %v4553_v21, %v5922_v53  ;;  %v3211_v53 = vld [vmem:[#allocation7 + $0x2a0] sm:$0xff]  ;;  %v1943_v10 = vadd.f32 %v5945_v45, %v4778_v44  ;;  %v4883_v5 = vld [vmem:[#allocation7 + $0x270] sm:$0xff] }
 0x317   : > { %2665 = vmatpush.msra.mxu3 %v1544_v54  ;;  %2164 = vmatmul.f32.gmra.mxu2 %v4829_v58  ;;  %v1404_v9 = vmul.f32 0.2, %v1266_v27  ;;  %v1530_v54 = vmax.f32 %v1263_v57, %v1402_v6  ;;  %v4885_v57 = vld [vmem:[#allocation7 + $0x78] sm:$0xff] }
 0x318   : > { %2229 = vmatmul.f32.gmra.mxu3 %v4831_v25 }
 0x319   : > { %2666 = vmatpush.msra.mxu3 %v1542_v7  ;;  %v4841_v4 = vpop.f32.mrf.mxu0  ;;  %v1532_v51 = vmax.f32 %v1266_v27, %v1404_v9 }
 0x31a   : > { %5940 = vst [vmem:[#allocation34_spill] sm:$0xff] %v4841_v4  ;;  %v4843_v59 = vpop.f32.mrf.mxu1  ;;  %v2117_v3 = vpop.f32.mrf.mxu2  ;;  %v3219_v4 = vld [vmem:[#allocation7 + $0x3a0] sm:$0xff] }
 0x31b   : > { %5941 = vst [vmem:[#allocation49_spill] sm:$0xff] %v4843_v59  ;;  %2667 = vmatpush.msra.mxu3 %v1540_v55  ;;  %v2052_v50 = vpop.f32.mrf.mxu3  ;;  %v4852_v21 = vadd.f32 %v2117_v3, %v4537_v11  ;;  %v1534_v11 = vmax.f32 %v1269_v8, %v1406_v61  ;;  %v5948_v55 = vld [vmem:[#allocation44_spill] sm:$0xff]  ;;  %v1394_v3 = vmul.f32 0.2, %v1251_v47 }
 0x31c   : > { %v4849_v43 = vadd.f32 %v2052_v50, %v1940_v48  ;;  %2402 = vmatmul.f32.gmra.mxu0 %v3211_v53  ;;  %v5949_v48 = vld [vmem:[#allocation73_spill] sm:$0xff]  ;;  %v1528_v50 = vmax.f32 %v1260_v56, %v1400_v1  ;;  %v1526_v53 = vmax.f32 %v1257_v26, %v1398_v0  ;;  %v5952_v56 = vld [vmem:[#allocation82_spill] sm:$0xff] }
 0x31d   : > { %2515 = vmatmul.f32.gmra.mxu1 %v4594_v12  ;;  %2668 = vmatpush.msra.mxu3 %v1538_v36  ;;  %v5942_v12 = vld [vmem:[#allocation79_spill] sm:$0xff]  ;;  %v1248_v61 = vadd.f32 %v5949_v48, %v5936_v62  ;;  %v1522_v1 = vmax.f32 %v1251_v47, %v1394_v3  ;;  %v3213_v0 = vld [vmem:[#allocation7 + $0x2e0] sm:$0xff] }
 0x31e   : > { %v1254_v41 = vadd.f32 %v5942_v12, %v5931_v33  ;;  %v5947_v33 = vld [vmem:[#allocation30_spill] sm:$0xff]  ;;  %v5962_v3 = vld [vmem:[#allocation16_spill] sm:$0xff] }
 0x31f   : > { %2669 = vmatpush.msra.mxu3 %v1536_v46  ;;  %2167 = vmatmul.f32.gmra.mxu2 %v4857_v15  ;;  %v1392_v9 = vmul.f32 0.2, %v1248_v61  ;;  %v3218_v59 = vld [vmem:[#allocation7 + $0x380] sm:$0xff] }
 0x320   : > { %2232 = vmatmul.f32.gmra.mxu3 %v4859_v63  ;;  %v1396_v36 = vmul.f32 0.2, %v1254_v41 }
 0x321   : > { %2670 = vmatpush.msra.mxu3 %v1534_v11  ;;  %v4867_v32 = vpop.f32.mrf.mxu0  ;;  %v5953_v11 = vld [vmem:[#allocation41_spill] sm:$0xff] }
 0x322   : > { %5943 = vst [vmem:[#allocation38_spill] sm:$0xff] %v4867_v32  ;;  %v4869_v13 = vpop.f32.mrf.mxu1  ;;  %v2120_v42 = vpop.f32.mrf.mxu2  ;;  %v1524_v46 = vmax.f32 %v1254_v41, %v1396_v36  ;;  %v1946_v12 = vadd.f32 %v5953_v11, %v5952_v56  ;;  %v5955_v41 = vld [vmem:[#allocation48_spill] sm:$0xff]  ;;  %v4919_v11 = vld [vmem:[#allocation7 + $0x2b0] sm:$0xff] }
 0x323   : > { %5944 = vst [vmem:[#allocation79_spill] sm:$0xff] %v4869_v13  ;;  %2671 = vmatpush.msra.mxu3 %v1532_v51  ;;  %v2055_v8 = vpop.f32.mrf.mxu3  ;;  %v4878_v27 = vadd.f32 %v2120_v42, %v5947_v33  ;;  %v4903_v42 = vld [vmem:[#allocation7 + $0x98] sm:$0xff] }
 0x324   : > { %v4875_v7 = vadd.f32 %v2055_v8, %v1943_v10  ;;  %2405 = vmatmul.f32.gmra.mxu0 %v3212_v24  ;;  %v5954_v10 = vld [vmem:[#allocation28_spill] sm:$0xff]  ;;  %v4901_v8 = vld [vmem:[#allocation7 + $0x290] sm:$0xff]  ;;  %5957 = vst [vmem:[#allocation44_spill] sm:$0xff] %v4903_v42 }
 0x325   : > { %2518 = vmatmul.f32.gmra.mxu1 %v5948_v55  ;;  %2672 = vmatpush.msra.mxu3 %v1530_v54  ;;  %v1520_v54 = vmax.f32 %v1248_v61, %v1392_v9  ;;  %5956 = vst [vmem:[#allocation30_spill] sm:$0xff] %v4901_v8  ;;  %v5960_v24 = vld [vmem:[#allocation84_spill] sm:$0xff]  ;;  %v5961_v55 = vld [vmem:[#allocation18_spill] sm:$0xff] }
 0x326   : > { %v1949_v48 = vadd.f32 %v5961_v55, %v5960_v24  ;;  %v3214_v9 = vld [vmem:[#allocation7 + $0x300] sm:$0xff]  ;;  %5964 = vst [vmem:[#allocation41_spill] sm:$0xff] %v4919_v11 }
 0x327   : > { %2673 = vmatpush.msra.mxu3 %v1528_v50  ;;  %2170 = vmatmul.f32.gmra.mxu2 %v4883_v5 }
 0x328   : > { %2235 = vmatmul.f32.gmra.mxu3 %v4885_v57 }
 0x329   : > { %2674 = vmatpush.msra.mxu3 %v1526_v53  ;;  %v4889_v6 = vpop.f32.mrf.mxu0 }
 0x32a   : > { %5950 = vst [vmem:[#allocation31_spill] sm:$0xff] %v4889_v6  ;;  %v4891_v62 = vpop.f32.mrf.mxu1  ;;  %v2123_v45 = vpop.f32.mrf.mxu2  ;;  %v4957_v6 = vld [vmem:[#allocation7 + $0xf8] sm:$0xff] }
 0x32b   : > { %5951 = vst [vmem:[#allocation76_spill] sm:$0xff] %v4891_v62  ;;  %2675 = vmatpush.msra.mxu3 %v1524_v46  ;;  %v2058_v51 = vpop.f32.mrf.mxu3  ;;  %v4898_v35 = vadd.f32 %v2123_v45, %v5954_v10  ;;  %v5963_v46 = vld [vmem:[#allocation43_spill] sm:$0xff]  ;;  %v5968_v45 = vld [vmem:[#allocation86_spill] sm:$0xff] }
 0x32c   : > { %v4895_v26 = vadd.f32 %v2058_v51, %v1946_v12  ;;  %2408 = vmatmul.f32.gmra.mxu0 %v3213_v0  ;;  %v4921_v12 = vld [vmem:[#allocation7 + $0xb8] sm:$0xff]  ;;  %v4955_v62 = vld [vmem:[#allocation7 + $0x2f0] sm:$0xff] }
 0x32d   : > { %2521 = vmatmul.f32.gmra.mxu1 %v5955_v41  ;;  %2676 = vmatpush.msra.mxu3 %v1522_v1  ;;  %5965 = vst [vmem:[#allocation28_spill] sm:$0xff] %v4921_v12  ;;  %v5969_v10 = vld [vmem:[#allocation35_spill] sm:$0xff] }
 0x32e   : > { %v1952_v0 = vadd.f32 %v5969_v10, %v5968_v45  ;;  %5980 = vst [vmem:[#allocation35_spill] sm:$0xff] %v4955_v62 }
 0x32f   : > { %2677 = vmatpush.msra.mxu3 %v1520_v54  ;;  %2173 = vmatmul.f32.gmra.mxu2 %v4901_v8 }
 0x330   : > { %2238 = vmatmul.f32.gmra.mxu3 %v4903_v42  ;;  %v3221_v42 = vld [vmem:[#allocation7 + $0x3e0] sm:$0xff] }
 0x331   : > { %v4907_v47 = vpop.f32.mrf.mxu0 }
 0x332   : > { %5958 = vst [vmem:[#allocation73_spill] sm:$0xff] %v4907_v47  ;;  %v4909_v33 = vpop.f32.mrf.mxu1  ;;  %v2126_v50 = vpop.f32.mrf.mxu2 }
 0x333   : > { %5959 = vst [vmem:[#allocation82_spill] sm:$0xff] %v4909_v33  ;;  %v2061_v36 = vpop.f32.mrf.mxu3  ;;  %v4916_v53 = vadd.f32 %v2126_v50, %v5962_v3  ;;  %v3215_v50 = vld [vmem:[#allocation7 + $0x320] sm:$0xff]  ;;  %v5971_v3 = vld [vmem:[#allocation62_spill] sm:$0xff] }
 0x334   : > { %v4913_v61 = vadd.f32 %v2061_v36, %v1949_v48  ;;  %2411 = vmatmul.f32.gmra.mxu0 %v3214_v9  ;;  %v5970_v48 = vld [vmem:[#allocation14_spill] sm:$0xff] }
 0x335   : > { %2524 = vmatmul.f32.gmra.mxu1 %v5963_v46  ;;  %v4937_v9 = vld [vmem:[#allocation7 + $0x2d0] sm:$0xff]  ;;  %v4939_v46 = vld [vmem:[#allocation7 + $0xd8] sm:$0xff]  ;;  %5981 = vst [vmem:[#allocation14_spill] sm:$0xff] %v4957_v6 }
 0x336   : > { %5972 = vst [vmem:[#allocation18_spill] sm:$0xff] %v4937_v9 }
 0x337   : > { %2176 = vmatmul.f32.gmra.mxu2 %v4919_v11  ;;  %5973 = vst [vmem:[#allocation16_spill] sm:$0xff] %v4939_v46 }
 0x338   : > { %2241 = vmatmul.f32.gmra.mxu3 %v4921_v12  ;;  %v5995_v12 = vld [vmem:[#allocation20_spill] sm:$0xff] }
 0x339   : > { %v4925_v1 = vpop.f32.mrf.mxu0 }
 0x33a   : > { %5966 = vst [vmem:[#allocation48_spill] sm:$0xff] %v4925_v1  ;;  %v4927_v51 = vpop.f32.mrf.mxu1  ;;  %v2129_v54 = vpop.f32.mrf.mxu2  ;;  %v3216_v1 = vld [vmem:[#allocation7 + $0x340] sm:$0xff] }
 0x33b   : > { %5967 = vst [vmem:[#allocation84_spill] sm:$0xff] %v4927_v51  ;;  %v2064_v41 = vpop.f32.mrf.mxu3  ;;  %v4934_v36 = vadd.f32 %v2129_v54, %v5970_v48 }
 0x33c   : > { %v4931_v55 = vadd.f32 %v2064_v41, %v1952_v0  ;;  %2414 = vmatmul.f32.gmra.mxu0 %v3215_v50  ;;  %v5976_v0 = vld [vmem:[#allocation74_spill] sm:$0xff]  ;;  %v5977_v41 = vld [vmem:[#allocation23_spill] sm:$0xff] }
 0x33d   : > { %2527 = vmatmul.f32.gmra.mxu1 %v5971_v3  ;;  %v1955_v54 = vadd.f32 %v5977_v41, %v5976_v0  ;;  %v5978_v3 = vld [vmem:[#allocation37_spill] sm:$0xff] }
 0x33f   : > { %2179 = vmatmul.f32.gmra.mxu2 %v4937_v9  ;;  %v5987_v9 = vld [vmem:[#allocation89_spill] sm:$0xff] }
 0x340   : > { %2244 = vmatmul.f32.gmra.mxu3 %v4939_v46  ;;  %v3217_v46 = vld [vmem:[#allocation7 + $0x360] sm:$0xff] }
 0x341   : > { %v4943_v10 = vpop.f32.mrf.mxu0 }
 0x342   : > { %5974 = vst [vmem:[#allocation43_spill] sm:$0xff] %v4943_v10  ;;  %v4945_v33 = vpop.f32.mrf.mxu1  ;;  %v2132_v51 = vpop.f32.mrf.mxu2 }
 0x343   : > { %5975 = vst [vmem:[#allocation86_spill] sm:$0xff] %v4945_v33  ;;  %v2067_v48 = vpop.f32.mrf.mxu3  ;;  %v4952_v47 = vadd.f32 %v2132_v51, %v5978_v3 }
 0x344   : > { %v4949_v50 = vadd.f32 %v2067_v48, %v1955_v54  ;;  %2417 = vmatmul.f32.gmra.mxu0 %v3216_v1  ;;  %v5984_v54 = vld [vmem:[#allocation77_spill] sm:$0xff]  ;;  %v5985_v48 = vld [vmem:[#allocation40_spill] sm:$0xff] }
 0x345   : > { %2530 = vmatmul.f32.gmra.mxu1 %v5979_v17  ;;  %v1958_v51 = vadd.f32 %v5985_v48, %v5984_v54  ;;  %v5986_v17 = vld [vmem:[#allocation53_spill] sm:$0xff] }
 0x347   : > { %2182 = vmatmul.f32.gmra.mxu2 %v4955_v62  ;;  %v4973_v62 = vld [vmem:[#allocation7 + $0x310] sm:$0xff] }
 0x348   : > { %2247 = vmatmul.f32.gmra.mxu3 %v4957_v6  ;;  %5988 = vst [vmem:[#allocation23_spill] sm:$0xff] %v4973_v62  ;;  %v4975_v6 = vld [vmem:[#allocation7 + $0x118] sm:$0xff] }
 0x349   : > { %v4961_v41 = vpop.f32.mrf.mxu0  ;;  %5989 = vst [vmem:[#allocation37_spill] sm:$0xff] %v4975_v6 }
 0x34a   : > { %5982 = vst [vmem:[#allocation62_spill] sm:$0xff] %v4961_v41  ;;  %v4963_v33 = vpop.f32.mrf.mxu1  ;;  %v2135_v10 = vpop.f32.mrf.mxu2 }
 0x34b   : > { %5983 = vst [vmem:[#allocation74_spill] sm:$0xff] %v4963_v33  ;;  %v2070_v3 = vpop.f32.mrf.mxu3  ;;  %v4970_v13 = vadd.f32 %v2135_v10, %v5986_v17 }
 0x34c   : > { %v4967_v1 = vadd.f32 %v2070_v3, %v1958_v51  ;;  %2420 = vmatmul.f32.gmra.mxu0 %v3217_v46  ;;  %v5992_v51 = vld [vmem:[#allocation80_spill] sm:$0xff]  ;;  %v5993_v3 = vld [vmem:[#allocation58_spill] sm:$0xff] }
 0x34d   : > { %2533 = vmatmul.f32.gmra.mxu1 %v5987_v9  ;;  %v1961_v10 = vadd.f32 %v5993_v3, %v5992_v51  ;;  %v5994_v9 = vld [vmem:[#allocation47_spill] sm:$0xff] }
 0x34f   : > { %2185 = vmatmul.f32.gmra.mxu2 %v4973_v62  ;;  %v4991_v62 = vld [vmem:[#allocation7 + $0x330] sm:$0xff] }
 0x350   : > { %2250 = vmatmul.f32.gmra.mxu3 %v4975_v6  ;;  %5996 = vst [vmem:[#allocation40_spill] sm:$0xff] %v4991_v62  ;;  %v4993_v6 = vld [vmem:[#allocation7 + $0x138] sm:$0xff] }
 0x351   : > { %v4979_v48 = vpop.f32.mrf.mxu0  ;;  %5997 = vst [vmem:[#allocation53_spill] sm:$0xff] %v4993_v6 }
 0x352   : > { %5990 = vst [vmem:[#allocation70_spill] sm:$0xff] %v4979_v48  ;;  %v4981_v33 = vpop.f32.mrf.mxu1  ;;  %v2138_v41 = vpop.f32.mrf.mxu2 }
 0x353   : > { %5991 = vst [vmem:[#allocation77_spill] sm:$0xff] %v4981_v33  ;;  %v2073_v17 = vpop.f32.mrf.mxu3  ;;  %v4988_v32 = vadd.f32 %v2138_v41, %v5994_v9 }
 0x354   : > { %v4985_v46 = vadd.f32 %v2073_v17, %v1961_v10  ;;  %2423 = vmatmul.f32.gmra.mxu0 %v3218_v59  ;;  %v6000_v10 = vld [vmem:[#allocation63_spill] sm:$0xff]  ;;  %v6001_v17 = vld [vmem:[#allocation66_spill] sm:$0xff] }
 0x355   : > { %2536 = vmatmul.f32.gmra.mxu1 %v5995_v12  ;;  %v1964_v41 = vadd.f32 %v6001_v17, %v6000_v10  ;;  %v6002_v12 = vld [vmem:[#allocation56_spill] sm:$0xff] }
 0x357   : > { %2188 = vmatmul.f32.gmra.mxu2 %v4991_v62  ;;  %v5009_v62 = vld [vmem:[#allocation7 + $0x350] sm:$0xff] }
 0x358   : > { %2253 = vmatmul.f32.gmra.mxu3 %v4993_v6  ;;  %6003 = vst [vmem:[#allocation58_spill] sm:$0xff] %v5009_v62  ;;  %v5011_v6 = vld [vmem:[#allocation7 + $0x158] sm:$0xff] }
 0x359   : > { %v4997_v3 = vpop.f32.mrf.mxu0  ;;  %6004 = vst [vmem:[#allocation47_spill] sm:$0xff] %v5011_v6 }
 0x35a   : > { %5998 = vst [vmem:[#allocation89_spill] sm:$0xff] %v4997_v3  ;;  %v4999_v33 = vpop.f32.mrf.mxu1  ;;  %v2141_v48 = vpop.f32.mrf.mxu2 }
 0x35b   : > { %5999 = vst [vmem:[#allocation80_spill] sm:$0xff] %v4999_v33  ;;  %v2076_v9 = vpop.f32.mrf.mxu3  ;;  %v5006_v11 = vadd.f32 %v2141_v48, %v6002_v12 }
 0x35c   : > { %v5003_v59 = vadd.f32 %v2076_v9, %v1964_v41  ;;  %2426 = vmatmul.f32.gmra.mxu0 %v3219_v4  ;;  %v6007_v41 = vld [vmem:[#allocation67_spill] sm:$0xff]  ;;  %v6008_v9 = vld [vmem:[#allocation64_spill] sm:$0xff] }
 0x35d   : > { %2539 = vmatmul.f32.gmra.mxu1 %v4724_v37  ;;  %v1967_v48 = vadd.f32 %v6008_v9, %v6007_v41  ;;  %v6009_v37 = vld [vmem:[#allocation88_spill] sm:$0xff] }
 0x35f   : > { %2191 = vmatmul.f32.gmra.mxu2 %v5009_v62  ;;  %v5027_v62 = vld [vmem:[#allocation7 + $0x370] sm:$0xff] }
 0x360   : > { %2256 = vmatmul.f32.gmra.mxu3 %v5011_v6  ;;  %6010 = vst [vmem:[#allocation56_spill] sm:$0xff] %v5027_v62  ;;  %v5029_v6 = vld [vmem:[#allocation7 + $0x178] sm:$0xff] }
 0x361   : > { %v5015_v17 = vpop.f32.mrf.mxu0  ;;  %6011 = vst [vmem:[#allocation64_spill] sm:$0xff] %v5029_v6 }
 0x362   : > { %6005 = vst [vmem:[#allocation20_spill] sm:$0xff] %v5015_v17  ;;  %v5017_v10 = vpop.f32.mrf.mxu1  ;;  %v2144_v33 = vpop.f32.mrf.mxu2 }
 0x363   : > { %6006 = vst [vmem:[#allocation66_spill] sm:$0xff] %v5017_v10  ;;  %v2079_v12 = vpop.f32.mrf.mxu3  ;;  %v5024_v3 = vadd.f32 %v2144_v33, %v6009_v37 }
 0x364   : > { %v5021_v4 = vadd.f32 %v2079_v12, %v1967_v48  ;;  %2429 = vmatmul.f32.gmra.mxu0 %v3220_v14  ;;  %v6014_v48 = vld [vmem:[#allocation71_spill] sm:$0xff] }
 0x365   : > { %2542 = vmatmul.f32.gmra.mxu1 %v4749_v18  ;;  %v6015_v12 = vld [vmem:[#allocation19_spill] sm:$0xff]  ;;  %v6016_v18 = vld [vmem:[#allocation69_spill] sm:$0xff] }
 0x366   : > { %v1970_v33 = vadd.f32 %v6015_v12, %v6014_v48 }
 0x367   : > { %2194 = vmatmul.f32.gmra.mxu2 %v5027_v62  ;;  %v5045_v62 = vld [vmem:[#allocation7 + $0x390] sm:$0xff] }
 0x368   : > { %2259 = vmatmul.f32.gmra.mxu3 %v5029_v6  ;;  %6017 = vst [vmem:[#allocation19_spill] sm:$0xff] %v5045_v62  ;;  %v5047_v6 = vld [vmem:[#allocation7 + $0x198] sm:$0xff] }
 0x369   : > { %v5033_v9 = vpop.f32.mrf.mxu0  ;;  %6018 = vst [vmem:[#allocation69_spill] sm:$0xff] %v5047_v6 }
 0x36a   : > { %6012 = vst [vmem:[#allocation88_spill] sm:$0xff] %v5033_v9  ;;  %v5035_v41 = vpop.f32.mrf.mxu1  ;;  %v2147_v10 = vpop.f32.mrf.mxu2 }
 0x36b   : > { %6013 = vst [vmem:[#allocation91_spill] sm:$0xff] %v5035_v41  ;;  %v2082_v37 = vpop.f32.mrf.mxu3  ;;  %v5042_v17 = vadd.f32 %v2147_v10, %v6016_v18  ;;  %v6019_v41 = vld [vmem:[#allocation51_spill] sm:$0xff] }
 0x36c   : > { %v5039_v14 = vadd.f32 %v2082_v37, %v1970_v33  ;;  %2432 = vmatmul.f32.gmra.mxu0 %v3221_v42  ;;  %v1973_v33 = vadd.f32 %v4716_v19, %v6019_v41 }
 0x36d   : > { %2545 = vmatmul.f32.gmra.mxu1 %v4774_v22  ;;  %v6020_v22 = vld [vmem:[#allocation21_spill] sm:$0xff] }
 0x36f   : > { %2197 = vmatmul.f32.gmra.mxu2 %v5045_v62  ;;  %v5063_v62 = vld [vmem:[#allocation7 + $0x1b8] sm:$0xff] }
 0x370   : > { %2262 = vmatmul.f32.gmra.mxu3 %v5047_v6  ;;  %v5077_v6 = vld [vmem:[#allocation7 + $0x3d0] sm:$0xff] }
 0x371   : > { %v2388_v12 = vpop.f32.mrf.mxu0  ;;  %6026 = vst [vmem:[#allocation93_spill] sm:$0xff] %v5077_v6 }
 0x372   : > { %v2501_v48 = vpop.f32.mrf.mxu1  ;;  %v2389_v10 = vadd.f32 %v2388_v12, %v4807_v16  ;;  %v2150_v18 = vpop.f32.mrf.mxu2  ;;  %v6023_v16 = vld [vmem:[#allocation55_spill] sm:$0xff] }
 0x373   : > { %v2085_v37 = vpop.f32.mrf.mxu3  ;;  %v5057_v9 = vadd.f32 %v2150_v18, %v6020_v22  ;;  %v1976_v12 = vadd.f32 %v4742_v49, %v6023_v16 }
 0x374   : > { %v5054_v42 = vadd.f32 %v2085_v37, %v1973_v33  ;;  %v5059_v8 = vadd.f32 %v2501_v48, %v2389_v10  ;;  %v6024_v48 = vld [vmem:[#allocation15_spill] sm:$0xff] }
 0x376   : > { %6021 = vst [vmem:[#allocation21_spill] sm:$0xff] %v5059_v8 }
 0x377   : > { %2200 = vmatmul.f32.gmra.mxu2 %v5061_v2  ;;  %v5079_v2 = vld [vmem:[#allocation7 + $0x1d8] sm:$0xff] }
 0x378   : > { %2265 = vmatmul.f32.gmra.mxu3 %v5063_v62  ;;  %6027 = vst [vmem:[#allocation94_spill] sm:$0xff] %v5079_v2 }
 0x379   : > { %v2391_v19 = vpop.f32.mrf.mxu0 }
 0x37a   : > { %v2504_v41 = vpop.f32.mrf.mxu1  ;;  %v2392_v33 = vadd.f32 %v2391_v19, %v4835_v28  ;;  %v2153_v18 = vpop.f32.mrf.mxu2  ;;  %v6028_v28 = vld [vmem:[#allocation59_spill] sm:$0xff] }
 0x37b   : > { %v2088_v37 = vpop.f32.mrf.mxu3  ;;  %v5073_v10 = vadd.f32 %v2153_v18, %v6024_v48  ;;  %v1979_v19 = vadd.f32 %v4767_v30, %v6028_v28 }
 0x37c   : > { %v5070_v22 = vadd.f32 %v2088_v37, %v1976_v12  ;;  %v5075_v8 = vadd.f32 %v2504_v41, %v2392_v33 }
 0x37e   : > { %6025 = vst [vmem:[#allocation15_spill] sm:$0xff] %v5075_v8  ;;  %v5093_v8 = vld [vmem:[#allocation7 + $0x3f0] sm:$0xff] }
 0x37f   : > { %2203 = vmatmul.f32.gmra.mxu2 %v5077_v6  ;;  %6030 = vst [vmem:[#allocation96_spill] sm:$0xff] %v5093_v8  ;;  %v5095_v6 = vld [vmem:[#allocation7 + $0x1f8] sm:$0xff] }
 0x380   : > { %2268 = vmatmul.f32.gmra.mxu3 %v5079_v2  ;;  %6031 = vst [vmem:[#allocation97_spill] sm:$0xff] %v5095_v6 }
 0x381   : > { %v2394_v49 = vpop.f32.mrf.mxu0 }
 0x382   : > { %v2507_v16 = vpop.f32.mrf.mxu1  ;;  %v2395_v12 = vadd.f32 %v2394_v49, %v4778_v44  ;;  %v2156_v18 = vpop.f32.mrf.mxu2  ;;  %v6032_v44 = vld [vmem:[#allocation42_spill] sm:$0xff] }
 0x383   : > { %v2091_v37 = vpop.f32.mrf.mxu3  ;;  %v5089_v41 = vadd.f32 %v2156_v18, %v4769_v52  ;;  %v1982_v49 = vadd.f32 %v4794_v31, %v6032_v44 }
 0x384   : > { %v5086_v48 = vadd.f32 %v2091_v37, %v1979_v19  ;;  %v5091_v33 = vadd.f32 %v2507_v16, %v2395_v12 }
 0x386   : > { %6029 = vst [vmem:[#allocation95_spill] sm:$0xff] %v5091_v33  ;;  %v5109_v33 = vld [vmem:[#allocation7 + $0x218] sm:$0xff] }
 0x387   : > { %2206 = vmatmul.f32.gmra.mxu2 %v5093_v8 }
 0x388   : > { %2271 = vmatmul.f32.gmra.mxu3 %v5095_v6  ;;  %v3222_v6 = vld [vmem:[#allocation7 + $0x10] sm:$0xff] }
 0x389   : > { %v2397_v30 = vpop.f32.mrf.mxu0 }
 0x38a   : > { %v2510_v28 = vpop.f32.mrf.mxu1  ;;  %v2398_v19 = vadd.f32 %v2397_v30, %v5952_v56  ;;  %v2159_v52 = vpop.f32.mrf.mxu2 }
 0x38b   : > { %v2094_v37 = vpop.f32.mrf.mxu3  ;;  %v5105_v16 = vadd.f32 %v2159_v52, %v4796_v60 }
 0x38c   : > { %v5102_v18 = vadd.f32 %v2094_v37, %v1982_v49  ;;  %v5107_v12 = vadd.f32 %v2510_v28, %v2398_v19  ;;  %v5121_v19 = vld [vmem:[#allocation7 + $0x238] sm:$0xff]  ;;  %v3223_v37 = vld [vmem:[#allocation7 + $0x30] sm:$0xff] }
 0x38d   : > { %6035 = vst [vmem:[#allocation100_spill] sm:$0xff] %v5121_v19 }
 0x38e   : > { %6033 = vst [vmem:[#allocation98_spill] sm:$0xff] %v5107_v12  ;;  %v6060_v12 = vld [vmem:[#allocation85_spill] sm:$0xff] }
 0x38f   : > { %2565 = vmatmul.f32.vlgmr.msra.gmra.mxu2 %v3222_v6 }
 0x390   : > { %2274 = vmatmul.f32.gmra.mxu3 %v5109_v33 }
 0x391   : > { %v2400_v8 = vpop.f32.mrf.mxu0 }
 0x392   : > { %v2513_v2 = vpop.f32.mrf.mxu1  ;;  %v2401_v31 = vadd.f32 %v2400_v8, %v5960_v24  ;;  %v2162_v56 = vpop.f32.mrf.mxu2 }
 0x393   : > { %v2227_v30 = vpop.f32.mrf.mxu3  ;;  %v5114_v49 = vadd.f32 %v2162_v56, %v4821_v23  ;;  %v3224_v56 = vld [vmem:[#allocation7 + $0x50] sm:$0xff] }
 0x394   : > { %v5117_v60 = vadd.f32 %v2227_v30, %v4824_v20  ;;  %v5119_v28 = vadd.f32 %v2513_v2, %v2401_v31  ;;  %v5133_v31 = vld [vmem:[#allocation7 + $0x258] sm:$0xff] }
 0x395   : > { %6037 = vst [vmem:[#allocation102_spill] sm:$0xff] %v5133_v31 }
 0x396   : > { %6034 = vst [vmem:[#allocation99_spill] sm:$0xff] %v5119_v28 }
 0x397   : > { %2568 = vmatmul.f32.gmra.mxu2 %v3223_v37 }
 0x398   : > { %2277 = vmatmul.f32.gmra.mxu3 %v5121_v19 }
 0x399   : > { %v2403_v6 = vpop.f32.mrf.mxu0 }
 0x39a   : > { %v2516_v52 = vpop.f32.mrf.mxu1  ;;  %v2404_v8 = vadd.f32 %v2403_v6, %v5968_v45  ;;  %v2165_v24 = vpop.f32.mrf.mxu2 }
 0x39b   : > { %v2230_v44 = vpop.f32.mrf.mxu3  ;;  %v5126_v23 = vadd.f32 %v2165_v24, %v4849_v43 }
 0x39c   : > { %v5129_v20 = vadd.f32 %v2230_v44, %v4852_v21  ;;  %v5131_v2 = vadd.f32 %v2516_v52, %v2404_v8  ;;  %v5145_v52 = vld [vmem:[#allocation7 + $0x278] sm:$0xff]  ;;  %v3225_v8 = vld [vmem:[#allocation7 + $0x70] sm:$0xff] }
 0x39d   : > { %6039 = vst [vmem:[#allocation104_spill] sm:$0xff] %v5145_v52 }
 0x39e   : > { %6036 = vst [vmem:[#allocation101_spill] sm:$0xff] %v5131_v2 }
 0x39f   : > { %2571 = vmatmul.f32.gmra.mxu2 %v3224_v56 }
 0x3a0   : > { %2280 = vmatmul.f32.gmra.mxu3 %v5133_v31 }
 0x3a1   : > { %v2406_v30 = vpop.f32.mrf.mxu0 }
 0x3a2   : > { %v2519_v37 = vpop.f32.mrf.mxu1  ;;  %v2407_v45 = vadd.f32 %v2406_v30, %v5976_v0  ;;  %v2168_v6 = vpop.f32.mrf.mxu2 }
 0x3a3   : > { %v2233_v28 = vpop.f32.mrf.mxu3  ;;  %v5138_v43 = vadd.f32 %v2168_v6, %v4875_v7 }
 0x3a4   : > { %v5141_v21 = vadd.f32 %v2233_v28, %v4878_v27  ;;  %v5143_v44 = vadd.f32 %v2519_v37, %v2407_v45  ;;  %v5157_v37 = vld [vmem:[#allocation7 + $0x298] sm:$0xff]  ;;  %v3226_v45 = vld [vmem:[#allocation7 + $0x90] sm:$0xff] }
 0x3a5   : > { %6041 = vst [vmem:[#allocation106_spill] sm:$0xff] %v5157_v37 }
 0x3a6   : > { %6038 = vst [vmem:[#allocation103_spill] sm:$0xff] %v5143_v44 }
 0x3a7   : > { %2574 = vmatmul.f32.gmra.mxu2 %v3225_v8 }
 0x3a8   : > { %2283 = vmatmul.f32.gmra.mxu3 %v5145_v52 }
 0x3a9   : > { %v2409_v24 = vpop.f32.mrf.mxu0 }
 0x3aa   : > { %v2522_v56 = vpop.f32.mrf.mxu1  ;;  %v2410_v0 = vadd.f32 %v2409_v24, %v5984_v54  ;;  %v2171_v30 = vpop.f32.mrf.mxu2 }
 0x3ab   : > { %v2236_v2 = vpop.f32.mrf.mxu3  ;;  %v5150_v7 = vadd.f32 %v2171_v30, %v4895_v26 }
 0x3ac   : > { %v5153_v27 = vadd.f32 %v2236_v2, %v4898_v35  ;;  %v5155_v28 = vadd.f32 %v2522_v56, %v2410_v0  ;;  %v5169_v56 = vld [vmem:[#allocation7 + $0x2b8] sm:$0xff]  ;;  %v3227_v0 = vld [vmem:[#allocation7 + $0xb0] sm:$0xff] }
 0x3ad   : > { %6043 = vst [vmem:[#allocation108_spill] sm:$0xff] %v5169_v56 }
 0x3ae   : > { %6040 = vst [vmem:[#allocation105_spill] sm:$0xff] %v5155_v28  ;;  %v5205_v28 = vld [vmem:[#allocation7 + $0x338] sm:$0xff] }
 0x3af   : > { %2577 = vmatmul.f32.gmra.mxu2 %v3226_v45  ;;  %6047 = vst [vmem:[#allocation112_spill] sm:$0xff] %v5205_v28 }
 0x3b0   : > { %2286 = vmatmul.f32.gmra.mxu3 %v5157_v37  ;;  %v5247_v37 = vld [vmem:[#allocation7 + $0x3f8] sm:$0xff] }
 0x3b1   : > { %v2412_v6 = vpop.f32.mrf.mxu0 }
 0x3b2   : > { %v2525_v8 = vpop.f32.mrf.mxu1  ;;  %v2413_v54 = vadd.f32 %v2412_v6, %v5992_v51  ;;  %v2174_v24 = vpop.f32.mrf.mxu2 }
 0x3b3   : > { %v2239_v44 = vpop.f32.mrf.mxu3  ;;  %v5162_v26 = vadd.f32 %v2174_v24, %v4913_v61  ;;  %v5178_v61 = vld [vmem:[#allocation7 + $0x2d8] sm:$0xff] }
 0x3b4   : > { %v5165_v35 = vadd.f32 %v2239_v44, %v4916_v53  ;;  %v5167_v2 = vadd.f32 %v2525_v8, %v2413_v54  ;;  %6044 = vst [vmem:[#allocation109_spill] sm:$0xff] %v5178_v61  ;;  %v3228_v53 = vld [vmem:[#allocation7 + $0xd0] sm:$0xff] }
 0x3b6   : > { %6042 = vst [vmem:[#allocation107_spill] sm:$0xff] %v5167_v2  ;;  %v5196_v2 = vld [vmem:[#allocation7 + $0x318] sm:$0xff] }
 0x3b7   : > { %2580 = vmatmul.f32.gmra.mxu2 %v3227_v0  ;;  %v5187_v0 = vld [vmem:[#allocation7 + $0x2f8] sm:$0xff]  ;;  %6046 = vst [vmem:[#allocation111_spill] sm:$0xff] %v5196_v2 }
 0x3b8   : > { %2289 = vmatmul.f32.gmra.mxu3 %v5169_v56  ;;  %6045 = vst [vmem:[#allocation110_spill] sm:$0xff] %v5187_v0  ;;  %v5240_v56 = vld [vmem:[#allocation7 + $0x3d8] sm:$0xff] }
 0x3ba   : > { %v2177_v30 = vpop.f32.mrf.mxu2 }
 0x3bb   : > { %v2242_v45 = vpop.f32.mrf.mxu3  ;;  %v5173_v51 = vadd.f32 %v2177_v30, %v4931_v55  ;;  %v3229_v55 = vld [vmem:[#allocation7 + $0xf0] sm:$0xff] }
 0x3bc   : > { %v5176_v6 = vadd.f32 %v2242_v45, %v4934_v36 }
 0x3bf   : > { %2583 = vmatmul.f32.gmra.mxu2 %v3228_v53 }
 0x3c0   : > { %2292 = vmatmul.f32.gmra.mxu3 %v5178_v61  ;;  %v5233_v61 = vld [vmem:[#allocation7 + $0x3b8] sm:$0xff] }
 0x3c2   : > { %v2180_v44 = vpop.f32.mrf.mxu2 }
 0x3c3   : > { %v2245_v8 = vpop.f32.mrf.mxu3  ;;  %v5182_v54 = vadd.f32 %v2180_v44, %v4949_v50 }
 0x3c4   : > { %v5185_v24 = vadd.f32 %v2245_v8, %v4952_v47  ;;  %v3230_v47 = vld [vmem:[#allocation7 + $0x110] sm:$0xff] }
 0x3c7   : > { %2586 = vmatmul.f32.gmra.mxu2 %v3229_v55 }
 0x3c8   : > { %2295 = vmatmul.f32.gmra.mxu3 %v5187_v0  ;;  %v5226_v0 = vld [vmem:[#allocation7 + $0x398] sm:$0xff] }
 0x3ca   : > { %v2183_v36 = vpop.f32.mrf.mxu2 }
 0x3cb   : > { %v2248_v30 = vpop.f32.mrf.mxu3  ;;  %v5191_v45 = vadd.f32 %v2183_v36, %v4967_v1 }
 0x3cc   : > { %v5194_v53 = vadd.f32 %v2248_v30, %v4970_v13  ;;  %v6048_v13 = vld [vmem:[#allocation52_spill] sm:$0xff] }
 0x3cf   : > { %2589 = vmatmul.f32.gmra.mxu2 %v3230_v47  ;;  %v5212_v47 = vld [vmem:[#allocation7 + $0x358] sm:$0xff] }
 0x3d0   : > { %2298 = vmatmul.f32.gmra.mxu3 %v5196_v2  ;;  %6049 = vst [vmem:[#allocation52_spill] sm:$0xff] %v5212_v47  ;;  %v5219_v2 = vld [vmem:[#allocation7 + $0x378] sm:$0xff] }
 0x3d2   : > { %v2186_v50 = vpop.f32.mrf.mxu2 }
 0x3d3   : > { %v2251_v44 = vpop.f32.mrf.mxu3  ;;  %v5200_v8 = vadd.f32 %v2186_v50, %v4985_v46  ;;  %v6050_v46 = vld [vmem:[#allocation60_spill] sm:$0xff] }
 0x3d4   : > { %v5203_v55 = vadd.f32 %v2251_v44, %v4988_v32  ;;  %6051 = vst [vmem:[#allocation60_spill] sm:$0xff] %v5219_v2 }
 0x3d7   : > { %2592 = vmatmul.f32.gmra.mxu2 %v6048_v13  ;;  %v6052_v13 = vld [vmem:[#allocation90_spill] sm:$0xff] }
 0x3d8   : > { %2301 = vmatmul.f32.gmra.mxu3 %v5205_v28  ;;  %6053 = vst [vmem:[#allocation90_spill] sm:$0xff] %v5226_v0 }
 0x3da   : > { %v2189_v1 = vpop.f32.mrf.mxu2 }
 0x3db   : > { %v2254_v36 = vpop.f32.mrf.mxu3  ;;  %v5210_v30 = vadd.f32 %v2189_v1, %v5003_v59 }
 0x3df   : > { %2595 = vmatmul.f32.gmra.mxu2 %v6050_v46  ;;  %v6054_v46 = vld [vmem:[#allocation13_spill] sm:$0xff] }
 0x3e0   : > { %2304 = vmatmul.f32.gmra.mxu3 %v5212_v47  ;;  %6055 = vst [vmem:[#allocation13_spill] sm:$0xff] %v5233_v61 }
 0x3e2   : > { %v2192_v50 = vpop.f32.mrf.mxu2 }
 0x3e3   : > { %v2257_v32 = vpop.f32.mrf.mxu3  ;;  %v5217_v44 = vadd.f32 %v2192_v50, %v5021_v4 }
 0x3e7   : > { %2598 = vmatmul.f32.gmra.mxu2 %v6052_v13  ;;  %v6056_v13 = vld [vmem:[#allocation25_spill] sm:$0xff] }
 0x3e8   : > { %2307 = vmatmul.f32.gmra.mxu3 %v5219_v2  ;;  %6057 = vst [vmem:[#allocation25_spill] sm:$0xff] %v5240_v56 }
 0x3ea   : > { %v2195_v28 = vpop.f32.mrf.mxu2 }
 0x3eb   : > { %v2260_v59 = vpop.f32.mrf.mxu3  ;;  %v5224_v1 = vadd.f32 %v2195_v28, %v5039_v14 }
 0x3ef   : > { %2601 = vmatmul.f32.gmra.mxu2 %v6054_v46  ;;  %v6058_v46 = vld [vmem:[#allocation32_spill] sm:$0xff] }
 0x3f0   : > { %2310 = vmatmul.f32.gmra.mxu3 %v5226_v0  ;;  %6059 = vst [vmem:[#allocation32_spill] sm:$0xff] %v5247_v37 }
 0x3f2   : > { %v2198_v47 = vpop.f32.mrf.mxu2 }
 0x3f3   : > { %v2263_v4 = vpop.f32.mrf.mxu3  ;;  %v5231_v50 = vadd.f32 %v2198_v47, %v5054_v42 }
 0x3f7   : > { %2604 = vmatmul.f32.gmra.mxu2 %v6056_v13 }
 0x3f8   : > { %2313 = vmatmul.f32.gmra.mxu3 %v5233_v61 }
 0x3fa   : > { %v2201_v2 = vpop.f32.mrf.mxu2 }
 0x3fb   : > { %v2266_v14 = vpop.f32.mrf.mxu3  ;;  %v5238_v28 = vadd.f32 %v2201_v2, %v5070_v22 }
 0x3fc   : > { %v2267_v61 = vadd.f32 %v2266_v14, %v5073_v10  ;;  %v2261_v10 = vadd.f32 %v2260_v59, %v5042_v17  ;;  %v6063_v17 = vld [vmem:[#allocation87_spill] sm:$0xff]  ;;  %v6064_v59 = vld [vmem:[#allocation24_spill] sm:$0xff] }
 0x3fe   : > { %v2801_v19 = vmul.f32 0.2, %v2267_v61 }
 0x3ff   : > { %2607 = vmatmul.f32.gmra.mxu2 %v6058_v46 }
 0x400   : > { %2316 = vmatmul.f32.gmra.mxu3 %v5240_v56 }
 0x402   : > { %v2204_v0 = vpop.f32.mrf.mxu2 }
 0x403   : > { %v2269_v42 = vpop.f32.mrf.mxu3  ;;  %v5245_v47 = vadd.f32 %v2204_v0, %v5086_v48  ;;  %v6061_v48 = vld [vmem:[#allocation17_spill] sm:$0xff] }
 0x404   : > { %v2270_v22 = vadd.f32 %v2269_v42, %v5089_v41  ;;  %v2341_v0 = vadd.f32 %v6061_v48, %v6060_v12  ;;  %v6062_v41 = vld [vmem:[#allocation22_spill] sm:$0xff] }
 0x406   : > { %v2803_v52 = vmul.f32 0.2, %v2270_v22 }
 0x407   : > { %2610 = vmatmul.f32.gmra.mxu2 %v4776_v38 }
 0x408   : > { %2319 = vmatmul.f32.gmra.mxu3 %v5247_v37  ;;  %v2264_v37 = vadd.f32 %v2263_v4, %v5057_v9  ;;  %v2867_v14 = vmax.f32 %v2270_v22, %v2803_v52  ;;  %v2344_v4 = vadd.f32 %v6064_v59, %v6063_v17  ;;  %v2779_v59 = vmul.f32 0.2, %v5141_v21 }
 0x40a   : > { %v2207_v2 = vpop.f32.mrf.mxu2  ;;  %v2799_v42 = vmul.f32 0.2, %v2264_v37 }
 0x40b   : > { %v2272_v13 = vpop.f32.mrf.mxu3  ;;  %v5254_v56 = vadd.f32 %v2207_v2, %v5102_v18  ;;  %v2454_v18 = vadd.f32 %v6062_v41, %v2341_v0  ;;  %v2787_v41 = vmul.f32 0.2, %v5185_v24 }
 0x40c   : > { %v2273_v46 = vadd.f32 %v2272_v13, %v5105_v16  ;;  %v2258_v16 = vadd.f32 %v2257_v32, %v5024_v3  ;;  %v2865_v13 = vmax.f32 %v2267_v61, %v2801_v19  ;;  %v2863_v22 = vmax.f32 %v2264_v37, %v2799_v42 }
 0x40d   : > { %v2791_v32 = vmul.f32 0.2, %v5203_v55 }
 0x40e   : > { %v2805_v31 = vmul.f32 0.2, %v2273_v46  ;;  %v2795_v52 = vmul.f32 0.2, %v2258_v16 }
 0x40f   : > { %2613 = vmatmul.f32.gmra.mxu2 %v4801_v39  ;;  %v2255_v39 = vadd.f32 %v2254_v36, %v5006_v11 }
 0x410   : > { %v2869_v38 = vmax.f32 %v2273_v46, %v2805_v31  ;;  %2678 = vmatmul.f32.vlgmr.msra.gmra.mxu3 %v4803_v34  ;;  %v2797_v34 = vmul.f32 0.2, %v2261_v10  ;;  %v2859_v46 = vmax.f32 %v2258_v16, %v2795_v52  ;;  %v6068_v16 = vld [vmem:[#allocation27_spill] sm:$0xff]  ;;  %v2775_v52 = vmul.f32 0.2, %v5117_v60 }
 0x411   : > { %v2793_v3 = vmul.f32 0.2, %v2255_v39 }
 0x412   : > { %2916 = vmatpush.msra.mxu0 %v2869_v38  ;;  %v2566_v2 = vpop.f32.mrf.mxu2  ;;  %v2861_v19 = vmax.f32 %v2261_v10, %v2797_v34  ;;  %v6067_v38 = vld [vmem:[#allocation29_spill] sm:$0xff] }
 0x413   : > { %v2275_v12 = vpop.f32.mrf.mxu3  ;;  %v5268_v31 = vadd.f32 %v2566_v2, %v2454_v18  ;;  %v2857_v37 = vmax.f32 %v2255_v39, %v2793_v3  ;;  %v2855_v18 = vmax.f32 %v5203_v55, %v2791_v32  ;;  %v2851_v2 = vmax.f32 %v5185_v24, %v2787_v41  ;;  %v6072_v32 = vld [vmem:[#allocation30_spill] sm:$0xff]  ;;  %v6078_v41 = vld [vmem:[#allocation28_spill] sm:$0xff] }
 0x414   : > { %v5266_v9 = vadd.f32 %v2275_v12, %v5114_v49  ;;  %2917 = vmatpush.msra.mxu0 %v2867_v14  ;;  %v6065_v49 = vld [vmem:[#allocation26_spill] sm:$0xff]  ;;  %v2783_v12 = vmul.f32 0.2, %v5165_v35 }
 0x415   : > { %v2457_v61 = vadd.f32 %v6065_v49, %v2344_v4 }
 0x416   : > { %2918 = vmatpush.msra.mxu0 %v2865_v13  ;;  %v2847_v24 = vmax.f32 %v5165_v35, %v2783_v12 }
 0x417   : > { %2616 = vmatmul.f32.gmra.mxu2 %v4829_v58  ;;  %v2789_v58 = vmul.f32 0.2, %v5194_v53 }
 0x418   : > { %2681 = vmatmul.f32.gmra.mxu3 %v4831_v25  ;;  %2919 = vmatpush.msra.mxu0 %v2863_v22  ;;  %v6066_v25 = vld [vmem:[#allocation33_spill] sm:$0xff] }
 0x419   : > { %v2347_v10 = vadd.f32 %v6067_v38, %v6066_v25  ;;  %v2853_v14 = vmax.f32 %v5194_v53, %v2789_v58  ;;  %v6069_v53 = vld [vmem:[#allocation78_spill] sm:$0xff]  ;;  %v6075_v25 = vld [vmem:[#allocation83_spill] sm:$0xff] }
 0x41a   : > { %2920 = vmatpush.msra.mxu0 %v2861_v19  ;;  %v2569_v36 = vpop.f32.mrf.mxu2  ;;  %v2350_v17 = vadd.f32 %v4786_v29, %v6069_v53  ;;  %v2843_v29 = vmax.f32 %v5141_v21, %v2779_v59  ;;  %v6071_v19 = vld [vmem:[#allocation39_spill] sm:$0xff] }
 0x41b   : > { %v2278_v11 = vpop.f32.mrf.mxu3  ;;  %v5280_v0 = vadd.f32 %v2569_v36, %v2457_v61  ;;  %v2460_v42 = vadd.f32 %v6068_v16, %v2347_v10  ;;  %v2839_v61 = vmax.f32 %v5117_v60, %v2775_v52  ;;  %v6076_v60 = vld [vmem:[#allocation34_spill] sm:$0xff]  ;;  %v6077_v10 = vld [vmem:[#allocation41_spill] sm:$0xff]  ;;  %v6087_v52 = vld [vmem:[#allocation35_spill] sm:$0xff] }
 0x41c   : > { %v5278_v48 = vadd.f32 %v2278_v11, %v5126_v23  ;;  %2921 = vmatpush.msra.mxu0 %v2859_v46  ;;  %v2785_v23 = vmul.f32 0.2, %v5176_v6  ;;  %v6073_v46 = vld [vmem:[#allocation44_spill] sm:$0xff]  ;;  %v2356_v38 = vadd.f32 %v6076_v60, %v6075_v25  ;;  %v6095_v60 = vld [vmem:[#allocation47_spill] sm:$0xff] }
 0x41e   : > { %2922 = vmatpush.msra.mxu0 %v2857_v37  ;;  %v2849_v34 = vmax.f32 %v5176_v6, %v2785_v23  ;;  %v2463_v6 = vadd.f32 %v4788_v40, %v2350_v17  ;;  %v6070_v40 = vld [vmem:[#allocation81_spill] sm:$0xff] }
 0x41f   : > { %2619 = vmatmul.f32.gmra.mxu2 %v4857_v15  ;;  %v2353_v49 = vadd.f32 %v6071_v19, %v6070_v40 }
 0x420   : > { %2684 = vmatmul.f32.gmra.mxu3 %v4859_v63  ;;  %2923 = vmatpush.msra.mxu0 %v2855_v18  ;;  %v2781_v63 = vmul.f32 0.2, %v5153_v27  ;;  %v6079_v18 = vld [vmem:[#allocation49_spill] sm:$0xff] }
 0x421   : > { %v2469_v23 = vadd.f32 %v6079_v18, %v2356_v38  ;;  %v6097_v18 = vld [vmem:[#allocation64_spill] sm:$0xff] }
 0x422   : > { %2924 = vmatpush.msra.mxu0 %v2853_v14  ;;  %v2572_v39 = vpop.f32.mrf.mxu2  ;;  %v2845_v4 = vmax.f32 %v5153_v27, %v2781_v63  ;;  %v6083_v63 = vld [vmem:[#allocation16_spill] sm:$0xff] }
 0x423   : > { %v2281_v13 = vpop.f32.mrf.mxu3  ;;  %v5297_v15 = vadd.f32 %v2572_v39, %v2460_v42  ;;  %v6082_v39 = vld [vmem:[#allocation18_spill] sm:$0xff] }
 0x424   : > { %v5295_v55 = vadd.f32 %v2281_v13, %v5138_v43  ;;  %2925 = vmatpush.msra.mxu0 %v2851_v2  ;;  %v2777_v43 = vmul.f32 0.2, %v5129_v20  ;;  %v6081_v2 = vld [vmem:[#allocation38_spill] sm:$0xff] }
 0x426   : > { %2926 = vmatpush.msra.mxu0 %v2849_v34  ;;  %v2841_v27 = vmax.f32 %v5129_v20, %v2777_v43  ;;  %v6084_v34 = vld [vmem:[#allocation79_spill] sm:$0xff] }
 0x427   : > { %2622 = vmatmul.f32.gmra.mxu2 %v4883_v5  ;;  %v5315_v5 = vld [vmem:[%s5640_s5] sm:$0x3] }
 0x428   : > { %2687 = vmatmul.f32.gmra.mxu3 %v4885_v57  ;;  %2927 = vmatpush.msra.mxu0 %v2847_v24  ;;  %v2912_v21 = vperm.slane %v5315_v5, 0 }
 0x42a   : > { %2928 = vmatpush.msra.mxu0 %v2845_v4  ;;  %v2575_v3 = vpop.f32.mrf.mxu2  ;;  %v6086_v4 = vld [vmem:[#allocation31_spill] sm:$0xff] }
 0x42b   : > { %v2284_v22 = vpop.f32.mrf.mxu3  ;;  %v5320_v35 = vadd.f32 %v2575_v3, %v2463_v6 }
 0x42c   : > { %v5318_v57 = vadd.f32 %v2284_v22, %v5150_v7  ;;  %2929 = vmatpush.msra.mxu0 %v2843_v29  ;;  %v6074_v7 = vld [vmem:[#allocation36_spill] sm:$0xff]  ;;  %v6088_v29 = vld [vmem:[#allocation14_spill] sm:$0xff] }
 0x42d   : > { %v2466_v11 = vadd.f32 %v6074_v7, %v2353_v49  ;;  %v6089_v22 = vld [vmem:[#allocation76_spill] sm:$0xff] }
 0x42e   : > { %2930 = vmatpush.msra.mxu0 %v2841_v27 }
 0x42f   : > { %2625 = vmatmul.f32.gmra.mxu2 %v6072_v32 }
 0x430   : > { %2690 = vmatmul.f32.gmra.mxu3 %v6073_v46  ;;  %2931 = vmatpush.msra.mxu0 %v2839_v61  ;;  %v6091_v61 = vld [vmem:[#allocation37_spill] sm:$0xff] }
 0x431   : > { %2932 = vmatmul.f32.vlgmr.msra.gmra.mxu0 %v2912_v21 }
 0x432   : > { %v2578_v36 = vpop.f32.mrf.mxu2 }
 0x433   : > { %v2287_v20 = vpop.f32.mrf.mxu3  ;;  %v5335_v37 = vadd.f32 %v2578_v36, %v2466_v11  ;;  %v6092_v11 = vld [vmem:[#allocation40_spill] sm:$0xff] }
 0x434   : > { %v5333_v58 = vadd.f32 %v2287_v20, %v5162_v26  ;;  %v6080_v26 = vld [vmem:[#allocation68_spill] sm:$0xff]  ;;  %v6093_v20 = vld [vmem:[#allocation53_spill] sm:$0xff] }
 0x435   : > { %v2359_v13 = vadd.f32 %v6081_v2, %v6080_v26 }
 0x437   : > { %2628 = vmatmul.f32.gmra.mxu2 %v6077_v10  ;;  %v2472_v53 = vadd.f32 %v6084_v34, %v2359_v13  ;;  %v6100_v13 = vld [vmem:[#allocation92_spill] sm:$0xff]  ;;  %v6101_v34 = vld [vmem:[#allocation93_spill] sm:$0xff] }
 0x438   : > { %2693 = vmatmul.f32.gmra.mxu3 %v6078_v41  ;;  %v6096_v41 = vld [vmem:[#allocation56_spill] sm:$0xff] }
 0x43a   : > { %v2581_v16 = vpop.f32.mrf.mxu2 }
 0x43b   : > { %v2290_v14 = vpop.f32.mrf.mxu3  ;;  %v5345_v12 = vadd.f32 %v2581_v16, %v2469_v23  ;;  %v6099_v16 = vld [vmem:[#allocation69_spill] sm:$0xff] }
 0x43c   : > { %v5343_v42 = vadd.f32 %v2290_v14, %v5173_v51  ;;  %v6085_v51 = vld [vmem:[#allocation72_spill] sm:$0xff]  ;;  %v6098_v14 = vld [vmem:[#allocation19_spill] sm:$0xff] }
 0x43d   : > { %v2362_v6 = vadd.f32 %v6086_v4, %v6085_v51  ;;  %v6103_v51 = vld [vmem:[#allocation96_spill] sm:$0xff]  ;;  %v6104_v4 = vld [vmem:[#allocation97_spill] sm:$0xff] }
 0x43f   : > { %2631 = vmatmul.f32.gmra.mxu2 %v6082_v39  ;;  %v2475_v3 = vadd.f32 %v6089_v22, %v2362_v6 }
 0x440   : > { %2696 = vmatmul.f32.gmra.mxu3 %v6083_v63 }
 0x442   : > { %v2584_v59 = vpop.f32.mrf.mxu2 }
 0x443   : > { %v2293_v17 = vpop.f32.mrf.mxu3  ;;  %v5355_v43 = vadd.f32 %v2584_v59, %v2472_v53  ;;  %v6102_v53 = vld [vmem:[#allocation94_spill] sm:$0xff] }
 0x444   : > { %v5353_v24 = vadd.f32 %v2293_v17, %v5182_v54  ;;  %v6090_v54 = vld [vmem:[#allocation23_spill] sm:$0xff] }
 0x447   : > { %2634 = vmatmul.f32.gmra.mxu2 %v6087_v52 }
 0x448   : > { %2699 = vmatmul.f32.gmra.mxu3 %v6088_v29 }
 0x44a   : > { %v2587_v40 = vpop.f32.mrf.mxu2 }
 0x44b   : > { %v2296_v27 = vpop.f32.mrf.mxu3  ;;  %v5365_v49 = vadd.f32 %v2587_v40, %v2475_v3 }
 0x44c   : > { %v5363_v19 = vadd.f32 %v2296_v27, %v5191_v45  ;;  %v6094_v45 = vld [vmem:[#allocation58_spill] sm:$0xff] }
 0x44f   : > { %2637 = vmatmul.f32.gmra.mxu2 %v6090_v54 }
 0x450   : > { %2702 = vmatmul.f32.gmra.mxu3 %v6091_v61 }
 0x452   : > { %v5369_v46 = vpop.f32.mrf.mxu2 }
 0x453   : > { %v2299_v32 = vpop.f32.mrf.mxu3 }
 0x454   : > { %v5372_v7 = vadd.f32 %v2299_v32, %v5200_v8 }
 0x457   : > { %2640 = vmatmul.f32.gmra.mxu2 %v6092_v11 }
 0x458   : > { %2705 = vmatmul.f32.gmra.mxu3 %v6093_v20 }
 0x45a   : > { %v5376_v25 = vpop.f32.mrf.mxu2 }
 0x45b   : > { %v2302_v36 = vpop.f32.mrf.mxu3 }
 0x45f   : > { %2643 = vmatmul.f32.gmra.mxu2 %v6094_v45  ;;  %v2303_v45 = vadd.f32 %v2302_v36, %v5210_v30  ;;  %v2823_v30 = vmul.f32 0.2, %v5372_v7 }
 0x460   : > { %2708 = vmatmul.f32.gmra.mxu3 %v6095_v60 }
 0x462   : > { %v5380_v10 = vpop.f32.mrf.mxu2 }
 0x463   : > { %v2305_v38 = vpop.f32.mrf.mxu3 }
 0x464   : > { %v2306_v11 = vadd.f32 %v2305_v38, %v5217_v44  ;;  %v2825_v44 = vmul.f32 0.2, %v2303_v45 }
 0x467   : > { %2646 = vmatmul.f32.gmra.mxu2 %v6096_v41 }
 0x468   : > { %2711 = vmatmul.f32.gmra.mxu3 %v6097_v18 }
 0x46a   : > { %v5384_v23 = vpop.f32.mrf.mxu2 }
 0x46b   : > { %v2308_v8 = vpop.f32.mrf.mxu3 }
 0x46c   : > { %v2309_v54 = vadd.f32 %v2308_v8, %v5224_v1  ;;  %v2827_v8 = vmul.f32 0.2, %v2306_v11 }
 0x46e   : > { %v2891_v36 = vmax.f32 %v2306_v11, %v2827_v8  ;;  %v6113_v8 = vld [vmem:[#allocation99_spill] sm:$0xff] }
 0x46f   : > { %2649 = vmatmul.f32.gmra.mxu2 %v6098_v14  ;;  %v6106_v14 = vld [vmem:[#allocation100_spill] sm:$0xff] }
 0x470   : > { %2714 = vmatmul.f32.gmra.mxu3 %v6099_v16 }
 0x472   : > { %v5388_v2 = vpop.f32.mrf.mxu2 }
 0x473   : > { %v2311_v26 = vpop.f32.mrf.mxu3 }
 0x474   : > { %v2312_v3 = vadd.f32 %v2311_v26, %v5231_v50  ;;  %v6105_v50 = vld [vmem:[#allocation21_spill] sm:$0xff] }
 0x477   : > { %2652 = vmatmul.f32.gmra.mxu2 %v6100_v13  ;;  %v2821_v13 = vmul.f32 0.2, %v5363_v19 }
 0x478   : > { %2717 = vmatmul.f32.gmra.mxu3 %v5063_v62 }
 0x47a   : > { %v5392_v63 = vpop.f32.mrf.mxu2 }
 0x47b   : > { %v2314_v39 = vpop.f32.mrf.mxu3 }
 0x47c   : > { %v2315_v62 = vadd.f32 %v2314_v39, %v5238_v28  ;;  %v2889_v39 = vmax.f32 %v2303_v45, %v2825_v44  ;;  %v6114_v44 = vld [vmem:[#allocation108_spill] sm:$0xff] }
 0x47e   : > { %v2833_v61 = vmul.f32 0.2, %v2315_v62 }
 0x47f   : > { %2655 = vmatmul.f32.gmra.mxu2 %v6101_v34 }
 0x480   : > { %2720 = vmatmul.f32.gmra.mxu3 %v6102_v53  ;;  %v2897_v41 = vmax.f32 %v2315_v62, %v2833_v61  ;;  %v2815_v62 = vmul.f32 0.2, %v5333_v58 }
 0x482   : > { %v5396_v59 = vpop.f32.mrf.mxu2 }
 0x483   : > { %v2317_v17 = vpop.f32.mrf.mxu3 }
 0x484   : > { %v2318_v6 = vadd.f32 %v2317_v17, %v5245_v47  ;;  %v2831_v47 = vmul.f32 0.2, %v2312_v3  ;;  %v2819_v17 = vmul.f32 0.2, %v5353_v24 }
 0x486   : > { %v2835_v27 = vmul.f32 0.2, %v2318_v6 }
 0x487   : > { %2658 = vmatmul.f32.gmra.mxu2 %v6103_v51  ;;  %v2887_v51 = vmax.f32 %v5372_v7, %v2823_v30  ;;  %v6109_v7 = vld [vmem:[#allocation95_spill] sm:$0xff] }
 0x488   : > { %2723 = vmatmul.f32.gmra.mxu3 %v6104_v4  ;;  %v2899_v20 = vmax.f32 %v2318_v6, %v2835_v27  ;;  %v2817_v4 = vmul.f32 0.2, %v5343_v42  ;;  %v2885_v6 = vmax.f32 %v5363_v19, %v2821_v13  ;;  %v2813_v27 = vmul.f32 0.2, %v5318_v57 }
 0x489   : > { %v2811_v19 = vmul.f32 0.2, %v5295_v55 }
 0x48a   : > { %v5401_v29 = vpop.f32.mrf.mxu2  ;;  %v2877_v11 = vmax.f32 %v5318_v57, %v2813_v27  ;;  %v2913_v57 = vperm.slane %v5315_v5, 1 }
 0x48b   : > { %v2320_v52 = vpop.f32.mrf.mxu3 }
 0x48c   : > { %v2321_v22 = vadd.f32 %v2320_v52, %v5254_v56  ;;  %v2829_v56 = vmul.f32 0.2, %v2309_v54  ;;  %v6108_v52 = vld [vmem:[#allocation102_spill] sm:$0xff] }
 0x48e   : > { %v2837_v40 = vmul.f32 0.2, %v2321_v22  ;;  %v2893_v38 = vmax.f32 %v2309_v54, %v2829_v56 }
 0x490   : > { %v2901_v32 = vmax.f32 %v2321_v22, %v2837_v40  ;;  %2726 = vmatmul.f32.gmra.mxu3 %v5109_v33  ;;  %v2895_v33 = vmax.f32 %v2312_v3, %v2831_v47  ;;  %v2883_v22 = vmax.f32 %v5353_v24, %v2819_v17  ;;  %v2881_v40 = vmax.f32 %v5343_v42, %v2817_v4  ;;  %v6110_v47 = vld [vmem:[#allocation104_spill] sm:$0xff]  ;;  %v6118_v17 = vld [vmem:[#allocation110_spill] sm:$0xff] }
 0x491   : > { %v2809_v24 = vmul.f32 0.2, %v5278_v48  ;;  %v2807_v42 = vmul.f32 0.2, %v5266_v9 }
 0x492   : > { %2936 = vmatpush.msra.mxu1 %v2901_v32  ;;  %v2614_v28 = vpop.f32.mrf.mxu2  ;;  %v2879_v32 = vmax.f32 %v5333_v58, %v2815_v62  ;;  %v6120_v62 = vld [vmem:[#allocation111_spill] sm:$0xff] }
 0x493   : > { %v2679_v60 = vpop.f32.mrf.mxu3  ;;  %v5411_v18 = vadd.f32 %v2614_v28, %v6105_v50  ;;  %v2873_v28 = vmax.f32 %v5278_v48, %v2809_v24  ;;  %v6112_v50 = vld [vmem:[#allocation106_spill] sm:$0xff] }
 0x494   : > { %v5414_v1 = vadd.f32 %v2679_v60, %v5268_v31  ;;  %2937 = vmatpush.msra.mxu1 %v2899_v20  ;;  %v6107_v31 = vld [vmem:[#allocation15_spill] sm:$0xff]  ;;  %v2875_v20 = vmax.f32 %v5295_v55, %v2811_v19  ;;  %v6111_v60 = vld [vmem:[#allocation98_spill] sm:$0xff] }
 0x496   : > { %2938 = vmatpush.msra.mxu1 %v2897_v41  ;;  %v2871_v41 = vmax.f32 %v5266_v9, %v2807_v42  ;;  %v6115_v9 = vld [vmem:[#allocation101_spill] sm:$0xff] }
 0x498   : > { %2729 = vmatmul.f32.gmra.mxu3 %v6106_v14  ;;  %2939 = vmatpush.msra.mxu1 %v2895_v33 }
 0x49a   : > { %2940 = vmatpush.msra.mxu1 %v2893_v38  ;;  %v2617_v16 = vpop.f32.mrf.mxu2 }
 0x49b   : > { %v2682_v26 = vpop.f32.mrf.mxu3  ;;  %v5420_v34 = vadd.f32 %v2617_v16, %v6107_v31  ;;  %v6116_v16 = vld [vmem:[#allocation109_spill] sm:$0xff] }
 0x49c   : > { %v5423_v53 = vadd.f32 %v2682_v26, %v5280_v0  ;;  %2941 = vmatpush.msra.mxu1 %v2891_v36 }
 0x49e   : > { %2942 = vmatpush.msra.mxu1 %v2889_v39  ;;  %v6117_v39 = vld [vmem:[#allocation103_spill] sm:$0xff] }
 0x4a0   : > { %2732 = vmatmul.f32.gmra.mxu3 %v6108_v52  ;;  %2943 = vmatpush.msra.mxu1 %v2887_v51 }
 0x4a2   : > { %2944 = vmatpush.msra.mxu1 %v2885_v6  ;;  %v2620_v0 = vpop.f32.mrf.mxu2  ;;  %v6119_v6 = vld [vmem:[#allocation105_spill] sm:$0xff] }
 0x4a3   : > { %v2685_v3 = vpop.f32.mrf.mxu3  ;;  %v5435_v54 = vadd.f32 %v2620_v0, %v6109_v7  ;;  %v6123_v7 = vld [vmem:[#allocation52_spill] sm:$0xff] }
 0x4a4   : > { %v5438_v61 = vadd.f32 %v2685_v3, %v5297_v15  ;;  %2945 = vmatpush.msra.mxu1 %v2883_v22  ;;  %v6121_v3 = vld [vmem:[#allocation107_spill] sm:$0xff] }
 0x4a6   : > { %2946 = vmatpush.msra.mxu1 %v2881_v40  ;;  %v6122_v40 = vld [vmem:[#allocation112_spill] sm:$0xff] }
 0x4a8   : > { %2735 = vmatmul.f32.gmra.mxu3 %v6110_v47  ;;  %2947 = vmatpush.msra.mxu1 %v2879_v32  ;;  %v6124_v32 = vld [vmem:[#allocation60_spill] sm:$0xff]  ;;  %v6126_v47 = vld [vmem:[#allocation13_spill] sm:$0xff] }
 0x4aa   : > { %2948 = vmatpush.msra.mxu1 %v2877_v11  ;;  %v2623_v15 = vpop.f32.mrf.mxu2  ;;  %v6125_v11 = vld [vmem:[#allocation90_spill] sm:$0xff] }
 0x4ab   : > { %v2688_v45 = vpop.f32.mrf.mxu3  ;;  %v5449_v56 = vadd.f32 %v2623_v15, %v6111_v60  ;;  %v6128_v15 = vld [vmem:[#allocation54_spill] sm:$0xff] }
 0x4ac   : > { %v5452_v58 = vadd.f32 %v2688_v45, %v5320_v35  ;;  %2949 = vmatpush.msra.mxu1 %v2875_v20  ;;  %v6127_v20 = vld [vmem:[#allocation25_spill] sm:$0xff]  ;;  %v6129_v45 = vld [vmem:[#allocation20_spill] sm:$0xff] }
 0x4ae   : > { %2950 = vmatpush.msra.mxu1 %v2873_v28  ;;  %v2383_v28 = vadd.f32 %v6129_v45, %v6128_v15 }
 0x4b0   : > { %2738 = vmatmul.f32.gmra.mxu3 %v6112_v50  ;;  %2951 = vmatpush.msra.mxu1 %v2871_v41  ;;  %v6130_v41 = vld [vmem:[#allocation50_spill] sm:$0xff]  ;;  %v6131_v50 = vld [vmem:[#allocation89_spill] sm:$0xff] }
 0x4b1   : > { %2952 = vmatmul.f32.vlgmr.msra.gmra.mxu1 %v2913_v57 }
 0x4b2   : > { %v2626_v55 = vpop.f32.mrf.mxu2 }
 0x4b3   : > { %v2691_v48 = vpop.f32.mrf.mxu3  ;;  %v5460_v33 = vadd.f32 %v2626_v55, %v6113_v8  ;;  %v2380_v55 = vadd.f32 %v6131_v50, %v6130_v41  ;;  %v6133_v8 = vld [vmem:[#allocation88_spill] sm:$0xff] }
 0x4b4   : > { %v5463_v35 = vadd.f32 %v2691_v48, %v5335_v37  ;;  %v6132_v48 = vld [vmem:[#allocation45_spill] sm:$0xff]  ;;  %v6146_v41 = vld [vmem:[#allocation48_spill] sm:$0xff] }
 0x4b8   : > { %2741 = vmatmul.f32.gmra.mxu3 %v6114_v44  ;;  %v2386_v44 = vadd.f32 %v6133_v8, %v6132_v48  ;;  %v6147_v48 = vld [vmem:[#allocation74_spill] sm:$0xff] }
 0x4ba   : > { %v2629_v38 = vpop.f32.mrf.mxu2 }
 0x4bb   : > { %v2694_v14 = vpop.f32.mrf.mxu3  ;;  %v5467_v30 = vadd.f32 %v2629_v38, %v6115_v9  ;;  %v6134_v38 = vld [vmem:[#allocation46_spill] sm:$0xff] }
 0x4bc   : > { %v5470_v36 = vadd.f32 %v2694_v14, %v5345_v12  ;;  %v6135_v14 = vld [vmem:[#allocation70_spill] sm:$0xff] }
 0x4bd   : > { %v2377_v9 = vadd.f32 %v6135_v14, %v6134_v38  ;;  %v6148_v14 = vld [vmem:[#allocation75_spill] sm:$0xff] }
 0x4c0   : > { %2744 = vmatmul.f32.gmra.mxu3 %v6116_v16  ;;  %v6136_v16 = vld [vmem:[#allocation66_spill] sm:$0xff] }
 0x4c2   : > { %v2632_v26 = vpop.f32.mrf.mxu2 }
 0x4c3   : > { %v2697_v13 = vpop.f32.mrf.mxu3  ;;  %v5474_v31 = vadd.f32 %v2632_v26, %v6117_v39  ;;  %v2496_v26 = vadd.f32 %v6136_v16, %v2383_v28  ;;  %v6138_v39 = vld [vmem:[#allocation62_spill] sm:$0xff]  ;;  %v6145_v28 = vld [vmem:[#allocation57_spill] sm:$0xff] }
 0x4c4   : > { %v5477_v37 = vadd.f32 %v2697_v13, %v5355_v43  ;;  %v6137_v13 = vld [vmem:[#allocation65_spill] sm:$0xff]  ;;  %v2368_v50 = vadd.f32 %v6146_v41, %v6145_v28 }
 0x4c5   : > { %v6149_v16 = vld [vmem:[#allocation73_spill] sm:$0xff] }
 0x4c8   : > { %2747 = vmatmul.f32.gmra.mxu3 %v6118_v17  ;;  %v2374_v17 = vadd.f32 %v6138_v39, %v6137_v13  ;;  %v6150_v13 = vld [vmem:[#allocation86_spill] sm:$0xff] }
 0x4ca   : > { %v2635_v51 = vpop.f32.mrf.mxu2  ;;  %v2487_v8 = vadd.f32 %v6147_v48, %v2374_v17  ;;  %v2786_v48 = vmul.f32 0.2, %v5470_v36 }
 0x4cb   : > { %v2700_v4 = vpop.f32.mrf.mxu3  ;;  %v5481_v52 = vadd.f32 %v2635_v51, %v6119_v6  ;;  %v6139_v51 = vld [vmem:[#allocation80_spill] sm:$0xff]  ;;  %v6140_v6 = vld [vmem:[#allocation91_spill] sm:$0xff] }
 0x4cc   : > { %v5484_v12 = vadd.f32 %v2700_v4, %v5365_v49  ;;  %v2493_v4 = vadd.f32 %v6139_v51, %v2380_v55  ;;  %v6151_v51 = vld [vmem:[#allocation84_spill] sm:$0xff] }
 0x4d0   : > { %2750 = vmatmul.f32.gmra.mxu3 %v6120_v62  ;;  %v2499_v62 = vadd.f32 %v6140_v6, %v2386_v44 }
 0x4d2   : > { %v2638_v22 = vpop.f32.mrf.mxu2  ;;  %v2612_v15 = vadd.f32 %v5401_v29, %v2499_v62 }
 0x4d3   : > { %v2703_v0 = vpop.f32.mrf.mxu3  ;;  %v5488_v27 = vadd.f32 %v2638_v22, %v6121_v3  ;;  %v2609_v22 = vadd.f32 %v5396_v59, %v2496_v26  ;;  %v6141_v3 = vld [vmem:[#allocation32_spill] sm:$0xff]  ;;  %v2365_v26 = vadd.f32 %v6149_v16, %v6148_v14  ;;  %v2782_v14 = vmul.f32 0.2, %v5452_v58 }
 0x4d8   : > { %2753 = vmatmul.f32.gmra.mxu3 %v6122_v40  ;;  %v6142_v40 = vld [vmem:[#allocation61_spill] sm:$0xff] }
 0x4db   : > { %v2706_v43 = vpop.f32.mrf.mxu3 }
 0x4e0   : > { %2756 = vmatmul.f32.gmra.mxu3 %v6123_v7  ;;  %v6143_v7 = vld [vmem:[#allocation43_spill] sm:$0xff] }
 0x4e3   : > { %v2709_v19 = vpop.f32.mrf.mxu3 }
 0x4e8   : > { %2759 = vmatmul.f32.gmra.mxu3 %v6124_v32  ;;  %v2371_v32 = vadd.f32 %v6143_v7, %v6142_v40 }
 0x4eb   : > { %v2712_v24 = vpop.f32.mrf.mxu3 }
 0x4f0   : > { %2762 = vmatmul.f32.gmra.mxu3 %v6125_v11  ;;  %v6144_v11 = vld [vmem:[#allocation77_spill] sm:$0xff] }
 0x4f3   : > { %v2715_v49 = vpop.f32.mrf.mxu3 }
 0x4f8   : > { %2765 = vmatmul.f32.gmra.mxu3 %v6126_v47  ;;  %v2490_v47 = vadd.f32 %v6144_v11, %v2377_v9  ;;  %v2484_v9 = vadd.f32 %v6150_v13, %v2371_v32 }
 0x4fa   : > { %v2603_v59 = vadd.f32 %v5388_v2, %v2490_v47  ;;  %v2597_v6 = vadd.f32 %v5380_v10, %v2484_v9  ;;  %v6152_v2 = vld [vmem:[#allocation82_spill] sm:$0xff]  ;;  %v2846_v9 = vmax.f32 %v5452_v58, %v2782_v14 }
 0x4fb   : > { %v2718_v42 = vpop.f32.mrf.mxu3 }
 0x4fc   : > { %v2716_v39 = vadd.f32 %v2715_v49, %v2603_v59  ;;  %v2710_v40 = vadd.f32 %v2709_v19, %v2597_v6  ;;  %v2784_v59 = vmul.f32 0.2, %v5463_v35 }
 0x4fe   : > { %v2800_v7 = vmul.f32 0.2, %v2716_v39  ;;  %v2848_v13 = vmax.f32 %v5463_v35, %v2784_v59 }
 0x500   : > { %2768 = vmatmul.f32.gmra.mxu3 %v6127_v20  ;;  %v2606_v20 = vadd.f32 %v5392_v63, %v2493_v4  ;;  %v2600_v63 = vadd.f32 %v5384_v23, %v2487_v8  ;;  %v2481_v4 = vadd.f32 %v6151_v51, %v2368_v50  ;;  %v2864_v28 = vmax.f32 %v2716_v39, %v2800_v7  ;;  %v2415_v51 = vpop.f32.mrf.mxu0 }
 0x502   : > { %v2719_v44 = vadd.f32 %v2718_v42, %v2606_v20  ;;  %v2713_v62 = vadd.f32 %v2712_v24, %v2600_v63  ;;  %v2478_v42 = vadd.f32 %v6152_v2, %v2365_v26  ;;  %v2796_v24 = vmul.f32 0.2, %v2710_v40 }
 0x503   : > { %v2721_v60 = vpop.f32.mrf.mxu3  ;;  %v2780_v26 = vmul.f32 0.2, %v5438_v61 }
 0x504   : > { %v2722_v45 = vadd.f32 %v2721_v60, %v2609_v22  ;;  %v2802_v17 = vmul.f32 0.2, %v2719_v44  ;;  %v2591_v23 = vadd.f32 %v5369_v46, %v2478_v42  ;;  %v2798_v47 = vmul.f32 0.2, %v2713_v62 }
 0x505   : > { %v2790_v46 = vmul.f32 0.2, %v5484_v12  ;;  %v2844_v63 = vmax.f32 %v5438_v61, %v2780_v26 }
 0x506   : > { %v2804_v29 = vmul.f32 0.2, %v2722_v45  ;;  %v2866_v20 = vmax.f32 %v2719_v44, %v2802_v17  ;;  %v2704_v10 = vadd.f32 %v2703_v0, %v2591_v23 }
 0x507   : > { %v2854_v8 = vmax.f32 %v5484_v12, %v2790_v46  ;;  %v2778_v12 = vmul.f32 0.2, %v5423_v53 }
 0x508   : > { %2771 = vmatmul.f32.gmra.mxu3 %v6141_v3  ;;  %v2594_v3 = vadd.f32 %v5376_v25, %v2481_v4  ;;  %v2868_v11 = vmax.f32 %v2722_v45, %v2804_v29  ;;  %v2862_v25 = vmax.f32 %v2713_v62, %v2798_v47  ;;  %v2792_v19 = vmul.f32 0.2, %v2704_v10  ;;  %v2528_v4 = vpop.f32.mrf.mxu1 }
 0x509   : > { %v2860_v45 = vmax.f32 %v2710_v40, %v2796_v24 }
 0x50a   : > { %v2707_v32 = vadd.f32 %v2706_v43, %v2594_v3  ;;  %v2856_v0 = vmax.f32 %v2704_v10, %v2792_v19 }
 0x50b   : > { %v2724_v55 = vpop.f32.mrf.mxu3 }
 0x50c   : > { %v2725_v38 = vadd.f32 %v2724_v55, %v2612_v15  ;;  %v2794_v41 = vmul.f32 0.2, %v2707_v32 }
 0x50e   : > { %v2806_v60 = vmul.f32 0.2, %v2725_v38  ;;  %v2858_v43 = vmax.f32 %v2707_v32, %v2794_v41 }
 0x510   : > { %v2870_v22 = vmax.f32 %v2725_v38, %v2806_v60  ;;  %v2531_v17 = vpop.f32.mrf.mxu1 }
 0x512   : > { %2956 = vmatpush.msrb.mxu2 %v2870_v22 }
 0x513   : > { %v2727_v49 = vpop.f32.mrf.mxu3 }
 0x514   : > { %v5530_v15 = vadd.f32 %v2727_v49, %v5411_v18  ;;  %2957 = vmatpush.msrb.mxu2 %v2868_v11  ;;  %v2788_v18 = vmul.f32 0.2, %v5477_v37 }
 0x516   : > { %2958 = vmatpush.msrb.mxu2 %v2866_v20  ;;  %v2852_v44 = vmax.f32 %v5477_v37, %v2788_v18  ;;  %v2776_v37 = vmul.f32 0.2, %v5414_v1 }
 0x518   : > { %2959 = vmatpush.msrb.mxu2 %v2864_v28  ;;  %v2840_v35 = vmax.f32 %v5414_v1, %v2776_v37  ;;  %v2641_v1 = vpop.f32.mrf.mxu2  ;;  %v2534_v3 = vpop.f32.mrf.mxu1 }
 0x51a   : > { %2960 = vmatpush.msrb.mxu2 %v2862_v25  ;;  %v6153_v25 = vld [vmem:[#allocation59_spill] sm:$0xff] }
 0x51b   : > { %v2730_v50 = vpop.f32.mrf.mxu3 }
 0x51c   : > { %v5534_v55 = vadd.f32 %v2730_v50, %v5420_v34  ;;  %2961 = vmatpush.msrb.mxu2 %v2860_v45  ;;  %v2850_v34 = vmax.f32 %v5470_v36, %v2786_v48  ;;  %v6154_v50 = vld [vmem:[#allocation55_spill] sm:$0xff] }
 0x51d   : > { %v6156_v48 = vld [vmem:[#allocation51_spill] sm:$0xff] }
 0x51e   : > { %2962 = vmatpush.msrb.mxu2 %v2858_v43  ;;  %v6155_v43 = vld [vmem:[#allocation42_spill] sm:$0xff] }
 0x520   : > { %2963 = vmatpush.msrb.mxu2 %v2856_v0  ;;  %v2644_v2 = vpop.f32.mrf.mxu2  ;;  %v2537_v11 = vpop.f32.mrf.mxu1 }
 0x522   : > { %2964 = vmatpush.msrb.mxu2 %v2854_v8 }
 0x523   : > { %v2733_v38 = vpop.f32.mrf.mxu3 }
 0x524   : > { %v5544_v16 = vadd.f32 %v2733_v38, %v5435_v54  ;;  %2965 = vmatpush.msrb.mxu2 %v2852_v44  ;;  %v2842_v54 = vmax.f32 %v5423_v53, %v2778_v12  ;;  %v6157_v38 = vld [vmem:[#allocation71_spill] sm:$0xff] }
 0x525   : > { %v6158_v12 = vld [vmem:[#allocation67_spill] sm:$0xff] }
 0x526   : > { %2966 = vmatpush.msrb.mxu2 %v2850_v34 }
 0x528   : > { %2967 = vmatpush.msrb.mxu2 %v2848_v13  ;;  %v2647_v40 = vpop.f32.mrf.mxu2  ;;  %v2540_v47 = vpop.f32.mrf.mxu1 }
 0x52a   : > { %2968 = vmatpush.msrb.mxu2 %v2846_v9 }
 0x52b   : > { %v2736_v36 = vpop.f32.mrf.mxu3 }
 0x52c   : > { %v5554_v39 = vadd.f32 %v2736_v36, %v5449_v56  ;;  %2969 = vmatpush.msrb.mxu2 %v2844_v63 }
 0x52e   : > { %2970 = vmatpush.msrb.mxu2 %v2842_v54 }
 0x530   : > { %2971 = vmatpush.msrb.mxu2 %v2840_v35  ;;  %v2650_v23 = vpop.f32.mrf.mxu2  ;;  %v2543_v24 = vpop.f32.mrf.mxu1  ;;  %v6159_v35 = vld [vmem:[#allocation63_spill] sm:$0xff] }
 0x531   : > { %2972 = vmatmul.f32.vlgmr.msrb.gmra.mxu2 %v2912_v21  ;;  %v2418_v21 = vpop.f32.mrf.mxu0 }
 0x532   : > { %v2419_v9 = vadd.f32 %v2418_v21, %v6158_v12 }
 0x533   : > { %v2739_v58 = vpop.f32.mrf.mxu3 }
 0x534   : > { %v5560_v29 = vadd.f32 %v2739_v58, %v5460_v33  ;;  %v2416_v58 = vadd.f32 %v2415_v51, %v6159_v35 }
 0x538   : > { %v2546_v0 = vpop.f32.mrf.mxu1 }
 0x53b   : > { %v2742_v61 = vpop.f32.mrf.mxu3 }
 0x53c   : > { %v5563_v60 = vadd.f32 %v2742_v61, %v5467_v30  ;;  %v2421_v30 = vpop.f32.mrf.mxu0 }
 0x53d   : > { %v2422_v14 = vadd.f32 %v2421_v30, %v6157_v38 }
 0x543   : > { %v2745_v53 = vpop.f32.mrf.mxu3 }
 0x544   : > { %v5566_v56 = vadd.f32 %v2745_v53, %v5474_v31  ;;  %v2424_v31 = vpop.f32.mrf.mxu0  ;;  %v2535_v53 = vadd.f32 %v2534_v3, %v2422_v14 }
 0x545   : > { %v2425_v8 = vadd.f32 %v2424_v31, %v6156_v48  ;;  %v2814_v48 = vmul.f32 0.2, %v5554_v39 }
 0x547   : > { %v2538_v37 = vadd.f32 %v2537_v11, %v2425_v8 }
 0x54b   : > { %v2748_v6 = vpop.f32.mrf.mxu3 }
 0x54c   : > { %v5569_v62 = vadd.f32 %v2748_v6, %v5481_v52  ;;  %v2427_v32 = vpop.f32.mrf.mxu0  ;;  %v2653_v52 = vpop.f32.mrf.mxu2  ;;  %v2651_v6 = vadd.f32 %v2650_v23, %v2538_v37 }
 0x54d   : > { %v2428_v46 = vadd.f32 %v2427_v32, %v6154_v50  ;;  %v2532_v32 = vadd.f32 %v2531_v17, %v2419_v9 }
 0x54f   : > { %v2541_v34 = vadd.f32 %v2540_v47, %v2428_v46  ;;  %v2818_v46 = vmul.f32 0.2, %v5563_v60 }
 0x551   : > { %v2654_v63 = vadd.f32 %v2653_v52, %v2541_v34  ;;  %v2882_v8 = vmax.f32 %v5563_v60, %v2818_v46 }
 0x553   : > { %v2751_v22 = vpop.f32.mrf.mxu3 }
 0x554   : > { %v5572_v33 = vadd.f32 %v2751_v22, %v5488_v27  ;;  %v2430_v10 = vpop.f32.mrf.mxu0  ;;  %v2656_v41 = vpop.f32.mrf.mxu2 }
 0x555   : > { %v2431_v19 = vadd.f32 %v2430_v10, %v6153_v25  ;;  %v2648_v10 = vadd.f32 %v2647_v40, %v2535_v53 }
 0x557   : > { %v2544_v59 = vadd.f32 %v2543_v24, %v2431_v19 }
 0x559   : > { %v2657_v13 = vadd.f32 %v2656_v41, %v2544_v59  ;;  %v2645_v41 = vadd.f32 %v2644_v2, %v2532_v32  ;;  %v2812_v59 = vmul.f32 0.2, %v5544_v16 }
 0x55b   : > { %v2754_v42 = vpop.f32.mrf.mxu3  ;;  %v2876_v38 = vmax.f32 %v5544_v16, %v2812_v59 }
 0x55c   : > { %v2433_v27 = vpop.f32.mrf.mxu0  ;;  %v2659_v44 = vpop.f32.mrf.mxu2 }
 0x55d   : > { %v2434_v18 = vadd.f32 %v2433_v27, %v6155_v43  ;;  %v2529_v27 = vadd.f32 %v2528_v4, %v2416_v58  ;;  %v2824_v4 = vmul.f32 0.2, %v5572_v33 }
 0x55f   : > { %v2547_v26 = vadd.f32 %v2546_v0, %v2434_v18  ;;  %v2642_v52 = vadd.f32 %v2641_v1, %v2529_v27  ;;  %v2822_v1 = vmul.f32 0.2, %v5569_v62  ;;  %v2816_v18 = vmul.f32 0.2, %v5560_v29 }
 0x561   : > { %v2660_v36 = vadd.f32 %v2659_v44, %v2547_v26  ;;  %v2755_v51 = vadd.f32 %v2754_v42, %v2642_v52  ;;  %v2888_v42 = vmax.f32 %v5572_v33, %v2824_v4  ;;  %v2886_v43 = vmax.f32 %v5569_v62, %v2822_v1 }
 0x562   : > { %v2880_v33 = vmax.f32 %v5560_v29, %v2816_v18  ;;  %v2810_v62 = vmul.f32 0.2, %v5534_v55  ;;  %v2878_v44 = vmax.f32 %v5554_v39, %v2814_v48  ;;  %v2908_v29 = vpop.permute.xlu0 %2907 }
 0x563   : > { %v2757_v7 = vpop.f32.mrf.mxu3  ;;  %v2826_v40 = vmul.f32 0.2, %v2755_v51  ;;  %v2910_v34 = vperm.slane %v2908_v29, 0 }
 0x564   : > { %v2758_v19 = vadd.f32 %v2757_v7, %v2645_v41  ;;  %v2874_v60 = vmax.f32 %v5534_v55, %v2810_v62  ;;  %v2933_v26 = vpop.f32.mrf.mxu0  ;;  %v3002_v55 = vlaneseq }
 0x565   : > { %v2890_v7 = vmax.f32 %v2755_v51, %v2826_v40  ;;  %v2934_v12 = vadd.f32 %v2933_v26, %v2910_v34 }
 0x566   : > { %vm3004_vm1 = vcmp.lt.s32.totalorder %v3002_v55, 256 }
 0x56b   : > { %v2760_v49 = vpop.f32.mrf.mxu3 }
 0x56c   : > { %v2761_v25 = vadd.f32 %v2760_v49, %v2648_v10  ;;  %v2820_v49 = vmul.f32 0.2, %v5566_v56 }
 0x56e   : > { %v2830_v3 = vmul.f32 0.2, %v2761_v25  ;;  %v2884_v0 = vmax.f32 %v5566_v56, %v2820_v49  ;;  %v2808_v56 = vmul.f32 0.2, %v5530_v15 }
 0x570   : > { %v2872_v14 = vmax.f32 %v5530_v15, %v2808_v56 }
 0x573   : > { %v2763_v20 = vpop.f32.mrf.mxu3 }
 0x574   : > { %v2764_v24 = vadd.f32 %v2763_v20, %v2651_v6  ;;  %v2894_v20 = vmax.f32 %v2761_v25, %v2830_v3 }
 0x57b   : > { %v2766_v28 = vpop.f32.mrf.mxu3 }
 0x57c   : > { %v2767_v22 = vadd.f32 %v2766_v28, %v2654_v63  ;;  %v2828_v28 = vmul.f32 0.2, %v2758_v19 }
 0x57e   : > { %v2834_v21 = vmul.f32 0.2, %v2767_v22  ;;  %v2892_v2 = vmax.f32 %v2758_v19, %v2828_v28 }
 0x580   : > { %v2898_v23 = vmax.f32 %v2767_v22, %v2834_v21 }
 0x583   : > { %v2769_v45 = vpop.f32.mrf.mxu3 }
 0x584   : > { %v2770_v54 = vadd.f32 %v2769_v45, %v2657_v13  ;;  %v2832_v45 = vmul.f32 0.2, %v2764_v24  ;;  %v2953_v13 = vpop.f32.mrf.mxu1 }
 0x585   : > { %v2954_v5 = vadd.f32 %v2953_v13, %v2934_v12 }
 0x586   : > { %v2836_v30 = vmul.f32 0.2, %v2770_v54  ;;  %v2896_v17 = vmax.f32 %v2764_v24, %v2832_v45 }
 0x588   : > { %v2900_v50 = vmax.f32 %v2770_v54, %v2836_v30 }
 0x58b   : > { %v2772_v61 = vpop.f32.mrf.mxu3 }
 0x58c   : > { %v2773_v31 = vadd.f32 %v2772_v61, %v2660_v36 }
 0x58e   : > { %v2838_v47 = vmul.f32 0.2, %v2773_v31 }
 0x590   : > { %v2902_v11 = vmax.f32 %v2773_v31, %v2838_v47 }
 0x592   : > { %2976 = vmatpush.msrb.mxu3 %v2902_v11 }
 0x594   : > { %2977 = vmatpush.msrb.mxu3 %v2900_v50 }
 0x596   : > { %2978 = vmatpush.msrb.mxu3 %v2898_v23 }
 0x598   : > { %2979 = vmatpush.msrb.mxu3 %v2896_v17 }
 0x59a   : > { %2980 = vmatpush.msrb.mxu3 %v2894_v20 }
 0x59c   : > { %2981 = vmatpush.msrb.mxu3 %v2892_v2 }
 0x59e   : > { %2982 = vmatpush.msrb.mxu3 %v2890_v7 }
 0x5a0   : > { %2983 = vmatpush.msrb.mxu3 %v2888_v42 }
 0x5a2   : > { %2984 = vmatpush.msrb.mxu3 %v2886_v43 }
 0x5a4   : > { %2985 = vmatpush.msrb.mxu3 %v2884_v0 }
 0x5a6   : > { %2986 = vmatpush.msrb.mxu3 %v2882_v8 }
 0x5a8   : > { %2987 = vmatpush.msrb.mxu3 %v2880_v33 }
 0x5aa   : > { %2988 = vmatpush.msrb.mxu3 %v2878_v44 }
 0x5ac   : > { %2989 = vmatpush.msrb.mxu3 %v2876_v38 }
 0x5ae   : > { %2990 = vmatpush.msrb.mxu3 %v2874_v60 }
 0x5b0   : > { %2991 = vmatpush.msrb.mxu3 %v2872_v14 }
 0x5b1   : > { %2992 = vmatmul.f32.vlgmr.msrb.gmra.mxu3 %v2913_v57 }
 0x5b4   : > { %v2973_v39 = vpop.f32.mrf.mxu2 }
 0x5b5   : > { %v2974_v16 = vadd.f32 %v2973_v39, %v2910_v34 }
 0x634   : > { %v2993_v15 = vpop.f32.mrf.mxu3 }
 0x635   : > { %v2994_v9 = vadd.f32 %v2993_v15, %v2974_v16 }
 0x637   : > { %v2998_v57 = vrot.slane %v2994_v9, 7 }
 0x639   : > { %v3000_v37 = vsel %vm2999_vm0, %v2954_v5, %v2998_v57 }
 0x63a   : > { %3006 = vst.msk [vmem:[%s394_s16] sm:$0x3] %vm3004_vm1, %v3000_v37 }
 0x63b   : > { %3318 = shalt.err (!%p3315_p9)
}
 0x63c   : > { %3136 = dma.vmem_to_hbm [thread:$0]  (%p3456_p6), %s3021_s17, 32, %s3023_s19, %s3008_s6  }
 0x63d PF: > { %s3034_s23 = sand.u32 1, %s3349_s26   ;;  %p3146_p11 = pnand %p3114_p1, %p3462_p10 }
 0x63e   : > { %s3035_s30 = scalar_lea.sflag [#allocation6], %s3034_s23 }
 0x63f   : > { %p3147_p12 = pneg %p3146_p11 }
 0x641   : > { %3344 = dma.done.wait (%p3147_p12), %s3035_s30, 32  }
 0x642   : > { %3346 = vsyncadd (%p3147_p12), %s3035_s30, 4294967264  ;;  %p21_p13 = scmp.ge.s32.totalorder %s3438_s8, 4   ;;  %s6160_s26 = smov %s3353_s27 }
 0x643   : > { %s6161_s27 = smov %s3357_s28  ;;  %s6162_s28 = smov %s3450_s11 }
 0x644   : > { %s6163_s29 = smov %s3438_s8  ;;  %23 = sbr.rel (!%p21_p13) target bundleno = 8 (0x8), region = 120 }
 0x649   :  { %3041 = vsyncpa [#allocation5], 1 }
 0x64a   :  { %3043 = vsyncpa [#allocation5 + $0x1], 1 }
 0x64b   :  { %3044 = vsyncpa [#allocation8], 1 }
 0x64c   :  { %3045 = vsyncpa [#allocation6], 1 }
 0x64d   :  { %3047 = vsyncpa [#allocation6 + $0x1], 1 }

</bundles_post_ra>
